<compile_context>
chip_gen: v5e
topology: v5e:2x2
jax: 0.10.0
libtpu: 0.0.40
codegen_flags: <defaults>
</compile_context>

<pallas_src>
import functools

import jax
import jax.numpy as jnp
from jax import lax
from jax.experimental import pallas as pl
from jax.experimental.pallas import tpu as pltpu

EPS = 1e-5


# ----------------------------------------------------------------------------
# Pallas kernels
# ----------------------------------------------------------------------------
def _conv_stack_kernel(p1_ref, w1_ref, t1_ref, smat_ref, w2_ref, t2_ref,
                       o_ref, *, m2):
    """conv1+bn1+relu -> maxpool(2,2) -> conv2+bn2+relu, fused in VMEM.

    p1_ref  : (4*m2, 9*Cin) bf16  im2col patches, rows ordered (pool_tap,b,hc,wc)
    w1_ref  : (9*Cin, 16)   bf16  conv1 weight (bn1 scale pre-folded)
    t1_ref  : (1, 16)       f32   conv1 bias + bn1 shift
    smat_ref: (9, m2, m2)   bf16  0/1 selection matrix per 3x3 tap (shift + zero pad)
    w2_ref  : (9, 16, 32)   bf16  conv2 weight per tap (bn2 scale pre-folded)
    t2_ref  : (1, 32)       f32   conv2 bias + bn2 shift
    o_ref   : (m2, 32)      bf16  conv2 output, rows ordered (b, hc, wc)
    """
    # conv1 (im2col matmul) + bn1 + relu
    y1 = jnp.dot(p1_ref[...], w1_ref[...], preferred_element_type=jnp.float32)
    y1 = jnp.maximum(y1 + t1_ref[...], 0.0)                        # (4*m2, 16)

    # MaxPool2d(2, 2): elementwise max over the four pool-tap row blocks.
    pooled = jnp.maximum(jnp.maximum(y1[0 * m2:1 * m2], y1[1 * m2:2 * m2]),
                         jnp.maximum(y1[2 * m2:3 * m2], y1[3 * m2:4 * m2]))
    pooled = pooled.astype(jnp.bfloat16)                           # (m2, 16)

    # conv2 + bn2 + relu: 3x3 taps as selection-matrix matmuls (MXU only).
    acc = jnp.zeros((m2, 32), jnp.float32)
    for tap in range(9):
        gathered = jnp.dot(smat_ref[tap], pooled,
                           preferred_element_type=jnp.float32)     # (m2, 16)
        acc = acc + jnp.dot(gathered.astype(jnp.bfloat16), w2_ref[tap],
                            preferred_element_type=jnp.float32)    # (m2, 32)
    y2 = jnp.maximum(acc + t2_ref[...], 0.0)
    o_ref[...] = y2.astype(o_ref.dtype)


def _fc_stack_kernel(x_ref, w1_ref, t1_ref, w2_ref, b2_ref, o_ref):
    """fc1+bn_fc1+relu -> fc2, fused (both weights resident in VMEM).

    x_ref : (B, Hc*Wc*32)  bf16  NHWC-flattened conv features (lane dense)
    w1_ref: (Hc*Wc*32, 64) bf16  fc1 weight, rows permuted to NHWC order,
                                 bn_fc1 scale pre-folded
    t1_ref: (1, 64)        f32   fc1 bias + bn_fc1 shift
    w2_ref: (64, out_dim)  bf16  fc2 weight (pre-transposed)
    b2_ref: (1, out_dim)   f32   fc2 bias
    """
    h = jnp.dot(x_ref[...], w1_ref[...], preferred_element_type=jnp.float32)
    h = jnp.maximum(h + t1_ref[...], 0.0)
    out = jnp.dot(h.astype(jnp.bfloat16), w2_ref[...],
                  preferred_element_type=jnp.float32) + b2_ref[...]
    o_ref[...] = out.astype(o_ref.dtype)


# ----------------------------------------------------------------------------
# pallas_call wrappers (single block: all operands fit VMEM at these shapes;
# for much larger batch, tile the row dimension over a "parallel" grid axis so
# v7x's two TensorCores can be used).
# ----------------------------------------------------------------------------
def conv_stack(p1, w1, t1, smat, w2, t2, *, m2):
    kern = functools.partial(_conv_stack_kernel, m2=m2)
    n_taps = smat.shape[0]
    flops = 2 * (p1.shape[0] * p1.shape[1] * 16
                 + n_taps * (m2 * m2 * 16 + m2 * 16 * 32))
    bytes_accessed = sum(int(a.size) * a.dtype.itemsize
                         for a in (p1, w1, t1, smat, w2, t2)) + m2 * 32 * 2
    return pl.pallas_call(
        kern,
        out_shape=jax.ShapeDtypeStruct((m2, 32), jnp.bfloat16),
        grid=(1,),
        in_specs=[
            pl.BlockSpec(p1.shape, lambda i: (0, 0)),
            pl.BlockSpec(w1.shape, lambda i: (0, 0)),
            pl.BlockSpec(t1.shape, lambda i: (0, 0)),
            pl.BlockSpec(smat.shape, lambda i: (0, 0, 0)),
            pl.BlockSpec(w2.shape, lambda i: (0, 0, 0)),
            pl.BlockSpec(t2.shape, lambda i: (0, 0)),
        ],
        out_specs=pl.BlockSpec((m2, 32), lambda i: (0, 0)),
        compiler_params=pltpu.CompilerParams(
            dimension_semantics=("arbitrary",)),
        cost_estimate=pl.CostEstimate(flops=flops, transcendentals=0,
                                      bytes_accessed=bytes_accessed),
    )(p1, w1, t1, smat, w2, t2)


def fc_stack(feat, w1, t1, w2, b2):
    B, K = feat.shape
    N1 = w1.shape[1]
    N2 = w2.shape[1]
    flops = 2 * (B * K * N1 + B * N1 * N2)
    bytes_accessed = sum(int(a.size) * a.dtype.itemsize
                         for a in (feat, w1, t1, w2, b2)) + B * N2 * 4
    return pl.pallas_call(
        _fc_stack_kernel,
        out_shape=jax.ShapeDtypeStruct((B, N2), jnp.float32),
        grid=(1,),
        in_specs=[
            pl.BlockSpec((B, K), lambda i: (0, 0)),
            pl.BlockSpec((K, N1), lambda i: (0, 0)),
            pl.BlockSpec((1, N1), lambda i: (0, 0)),
            pl.BlockSpec((N1, N2), lambda i: (0, 0)),
            pl.BlockSpec((1, N2), lambda i: (0, 0)),
        ],
        out_specs=pl.BlockSpec((B, N2), lambda i: (0, 0)),
        compiler_params=pltpu.CompilerParams(
            dimension_semantics=("arbitrary",)),
        cost_estimate=pl.CostEstimate(flops=flops, transcendentals=0,
                                      bytes_accessed=bytes_accessed),
    )(feat, w1, t1, w2, b2)


# ----------------------------------------------------------------------------
# JAX glue: im2col (pool-tap-major row order), selection matrices, BN folding
# ----------------------------------------------------------------------------
def _im2col_pool_major(x_nhwc):
    """(B,H,W,C) -> (4*B*Hc*Wc, 9*C) bf16.

    Rows are ordered (pool_tap=py*2+px, b, hc, wc) so the 2x2 pool is a max
    over four contiguous row blocks; columns are ordered (ky, kx, cin) and
    match the conv-weight repack below.
    """
    B, H, W, C = x_nhwc.shape
    Hc, Wc = H // 2, W // 2
    xp = jnp.pad(x_nhwc, ((0, 0), (1, 1), (1, 1), (0, 0)))
    taps = [xp[:, ky:ky + H, kx:kx + W, :] for ky in range(3) for kx in range(3)]
    patches = jnp.stack(taps, axis=3).reshape(B, H, W, 9 * C)
    patches = patches.reshape(B, Hc, 2, Wc, 2, 9 * C)
    patches = jnp.transpose(patches, (2, 4, 0, 1, 3, 5))    # (py,px,B,Hc,Wc,9C)
    return patches.reshape(4 * B * Hc * Wc, 9 * C).astype(jnp.bfloat16)


def _pool_shift_matrices(batch, hc, wc):
    """(9, m2, m2) bf16 0/1 matrices: S_tap @ pooled gathers the 3x3 neighbour
    (with zero padding) of every pooled-grid row for conv2."""
    m2 = batch * hc * wc
    r = jnp.arange(m2)
    b_i = r // (hc * wc)
    h_i = (r // wc) % hc
    w_i = r % wc
    cols = jnp.arange(m2)[None, :]
    mats = []
    for dy in (-1, 0, 1):
        for dx in (-1, 0, 1):
            hs, ws = h_i + dy, w_i + dx
            valid = (hs >= 0) & (hs < hc) & (ws >= 0) & (ws < wc)
            src = (b_i * hc + jnp.clip(hs, 0, hc - 1)) * wc + jnp.clip(ws, 0, wc - 1)
            mats.append(((cols == src[:, None]) & valid[:, None])
                        .astype(jnp.bfloat16))
    return jnp.stack(mats, axis=0)


def prepare_params(params, height, width, batch):
    """One-time (outside jit) repack: fold BN scales into weights, biases + BN
    shifts into per-column adds, pre-transpose / pre-permute weights, cast to
    bf16 for the MXU."""
    hc, wc = height // 2, width // 2
    p = {}

    # input BatchNorm2d affine (applied in glue, before conv1's zero padding).
    a_in = params["in_gamma"] * lax.rsqrt(params["in_var"] + EPS)
    p["in_scale"] = a_in.astype(jnp.float32)
    p["in_shift"] = (params["in_beta"] - params["in_mean"] * a_in).astype(jnp.float32)

    # conv1 + bn1
    s1 = params["bn1_gamma"] * lax.rsqrt(params["bn1_var"] + EPS)
    w1 = jnp.transpose(params["conv1_w"], (2, 3, 1, 0)).reshape(-1, 16)
    p["w1"] = (w1 * s1[None, :]).astype(jnp.bfloat16)
    p["t1"] = ((params["conv1_b"] - params["bn1_mean"]) * s1
               + params["bn1_beta"]).reshape(1, 16).astype(jnp.float32)

    # conv2 + bn2 (per-tap (cin, cout) weights, tap = ky*3+kx)
    s2 = params["bn2_gamma"] * lax.rsqrt(params["bn2_var"] + EPS)
    w2 = jnp.transpose(params["conv2_w"], (2, 3, 1, 0)).reshape(9, 16, 32)
    p["w2"] = (w2 * s2[None, None, :]).astype(jnp.bfloat16)
    p["t2"] = ((params["conv2_b"] - params["bn2_mean"]) * s2
               + params["bn2_beta"]).reshape(1, 32).astype(jnp.float32)

    # 3x3 neighbourhood selection matrices for the pooled grid.
    p["smat"] = _pool_shift_matrices(batch, hc, wc)

    # fc1 + bn_fc1: permute columns NCHW-flat -> NHWC-flat, transpose to (in,out)
    # so the kernel consumes the NHWC-flattened conv features directly.
    s3 = params["bnfc_gamma"] * lax.rsqrt(params["bnfc_var"] + EPS)
    fc1 = params["fc1_w"].reshape(64, 32, hc, wc)
    fc1 = jnp.transpose(fc1, (2, 3, 1, 0)).reshape(hc * wc * 32, 64)
    p["w_fc1"] = (fc1 * s3[None, :]).astype(jnp.bfloat16)
    p["t_fc1"] = ((params["fc1_b"] - params["bnfc_mean"]) * s3
                  + params["bnfc_beta"]).reshape(1, 64).astype(jnp.float32)

    # fc2
    p["w_fc2"] = params["fc2_w"].T.astype(jnp.bfloat16)
    p["b_fc2"] = params["fc2_b"].reshape(1, -1).astype(jnp.float32)
    return p


# ----------------------------------------------------------------------------
# Parameters (deterministic, matching nn.Module shapes)
# ----------------------------------------------------------------------------
def init_params(key, input_channels, height, width, output_dim):
    ks = jax.random.split(key, 12)
    c_in = input_channels
    conv_out = 32 * (height // 2) * (width // 2)
    p = {
        "in_gamma": 1.0 + 0.1 * jax.random.normal(ks[0], (c_in,)),
        "in_beta": 0.1 * jax.random.normal(ks[1], (c_in,)),
        "in_mean": jnp.zeros((c_in,)),
        "in_var": jnp.ones((c_in,)),
        "conv1_w": 0.1 * jax.random.normal(ks[2], (16, c_in, 3, 3)),
        "conv1_b": 0.1 * jax.random.normal(ks[3], (16,)),
        "bn1_gamma": 1.0 + 0.1 * jax.random.normal(ks[4], (16,)),
        "bn1_beta": 0.1 * jax.random.normal(ks[5], (16,)),
        "bn1_mean": jnp.zeros((16,)),
        "bn1_var": jnp.ones((16,)),
        "conv2_w": 0.1 * jax.random.normal(ks[6], (32, 16, 3, 3)),
        "conv2_b": 0.1 * jax.random.normal(ks[7], (32,)),
        "bn2_gamma": 1.0 + 0.1 * jax.random.normal(ks[8], (32,)),
        "bn2_beta": 0.1 * jax.random.normal(ks[9], (32,)),
        "bn2_mean": jnp.zeros((32,)),
        "bn2_var": jnp.ones((32,)),
        "fc1_w": 0.05 * jax.random.normal(ks[10], (64, conv_out)),
        "fc1_b": jnp.zeros((64,)),
        "bnfc_gamma": jnp.ones((64,)),
        "bnfc_beta": jnp.zeros((64,)),
        "bnfc_mean": jnp.zeros((64,)),
        "bnfc_var": jnp.ones((64,)),
        "fc2_w": 0.05 * jax.random.normal(ks[11], (output_dim, 64)),
        "fc2_b": jnp.zeros((output_dim,)),
    }
    return jax.tree_util.tree_map(lambda a: a.astype(jnp.float32), p)


# ----------------------------------------------------------------------------
# Forward pass (2 fused pallas_calls + thin XLA glue)
# ----------------------------------------------------------------------------
def cnn_forward(x, prep):
    """x: (B, C, H, W) float32 (PyTorch NCHW). prep: prepare_params output."""
    B, C, H, W = x.shape
    Hc, Wc = H // 2, W // 2
    m2 = B * Hc * Wc

    # input BatchNorm2d (eval).  Not folded into conv1 because the reference
    # zero-pads *after* this affine; XLA fuses it with the im2col gather.
    x = jnp.transpose(x, (0, 2, 3, 1))                      # NHWC
    x = x * prep["in_scale"] + prep["in_shift"]

    # fused conv1+bn1+relu -> maxpool(2,2) -> conv2+bn2+relu  (one launch)
    p1 = _im2col_pool_major(x)                              # (4*m2, 9*C) bf16
    y2 = conv_stack(p1, prep["w1"], prep["t1"], prep["smat"],
                    prep["w2"], prep["t2"], m2=m2)          # (m2, 32) bf16

    # NHWC flatten = free row-major reshape (lane-dense FC input); the fc1
    # weight rows were pre-permuted so this matches PyTorch's NCHW view(-1).
    feat = y2.reshape(B, Hc * Wc * 32)

    # Dropout2d / Dropout are identity in inference mode.
    # fused fc1+bn_fc1+relu -> fc2  (one launch)
    return fc_stack(feat, prep["w_fc1"], prep["t_fc1"],
                    prep["w_fc2"], prep["b_fc2"])


# ----------------------------------------------------------------------------
# Pure-JAX reference (f32) for correctness checking
# ----------------------------------------------------------------------------
def _bn_nchw(v, gamma, beta, mean, var):
    s = gamma / jnp.sqrt(var + EPS)
    return (v - mean[None, :, None, None]) * s[None, :, None, None] \
        + beta[None, :, None, None]


def reference_forward(x, params):
    B = x.shape[0]
    v = _bn_nchw(x, params["in_gamma"], params["in_beta"],
                 params["in_mean"], params["in_var"])
    v = lax.conv_general_dilated(v, params["conv1_w"], (1, 1), "SAME",
                                 dimension_numbers=("NCHW", "OIHW", "NCHW"))
    v = v + params["conv1_b"][None, :, None, None]
    v = jax.nn.relu(_bn_nchw(v, params["bn1_gamma"], params["bn1_beta"],
                             params["bn1_mean"], params["bn1_var"]))
    Bc, Cc, H, W = v.shape
    v = v.reshape(Bc, Cc, H // 2, 2, W // 2, 2).max(axis=(3, 5))
    v = lax.conv_general_dilated(v, params["conv2_w"], (1, 1), "SAME",
                                 dimension_numbers=("NCHW", "OIHW", "NCHW"))
    v = v + params["conv2_b"][None, :, None, None]
    v = jax.nn.relu(_bn_nchw(v, params["bn2_gamma"], params["bn2_beta"],
                             params["bn2_mean"], params["bn2_var"]))
    feat = v.reshape(B, -1)
    h = feat @ params["fc1_w"].T + params["fc1_b"]
    s = params["bnfc_gamma"] / jnp.sqrt(params["bnfc_var"] + EPS)
    h = jax.nn.relu((h - params["bnfc_mean"]) * s + params["bnfc_beta"])
    return h @ params["fc2_w"].T + params["fc2_b"]


# ----------------------------------------------------------------------------
# Main
# ----------------------------------------------------------------------------
if __name__ == "__main__":
    input_channels, height, width, output_dim = 4, 16, 16, 8
    batch = 2

    key = jax.random.PRNGKey(0)
    k_x, k_p = jax.random.split(key)
    x = jax.random.normal(k_x, (batch, input_channels, height, width), jnp.float32)
    params = init_params(k_p, input_channels, height, width, output_dim)

    # One-time host-side weight repack (outside jit).
    prep = prepare_params(params, height, width, batch)

    fwd = jax.jit(cnn_forward)
    out = jax.block_until_ready(fwd(x, prep))

    assert out.shape == (batch, output_dim), out.shape
    assert bool(jnp.all(jnp.isfinite(out)))

    # Correctness vs. pure-JAX f32 reference (kernels use bf16 MXU inputs,
    # so use a loose tolerance).
    ref = reference_forward(x, params)
    err = float(jnp.max(jnp.abs(out - ref)))
    scale = float(jnp.max(jnp.abs(ref)))
    assert err <= 0.05 + 0.05 * scale, (err, scale)

    print("KERNEL_OK")
</pallas_src>

<mosaic_0001>
module attributes {stable_mosaic.version = 11 : i64} {
  func.func @_conv_stack_kernel(%arg0: i32, %arg1: memref<512x36xbf16, #tpu.memory_space<vmem>>, %arg2: memref<36x16xbf16, #tpu.memory_space<vmem>>, %arg3: memref<1x16xf32, #tpu.memory_space<vmem>>, %arg4: memref<9x128x128xbf16, #tpu.memory_space<vmem>>, %arg5: memref<9x16x32xbf16, #tpu.memory_space<vmem>>, %arg6: memref<1x32xf32, #tpu.memory_space<vmem>>, %arg7: memref<128x32xbf16, #tpu.memory_space<vmem>>) attributes {dimension_semantics = [#tpu.dimension_semantics<arbitrary>], iteration_bounds = array<i64: 1>, scalar_prefetch = 0 : i64, scratch_operands = 0 : i64, tpu.core_type = #tpu.core_type<tc>, window_params = [{pipeline_mode = #tpu.pipeline_mode<synchronous>, transform_indices = @transform_0, window_bounds = array<i64: 512, 36>}, {pipeline_mode = #tpu.pipeline_mode<synchronous>, transform_indices = @transform_1, window_bounds = array<i64: 36, 16>}, {pipeline_mode = #tpu.pipeline_mode<synchronous>, transform_indices = @transform_2, window_bounds = array<i64: 1, 16>}, {pipeline_mode = #tpu.pipeline_mode<synchronous>, transform_indices = @transform_3, window_bounds = array<i64: 9, 128, 128>}, {pipeline_mode = #tpu.pipeline_mode<synchronous>, transform_indices = @transform_4, window_bounds = array<i64: 9, 16, 32>}, {pipeline_mode = #tpu.pipeline_mode<synchronous>, transform_indices = @transform_5, window_bounds = array<i64: 1, 32>}, {pipeline_mode = #tpu.pipeline_mode<synchronous>, transform_indices = @transform_6, window_bounds = array<i64: 128, 32>}]} {
    %c0 = arith.constant 0 : index
    %c0_0 = arith.constant 0 : index
    %0 = vector.load %arg1[%c0, %c0_0] : memref<512x36xbf16, #tpu.memory_space<vmem>>, vector<512x36xbf16>
    %c0_1 = arith.constant 0 : index
    %c0_2 = arith.constant 0 : index
    %1 = vector.load %arg2[%c0_1, %c0_2] : memref<36x16xbf16, #tpu.memory_space<vmem>>, vector<36x16xbf16>
    %cst = arith.constant dense<0.000000e+00> : vector<512x16xf32>
    %2 = tpu.matmul %0, %1, %cst {dimension_numbers = #tpu.dot_dimension_numbers<[1], [0], [0], [1], [0, 0, 1, 1], [], []>} : vector<512x36xbf16>, vector<36x16xbf16>, vector<512x16xf32> -> vector<512x16xf32>
    %c0_3 = arith.constant 0 : index
    %c0_4 = arith.constant 0 : index
    %3 = vector.load %arg3[%c0_3, %c0_4] : memref<1x16xf32, #tpu.memory_space<vmem>>, vector<1x16xf32>
    %4 = vector.broadcast %3 : vector<1x16xf32> to vector<512x16xf32>
    %5 = arith.addf %2, %4 : vector<512x16xf32>
    %cst_5 = arith.constant 0.000000e+00 : f32
    %6 = vector.broadcast %cst_5 : f32 to vector<512x16xf32>
    %7 = arith.maximumf %5, %6 : vector<512x16xf32>
    %8 = vector.extract_strided_slice %7 {offsets = [0, 0], sizes = [128, 16], strides = [1, 1]} : vector<512x16xf32> to vector<128x16xf32>
    %9 = vector.extract_strided_slice %7 {offsets = [128, 0], sizes = [128, 16], strides = [1, 1]} : vector<512x16xf32> to vector<128x16xf32>
    %10 = arith.maximumf %8, %9 : vector<128x16xf32>
    %11 = vector.extract_strided_slice %7 {offsets = [256, 0], sizes = [128, 16], strides = [1, 1]} : vector<512x16xf32> to vector<128x16xf32>
    %12 = vector.extract_strided_slice %7 {offsets = [384, 0], sizes = [128, 16], strides = [1, 1]} : vector<512x16xf32> to vector<128x16xf32>
    %13 = arith.maximumf %11, %12 : vector<128x16xf32>
    %14 = arith.maximumf %10, %13 : vector<128x16xf32>
    %15 = arith.truncf %14 : vector<128x16xf32> to vector<128x16xbf16>
    %cst_6 = arith.constant 0.000000e+00 : f32
    %16 = vector.broadcast %cst_6 : f32 to vector<128x32xf32>
    %c0_7 = arith.constant 0 : index
    %c0_8 = arith.constant 0 : index
    %c0_9 = arith.constant 0 : index
    %17 = vector.load %arg4[%c0_7, %c0_8, %c0_9] : memref<9x128x128xbf16, #tpu.memory_space<vmem>>, vector<1x128x128xbf16>
    %18 = vector.shape_cast %17 : vector<1x128x128xbf16> to vector<128x128xbf16>
    %cst_10 = arith.constant dense<0.000000e+00> : vector<128x16xf32>
    %19 = tpu.matmul %18, %15, %cst_10 {dimension_numbers = #tpu.dot_dimension_numbers<[1], [0], [0], [1], [0, 0, 1, 1], [], []>} : vector<128x128xbf16>, vector<128x16xbf16>, vector<128x16xf32> -> vector<128x16xf32>
    %20 = arith.truncf %19 : vector<128x16xf32> to vector<128x16xbf16>
    %c0_11 = arith.constant 0 : index
    %c0_12 = arith.constant 0 : index
    %c0_13 = arith.constant 0 : index
    %21 = vector.load %arg5[%c0_11, %c0_12, %c0_13] : memref<9x16x32xbf16, #tpu.memory_space<vmem>>, vector<1x16x32xbf16>
    %22 = vector.shape_cast %21 : vector<1x16x32xbf16> to vector<16x32xbf16>
    %cst_14 = arith.constant dense<0.000000e+00> : vector<128x32xf32>
    %23 = tpu.matmul %20, %22, %cst_14 {dimension_numbers = #tpu.dot_dimension_numbers<[1], [0], [0], [1], [0, 0, 1, 1], [], []>} : vector<128x16xbf16>, vector<16x32xbf16>, vector<128x32xf32> -> vector<128x32xf32>
    %24 = arith.addf %16, %23 : vector<128x32xf32>
    %c1 = arith.constant 1 : index
    %c0_15 = arith.constant 0 : index
    %c0_16 = arith.constant 0 : index
    %25 = vector.load %arg4[%c1, %c0_15, %c0_16] : memref<9x128x128xbf16, #tpu.memory_space<vmem>>, vector<1x128x128xbf16>
    %26 = vector.shape_cast %25 : vector<1x128x128xbf16> to vector<128x128xbf16>
    %cst_17 = arith.constant dense<0.000000e+00> : vector<128x16xf32>
    %27 = tpu.matmul %26, %15, %cst_17 {dimension_numbers = #tpu.dot_dimension_numbers<[1], [0], [0], [1], [0, 0, 1, 1], [], []>} : vector<128x128xbf16>, vector<128x16xbf16>, vector<128x16xf32> -> vector<128x16xf32>
    %28 = arith.truncf %27 : vector<128x16xf32> to vector<128x16xbf16>
    %c1_18 = arith.constant 1 : index
    %c0_19 = arith.constant 0 : index
    %c0_20 = arith.constant 0 : index
    %29 = vector.load %arg5[%c1_18, %c0_19, %c0_20] : memref<9x16x32xbf16, #tpu.memory_space<vmem>>, vector<1x16x32xbf16>
    %30 = vector.shape_cast %29 : vector<1x16x32xbf16> to vector<16x32xbf16>
    %cst_21 = arith.constant dense<0.000000e+00> : vector<128x32xf32>
    %31 = tpu.matmul %28, %30, %cst_21 {dimension_numbers = #tpu.dot_dimension_numbers<[1], [0], [0], [1], [0, 0, 1, 1], [], []>} : vector<128x16xbf16>, vector<16x32xbf16>, vector<128x32xf32> -> vector<128x32xf32>
    %32 = arith.addf %24, %31 : vector<128x32xf32>
    %c2 = arith.constant 2 : index
    %c0_22 = arith.constant 0 : index
    %c0_23 = arith.constant 0 : index
    %33 = vector.load %arg4[%c2, %c0_22, %c0_23] : memref<9x128x128xbf16, #tpu.memory_space<vmem>>, vector<1x128x128xbf16>
    %34 = vector.shape_cast %33 : vector<1x128x128xbf16> to vector<128x128xbf16>
    %cst_24 = arith.constant dense<0.000000e+00> : vector<128x16xf32>
    %35 = tpu.matmul %34, %15, %cst_24 {dimension_numbers = #tpu.dot_dimension_numbers<[1], [0], [0], [1], [0, 0, 1, 1], [], []>} : vector<128x128xbf16>, vector<128x16xbf16>, vector<128x16xf32> -> vector<128x16xf32>
    %36 = arith.truncf %35 : vector<128x16xf32> to vector<128x16xbf16>
    %c2_25 = arith.constant 2 : index
    %c0_26 = arith.constant 0 : index
    %c0_27 = arith.constant 0 : index
    %37 = vector.load %arg5[%c2_25, %c0_26, %c0_27] : memref<9x16x32xbf16, #tpu.memory_space<vmem>>, vector<1x16x32xbf16>
    %38 = vector.shape_cast %37 : vector<1x16x32xbf16> to vector<16x32xbf16>
    %cst_28 = arith.constant dense<0.000000e+00> : vector<128x32xf32>
    %39 = tpu.matmul %36, %38, %cst_28 {dimension_numbers = #tpu.dot_dimension_numbers<[1], [0], [0], [1], [0, 0, 1, 1], [], []>} : vector<128x16xbf16>, vector<16x32xbf16>, vector<128x32xf32> -> vector<128x32xf32>
    %40 = arith.addf %32, %39 : vector<128x32xf32>
    %c3 = arith.constant 3 : index
    %c0_29 = arith.constant 0 : index
    %c0_30 = arith.constant 0 : index
    %41 = vector.load %arg4[%c3, %c0_29, %c0_30] : memref<9x128x128xbf16, #tpu.memory_space<vmem>>, vector<1x128x128xbf16>
    %42 = vector.shape_cast %41 : vector<1x128x128xbf16> to vector<128x128xbf16>
    %cst_31 = arith.constant dense<0.000000e+00> : vector<128x16xf32>
    %43 = tpu.matmul %42, %15, %cst_31 {dimension_numbers = #tpu.dot_dimension_numbers<[1], [0], [0], [1], [0, 0, 1, 1], [], []>} : vector<128x128xbf16>, vector<128x16xbf16>, vector<128x16xf32> -> vector<128x16xf32>
    %44 = arith.truncf %43 : vector<128x16xf32> to vector<128x16xbf16>
    %c3_32 = arith.constant 3 : index
    %c0_33 = arith.constant 0 : index
    %c0_34 = arith.constant 0 : index
    %45 = vector.load %arg5[%c3_32, %c0_33, %c0_34] : memref<9x16x32xbf16, #tpu.memory_space<vmem>>, vector<1x16x32xbf16>
    %46 = vector.shape_cast %45 : vector<1x16x32xbf16> to vector<16x32xbf16>
    %cst_35 = arith.constant dense<0.000000e+00> : vector<128x32xf32>
    %47 = tpu.matmul %44, %46, %cst_35 {dimension_numbers = #tpu.dot_dimension_numbers<[1], [0], [0], [1], [0, 0, 1, 1], [], []>} : vector<128x16xbf16>, vector<16x32xbf16>, vector<128x32xf32> -> vector<128x32xf32>
    %48 = arith.addf %40, %47 : vector<128x32xf32>
    %c4 = arith.constant 4 : index
    %c0_36 = arith.constant 0 : index
    %c0_37 = arith.constant 0 : index
    %49 = vector.load %arg4[%c4, %c0_36, %c0_37] : memref<9x128x128xbf16, #tpu.memory_space<vmem>>, vector<1x128x128xbf16>
    %50 = vector.shape_cast %49 : vector<1x128x128xbf16> to vector<128x128xbf16>
    %cst_38 = arith.constant dense<0.000000e+00> : vector<128x16xf32>
    %51 = tpu.matmul %50, %15, %cst_38 {dimension_numbers = #tpu.dot_dimension_numbers<[1], [0], [0], [1], [0, 0, 1, 1], [], []>} : vector<128x128xbf16>, vector<128x16xbf16>, vector<128x16xf32> -> vector<128x16xf32>
    %52 = arith.truncf %51 : vector<128x16xf32> to vector<128x16xbf16>
    %c4_39 = arith.constant 4 : index
    %c0_40 = arith.constant 0 : index
    %c0_41 = arith.constant 0 : index
    %53 = vector.load %arg5[%c4_39, %c0_40, %c0_41] : memref<9x16x32xbf16, #tpu.memory_space<vmem>>, vector<1x16x32xbf16>
    %54 = vector.shape_cast %53 : vector<1x16x32xbf16> to vector<16x32xbf16>
    %cst_42 = arith.constant dense<0.000000e+00> : vector<128x32xf32>
    %55 = tpu.matmul %52, %54, %cst_42 {dimension_numbers = #tpu.dot_dimension_numbers<[1], [0], [0], [1], [0, 0, 1, 1], [], []>} : vector<128x16xbf16>, vector<16x32xbf16>, vector<128x32xf32> -> vector<128x32xf32>
    %56 = arith.addf %48, %55 : vector<128x32xf32>
    %c5 = arith.constant 5 : index
    %c0_43 = arith.constant 0 : index
    %c0_44 = arith.constant 0 : index
    %57 = vector.load %arg4[%c5, %c0_43, %c0_44] : memref<9x128x128xbf16, #tpu.memory_space<vmem>>, vector<1x128x128xbf16>
    %58 = vector.shape_cast %57 : vector<1x128x128xbf16> to vector<128x128xbf16>
    %cst_45 = arith.constant dense<0.000000e+00> : vector<128x16xf32>
    %59 = tpu.matmul %58, %15, %cst_45 {dimension_numbers = #tpu.dot_dimension_numbers<[1], [0], [0], [1], [0, 0, 1, 1], [], []>} : vector<128x128xbf16>, vector<128x16xbf16>, vector<128x16xf32> -> vector<128x16xf32>
    %60 = arith.truncf %59 : vector<128x16xf32> to vector<128x16xbf16>
    %c5_46 = arith.constant 5 : index
    %c0_47 = arith.constant 0 : index
    %c0_48 = arith.constant 0 : index
    %61 = vector.load %arg5[%c5_46, %c0_47, %c0_48] : memref<9x16x32xbf16, #tpu.memory_space<vmem>>, vector<1x16x32xbf16>
    %62 = vector.shape_cast %61 : vector<1x16x32xbf16> to vector<16x32xbf16>
    %cst_49 = arith.constant dense<0.000000e+00> : vector<128x32xf32>
    %63 = tpu.matmul %60, %62, %cst_49 {dimension_numbers = #tpu.dot_dimension_numbers<[1], [0], [0], [1], [0, 0, 1, 1], [], []>} : vector<128x16xbf16>, vector<16x32xbf16>, vector<128x32xf32> -> vector<128x32xf32>
    %64 = arith.addf %56, %63 : vector<128x32xf32>
    %c6 = arith.constant 6 : index
    %c0_50 = arith.constant 0 : index
    %c0_51 = arith.constant 0 : index
    %65 = vector.load %arg4[%c6, %c0_50, %c0_51] : memref<9x128x128xbf16, #tpu.memory_space<vmem>>, vector<1x128x128xbf16>
    %66 = vector.shape_cast %65 : vector<1x128x128xbf16> to vector<128x128xbf16>
    %cst_52 = arith.constant dense<0.000000e+00> : vector<128x16xf32>
    %67 = tpu.matmul %66, %15, %cst_52 {dimension_numbers = #tpu.dot_dimension_numbers<[1], [0], [0], [1], [0, 0, 1, 1], [], []>} : vector<128x128xbf16>, vector<128x16xbf16>, vector<128x16xf32> -> vector<128x16xf32>
    %68 = arith.truncf %67 : vector<128x16xf32> to vector<128x16xbf16>
    %c6_53 = arith.constant 6 : index
    %c0_54 = arith.constant 0 : index
    %c0_55 = arith.constant 0 : index
    %69 = vector.load %arg5[%c6_53, %c0_54, %c0_55] : memref<9x16x32xbf16, #tpu.memory_space<vmem>>, vector<1x16x32xbf16>
    %70 = vector.shape_cast %69 : vector<1x16x32xbf16> to vector<16x32xbf16>
    %cst_56 = arith.constant dense<0.000000e+00> : vector<128x32xf32>
    %71 = tpu.matmul %68, %70, %cst_56 {dimension_numbers = #tpu.dot_dimension_numbers<[1], [0], [0], [1], [0, 0, 1, 1], [], []>} : vector<128x16xbf16>, vector<16x32xbf16>, vector<128x32xf32> -> vector<128x32xf32>
    %72 = arith.addf %64, %71 : vector<128x32xf32>
    %c7 = arith.constant 7 : index
    %c0_57 = arith.constant 0 : index
    %c0_58 = arith.constant 0 : index
    %73 = vector.load %arg4[%c7, %c0_57, %c0_58] : memref<9x128x128xbf16, #tpu.memory_space<vmem>>, vector<1x128x128xbf16>
    %74 = vector.shape_cast %73 : vector<1x128x128xbf16> to vector<128x128xbf16>
    %cst_59 = arith.constant dense<0.000000e+00> : vector<128x16xf32>
    %75 = tpu.matmul %74, %15, %cst_59 {dimension_numbers = #tpu.dot_dimension_numbers<[1], [0], [0], [1], [0, 0, 1, 1], [], []>} : vector<128x128xbf16>, vector<128x16xbf16>, vector<128x16xf32> -> vector<128x16xf32>
    %76 = arith.truncf %75 : vector<128x16xf32> to vector<128x16xbf16>
    %c7_60 = arith.constant 7 : index
    %c0_61 = arith.constant 0 : index
    %c0_62 = arith.constant 0 : index
    %77 = vector.load %arg5[%c7_60, %c0_61, %c0_62] : memref<9x16x32xbf16, #tpu.memory_space<vmem>>, vector<1x16x32xbf16>
    %78 = vector.shape_cast %77 : vector<1x16x32xbf16> to vector<16x32xbf16>
    %cst_63 = arith.constant dense<0.000000e+00> : vector<128x32xf32>
    %79 = tpu.matmul %76, %78, %cst_63 {dimension_numbers = #tpu.dot_dimension_numbers<[1], [0], [0], [1], [0, 0, 1, 1], [], []>} : vector<128x16xbf16>, vector<16x32xbf16>, vector<128x32xf32> -> vector<128x32xf32>
    %80 = arith.addf %72, %79 : vector<128x32xf32>
    %c8 = arith.constant 8 : index
    %c0_64 = arith.constant 0 : index
    %c0_65 = arith.constant 0 : index
    %81 = vector.load %arg4[%c8, %c0_64, %c0_65] : memref<9x128x128xbf16, #tpu.memory_space<vmem>>, vector<1x128x128xbf16>
    %82 = vector.shape_cast %81 : vector<1x128x128xbf16> to vector<128x128xbf16>
    %cst_66 = arith.constant dense<0.000000e+00> : vector<128x16xf32>
    %83 = tpu.matmul %82, %15, %cst_66 {dimension_numbers = #tpu.dot_dimension_numbers<[1], [0], [0], [1], [0, 0, 1, 1], [], []>} : vector<128x128xbf16>, vector<128x16xbf16>, vector<128x16xf32> -> vector<128x16xf32>
    %84 = arith.truncf %83 : vector<128x16xf32> to vector<128x16xbf16>
    %c8_67 = arith.constant 8 : index
    %c0_68 = arith.constant 0 : index
    %c0_69 = arith.constant 0 : index
    %85 = vector.load %arg5[%c8_67, %c0_68, %c0_69] : memref<9x16x32xbf16, #tpu.memory_space<vmem>>, vector<1x16x32xbf16>
    %86 = vector.shape_cast %85 : vector<1x16x32xbf16> to vector<16x32xbf16>
    %cst_70 = arith.constant dense<0.000000e+00> : vector<128x32xf32>
    %87 = tpu.matmul %84, %86, %cst_70 {dimension_numbers = #tpu.dot_dimension_numbers<[1], [0], [0], [1], [0, 0, 1, 1], [], []>} : vector<128x16xbf16>, vector<16x32xbf16>, vector<128x32xf32> -> vector<128x32xf32>
    %88 = arith.addf %80, %87 : vector<128x32xf32>
    %c0_71 = arith.constant 0 : index
    %c0_72 = arith.constant 0 : index
    %89 = vector.load %arg6[%c0_71, %c0_72] : memref<1x32xf32, #tpu.memory_space<vmem>>, vector<1x32xf32>
    %90 = vector.broadcast %89 : vector<1x32xf32> to vector<128x32xf32>
    %91 = arith.addf %88, %90 : vector<128x32xf32>
    %cst_73 = arith.constant 0.000000e+00 : f32
    %92 = vector.broadcast %cst_73 : f32 to vector<128x32xf32>
    %93 = arith.maximumf %91, %92 : vector<128x32xf32>
    %94 = arith.truncf %93 : vector<128x32xf32> to vector<128x32xbf16>
    %c0_74 = arith.constant 0 : index
    %c0_75 = arith.constant 0 : index
    %95 = vector.load %arg7[%c0_74, %c0_75] : memref<128x32xbf16, #tpu.memory_space<vmem>>, vector<128x32xbf16>
    tpu.vector_store %arg7[%c0_74, %c0_75], %94 {strides = array<i32>} : memref<128x32xbf16, #tpu.memory_space<vmem>>, vector<128x32xbf16>,
    return
  }
  func.func @transform_0(%arg0: i32) -> (i32, i32) {
    %c0_i32 = arith.constant 0 : i32
    %c0_i32_0 = arith.constant 0 : i32
    %c0_i32_1 = arith.constant 0 : i32
    return %c0_i32, %c0_i32_0 : i32, i32
  }
  func.func @transform_1(%arg0: i32) -> (i32, i32) {
    %c0_i32 = arith.constant 0 : i32
    %c0_i32_0 = arith.constant 0 : i32
    %c0_i32_1 = arith.constant 0 : i32
    return %c0_i32, %c0_i32_0 : i32, i32
  }
  func.func @transform_2(%arg0: i32) -> (i32, i32) {
    %c0_i32 = arith.constant 0 : i32
    %c0_i32_0 = arith.constant 0 : i32
    %c0_i32_1 = arith.constant 0 : i32
    return %c0_i32, %c0_i32_0 : i32, i32
  }
  func.func @transform_3(%arg0: i32) -> (i32, i32, i32) {
    %c0_i32 = arith.constant 0 : i32
    %c0_i32_0 = arith.constant 0 : i32
    %c0_i32_1 = arith.constant 0 : i32
    %c0_i32_2 = arith.constant 0 : i32
    return %c0_i32, %c0_i32_0, %c0_i32_1 : i32, i32, i32
  }
  func.func @transform_4(%arg0: i32) -> (i32, i32, i32) {
    %c0_i32 = arith.constant 0 : i32
    %c0_i32_0 = arith.constant 0 : i32
    %c0_i32_1 = arith.constant 0 : i32
    %c0_i32_2 = arith.constant 0 : i32
    return %c0_i32, %c0_i32_0, %c0_i32_1 : i32, i32, i32
  }
  func.func @transform_5(%arg0: i32) -> (i32, i32) {
    %c0_i32 = arith.constant 0 : i32
    %c0_i32_0 = arith.constant 0 : i32
    %c0_i32_1 = arith.constant 0 : i32
    return %c0_i32, %c0_i32_0 : i32, i32
  }
  func.func @transform_6(%arg0: i32) -> (i32, i32) {
    %c0_i32 = arith.constant 0 : i32
    %c0_i32_0 = arith.constant 0 : i32
    %c0_i32_1 = arith.constant 0 : i32
    return %c0_i32, %c0_i32_0 : i32, i32
  }
}

module attributes {stable_mosaic.version = 11 : i64} {
  func.func @_fc_stack_kernel(%arg0: i32, %arg1: memref<2x2048xbf16, #tpu.memory_space<vmem>>, %arg2: memref<2048x64xbf16, #tpu.memory_space<vmem>>, %arg3: memref<1x64xf32, #tpu.memory_space<vmem>>, %arg4: memref<64x8xbf16, #tpu.memory_space<vmem>>, %arg5: memref<1x8xf32, #tpu.memory_space<vmem>>, %arg6: memref<2x8xf32, #tpu.memory_space<vmem>>) attributes {dimension_semantics = [#tpu.dimension_semantics<arbitrary>], iteration_bounds = array<i64: 1>, scalar_prefetch = 0 : i64, scratch_operands = 0 : i64, tpu.core_type = #tpu.core_type<tc>, window_params = [{pipeline_mode = #tpu.pipeline_mode<synchronous>, transform_indices = @transform_0, window_bounds = array<i64: 2, 2048>}, {pipeline_mode = #tpu.pipeline_mode<synchronous>, transform_indices = @transform_1, window_bounds = array<i64: 2048, 64>}, {pipeline_mode = #tpu.pipeline_mode<synchronous>, transform_indices = @transform_2, window_bounds = array<i64: 1, 64>}, {pipeline_mode = #tpu.pipeline_mode<synchronous>, transform_indices = @transform_3, window_bounds = array<i64: 64, 8>}, {pipeline_mode = #tpu.pipeline_mode<synchronous>, transform_indices = @transform_4, window_bounds = array<i64: 1, 8>}, {pipeline_mode = #tpu.pipeline_mode<synchronous>, transform_indices = @transform_5, window_bounds = array<i64: 2, 8>}]} {
    %c0 = arith.constant 0 : index
    %c0_0 = arith.constant 0 : index
    %0 = vector.load %arg1[%c0, %c0_0] : memref<2x2048xbf16, #tpu.memory_space<vmem>>, vector<2x2048xbf16>
    %c0_1 = arith.constant 0 : index
    %c0_2 = arith.constant 0 : index
    %1 = vector.load %arg2[%c0_1, %c0_2] : memref<2048x64xbf16, #tpu.memory_space<vmem>>, vector<2048x64xbf16>
    %cst = arith.constant dense<0.000000e+00> : vector<2x64xf32>
    %2 = tpu.matmul %0, %1, %cst {dimension_numbers = #tpu.dot_dimension_numbers<[1], [0], [0], [1], [0, 0, 1, 1], [], []>} : vector<2x2048xbf16>, vector<2048x64xbf16>, vector<2x64xf32> -> vector<2x64xf32>
    %c0_3 = arith.constant 0 : index
    %c0_4 = arith.constant 0 : index
    %3 = vector.load %arg3[%c0_3, %c0_4] : memref<1x64xf32, #tpu.memory_space<vmem>>, vector<1x64xf32>
    %4 = vector.broadcast %3 : vector<1x64xf32> to vector<2x64xf32>
    %5 = arith.addf %2, %4 : vector<2x64xf32>
    %cst_5 = arith.constant 0.000000e+00 : f32
    %6 = vector.broadcast %cst_5 : f32 to vector<2x64xf32>
    %7 = arith.maximumf %5, %6 : vector<2x64xf32>
    %8 = arith.truncf %7 : vector<2x64xf32> to vector<2x64xbf16>
    %c0_6 = arith.constant 0 : index
    %c0_7 = arith.constant 0 : index
    %9 = vector.load %arg4[%c0_6, %c0_7] : memref<64x8xbf16, #tpu.memory_space<vmem>>, vector<64x8xbf16>
    %cst_8 = arith.constant dense<0.000000e+00> : vector<2x8xf32>
    %10 = tpu.matmul %8, %9, %cst_8 {dimension_numbers = #tpu.dot_dimension_numbers<[1], [0], [0], [1], [0, 0, 1, 1], [], []>} : vector<2x64xbf16>, vector<64x8xbf16>, vector<2x8xf32> -> vector<2x8xf32>
    %c0_9 = arith.constant 0 : index
    %c0_10 = arith.constant 0 : index
    %11 = vector.load %arg5[%c0_9, %c0_10] : memref<1x8xf32, #tpu.memory_space<vmem>>, vector<1x8xf32>
    %12 = vector.broadcast %11 : vector<1x8xf32> to vector<2x8xf32>
    %13 = arith.addf %10, %12 : vector<2x8xf32>
    %c0_11 = arith.constant 0 : index
    %c0_12 = arith.constant 0 : index
    %14 = vector.load %arg6[%c0_11, %c0_12] : memref<2x8xf32, #tpu.memory_space<vmem>>, vector<2x8xf32>
    tpu.vector_store %arg6[%c0_11, %c0_12], %13 {strides = array<i32>} : memref<2x8xf32, #tpu.memory_space<vmem>>, vector<2x8xf32>,
    return
  }
  func.func @transform_0(%arg0: i32) -> (i32, i32) {
    %c0_i32 = arith.constant 0 : i32
    %c0_i32_0 = arith.constant 0 : i32
    %c0_i32_1 = arith.constant 0 : i32
    return %c0_i32, %c0_i32_0 : i32, i32
  }
  func.func @transform_1(%arg0: i32) -> (i32, i32) {
    %c0_i32 = arith.constant 0 : i32
    %c0_i32_0 = arith.constant 0 : i32
    %c0_i32_1 = arith.constant 0 : i32
    return %c0_i32, %c0_i32_0 : i32, i32
  }
  func.func @transform_2(%arg0: i32) -> (i32, i32) {
    %c0_i32 = arith.constant 0 : i32
    %c0_i32_0 = arith.constant 0 : i32
    %c0_i32_1 = arith.constant 0 : i32
    return %c0_i32, %c0_i32_0 : i32, i32
  }
  func.func @transform_3(%arg0: i32) -> (i32, i32) {
    %c0_i32 = arith.constant 0 : i32
    %c0_i32_0 = arith.constant 0 : i32
    %c0_i32_1 = arith.constant 0 : i32
    return %c0_i32, %c0_i32_0 : i32, i32
  }
  func.func @transform_4(%arg0: i32) -> (i32, i32) {
    %c0_i32 = arith.constant 0 : i32
    %c0_i32_0 = arith.constant 0 : i32
    %c0_i32_1 = arith.constant 0 : i32
    return %c0_i32, %c0_i32_0 : i32, i32
  }
  func.func @transform_5(%arg0: i32) -> (i32, i32) {
    %c0_i32 = arith.constant 0 : i32
    %c0_i32_0 = arith.constant 0 : i32
    %c0_i32_1 = arith.constant 0 : i32
    return %c0_i32, %c0_i32_0 : i32, i32
  }
}

</mosaic_0001>

<bundles_post_ra>
// kernel: cnn_forward.2
= control target key start
LH: loop header
LB: loop body
LE: loop exit
PB: predicated region body
PF: predicated region fallthrough
CT: control target
= control target key end

     0   :  { %vm369_vm0 = vcmask 1041408   ;;  %vm272_vm1 = vcmask 293888   ;;  %vm916_vm2 = vcmask 130048   ;;  %vm2661_vm3 = vcmask 257024   ;;  %s4591_s1 = inlined_call_operand.vmem [shape: bf16[36,16], index: 1, kind: input, shape index: {}]   ;;  %s4592_s2 = inlined_call_operand.vmem [shape: f32[1,16], index: 2, kind: input, shape index: {}]   ;;  %s4593_s0 = inlined_call_operand.vmem [shape: bf16[512,36], index: 0, kind: input, shape index: {}]   ;;  %s4594_s3 = inlined_call_operand.vmem [shape: bf16[9,128,128], index: 3, kind: input, shape index: {}]   ;;  %s4595_s4 = inlined_call_operand.vmem [shape: bf16[9,16,32], index: 4, kind: input, shape index: {}]   ;;  %s4596_s5 = inlined_call_operand.vmem [shape: f32[1,32], index: 5, kind: input, shape index: {}]   ;;  %s4597_s6 = inlined_call_operand.vmem [shape: bf16[128,32], index: 6, kind: output, shape index: {}]  }
   0x1   :  { %v92_v0 = vld [vmem:[%s4591_s1 + $0x10] sm:$0x3]  ;;  %v3423_v4 = vld [vmem:[%s4591_s1 + $0x8] sm:$0xff]  ;;  %v3422_v5 = vld [vmem:[%s4591_s1] sm:$0xff] }
   0x2   :  { %v266_v1 = vunpack.c.l.b16 %v92_v0  ;;  %v3390_v6 = vld [vmem:[%s4593_s0] sm:$0xff]  ;;  %v3391_v7 = vld [vmem:[%s4593_s0 + $0x8] sm:$0xff]  ;;  %v3392_v8 = vld [vmem:[%s4593_s0 + $0x10] sm:$0xff] }
   0x3   :  { %v3393_v9 = vld [vmem:[%s4593_s0 + $0x18] sm:$0xff]  ;;  %v3394_v10 = vld [vmem:[%s4593_s0 + $0x20] sm:$0xff]  ;;  %v3395_v11 = vld [vmem:[%s4593_s0 + $0x28] sm:$0xff] }
   0x4   :  { %v269_v2 = vpack.c.b16 %v266_v1, %v266_v1  ;;  %v3396_v12 = vld [vmem:[%s4593_s0 + $0x30] sm:$0xff]  ;;  %v3397_v13 = vld [vmem:[%s4593_s0 + $0x38] sm:$0xff]  ;;  %v3398_v14 = vld [vmem:[%s4593_s0 + $0x40] sm:$0xff] }
   0x5   :  { %v3399_v17 = vld [vmem:[%s4593_s0 + $0x48] sm:$0xff]  ;;  %v3400_v20 = vld [vmem:[%s4593_s0 + $0x50] sm:$0xff]  ;;  %v3401_v23 = vld [vmem:[%s4593_s0 + $0x58] sm:$0xff] }
   0x6   :  { %v371_v3 = vsel %vm369_vm0, %v269_v2, 0  ;;  %v3402_v26 = vld [vmem:[%s4593_s0 + $0x60] sm:$0xff]  ;;  %v3403_v29 = vld [vmem:[%s4593_s0 + $0x68] sm:$0xff]  ;;  %v3404_v32 = vld [vmem:[%s4593_s0 + $0x70] sm:$0xff] }
   0x7   :  { %378 = vmatpush.bf16.msra.mxu0 %v371_v3  ;;  %3505 = vmatpush.bf16.msra.mxu1 %v371_v3  ;;  %v3405_v35 = vld [vmem:[%s4593_s0 + $0x78] sm:$0xff]  ;;  %v3640_v38 = vld [vmem:[%s4592_s2] ss:$0 sm:$0xff]  ;;  %v3407_v53 = vld [vmem:[%s4593_s0 + $0x88] sm:$0xff] }
   0x8   :  { %v3406_v40 = vld [vmem:[%s4593_s0 + $0x80] sm:$0xff]  ;;  %v3408_v2 = vld [vmem:[%s4593_s0 + $0x90] sm:$0xff] }
   0xb   :  { %379 = vmatpush.bf16.msra.mxu0 %v3423_v4  ;;  %3506 = vmatpush.bf16.msra.mxu1 %v3423_v4 }
   0xf   :  { %380 = vmatpush.bf16.msra.mxu0 %v3422_v5  ;;  %3507 = vmatpush.bf16.msra.mxu1 %v3422_v5 }
  0x12   :  { %2818 = vmatmul.msk.bf16.vlgmr.msra.gmra.mxu0 %vm272_vm1, %v3390_v6 }
  0x22   :  { %2819 = vmatmul.msk.bf16.gmra.mxu0 %vm272_vm1, %v3391_v7 }
  0x32   :  { %2820 = vmatmul.msk.bf16.gmra.mxu0 %vm272_vm1, %v3392_v8 }
  0x42   :  { %2821 = vmatmul.msk.bf16.gmra.mxu0 %vm272_vm1, %v3393_v9 }
  0x52   :  { %2822 = vmatmul.msk.bf16.gmra.mxu0 %vm272_vm1, %v3394_v10 }
  0x62   :  { %2823 = vmatmul.msk.bf16.gmra.mxu0 %vm272_vm1, %v3395_v11 }
  0x72   :  { %2824 = vmatmul.msk.bf16.gmra.mxu0 %vm272_vm1, %v3396_v12 }
  0x82   :  { %2825 = vmatmul.msk.bf16.gmra.mxu0 %vm272_vm1, %v3397_v13 }
  0x8f   :  { %v382_v15 = vpop.f32.mrf.mxu0 }
  0x90   :  { %v383_v39 = vadd.f32 %v3640_v38, %v382_v15  ;;  %v3409_v15 = vld [vmem:[%s4593_s0 + $0x98] sm:$0xff] }
  0x92   :  { %2826 = vmatmul.msk.bf16.gmra.mxu0 %vm272_vm1, %v3398_v14  ;;  %v542_v43 = vmax.f32 %v383_v39, 0.0  ;;  %v3410_v39 = vld [vmem:[%s4593_s0 + $0xa0] sm:$0xff] }
  0x97   :  { %v384_v16 = vpop.f32.mrf.mxu0 }
  0x98   :  { %v385_v46 = vadd.f32 %v3640_v38, %v384_v16 }
  0x9a   :  { %v543_v49 = vmax.f32 %v385_v46, 0.0 }
  0x9f   :  { %v387_v18 = vpop.f32.mrf.mxu0 }
  0xa0   :  { %v388_v52 = vadd.f32 %v3640_v38, %v387_v18  ;;  %v3419_v18 = vld [vmem:[%s4593_s0 + $0xe8] sm:$0xff] }
  0xa1   :  { %2847 = vmatmul.msk.bf16.vlgmr.msra.gmra.mxu1 %vm272_vm1, %v3419_v18 }
  0xa2   :  { %2827 = vmatmul.msk.bf16.gmra.mxu0 %vm272_vm1, %v3399_v17  ;;  %v544_v56 = vmax.f32 %v388_v52, 0.0 }
  0xa7   :  { %v389_v19 = vpop.f32.mrf.mxu0 }
  0xa8   :  { %v390_v59 = vadd.f32 %v3640_v38, %v389_v19 }
  0xaa   :  { %v545_v62 = vmax.f32 %v390_v59, 0.0 }
  0xaf   :  { %v392_v21 = vpop.f32.mrf.mxu0 }
  0xb0   :  { %v393_v1 = vadd.f32 %v3640_v38, %v392_v21 }
  0xb2   :  { %2828 = vmatmul.msk.bf16.gmra.mxu0 %vm272_vm1, %v3400_v20  ;;  %v546_v5 = vmax.f32 %v393_v1, 0.0 }
  0xb7   :  { %v394_v22 = vpop.f32.mrf.mxu0 }
  0xb8   :  { %v395_v8 = vadd.f32 %v3640_v38, %v394_v22 }
  0xba   :  { %v547_v11 = vmax.f32 %v395_v8, 0.0 }
  0xbf   :  { %v397_v24 = vpop.f32.mrf.mxu0 }
  0xc0   :  { %v398_v14 = vadd.f32 %v3640_v38, %v397_v24 }
  0xc2   :  { %2829 = vmatmul.msk.bf16.gmra.mxu0 %vm272_vm1, %v3401_v23  ;;  %v548_v19 = vmax.f32 %v398_v14, 0.0 }
  0xc7   :  { %v3603_v25 = vpop.f32.mrf.mxu0 }
  0xc8   :  { %v400_v22 = vadd.f32 %v3640_v38, %v3603_v25  ;;  %v3420_v25 = vld [vmem:[%s4593_s0 + $0xf0] sm:$0xff] }
  0xc9   :  { %2848 = vmatmul.msk.bf16.gmra.mxu1 %vm272_vm1, %v3420_v25 }
  0xcf   :  { %v3608_v27 = vpop.f32.mrf.mxu0 }
  0xd2   :  { %2830 = vmatmul.msk.bf16.gmra.mxu0 %vm272_vm1, %v3402_v26  ;;  %v549_v26 = vmax.f32 %v400_v22, 0.0 }
  0xd7   :  { %v3611_v28 = vpop.f32.mrf.mxu0 }
  0xdf   :  { %v3616_v30 = vpop.f32.mrf.mxu0 }
  0xe0   :  { %v408_v52 = vadd.f32 %v3640_v38, %v3616_v30 }
  0xe2   :  { %2831 = vmatmul.msk.bf16.gmra.mxu0 %vm272_vm1, %v3403_v29 }
  0xe7   :  { %v3619_v31 = vpop.f32.mrf.mxu0 }
  0xe8   :  { %v410_v30 = vadd.f32 %v3640_v38, %v3619_v31 }
  0xef   :  { %v3624_v33 = vpop.f32.mrf.mxu0 }
  0xf2   :  { %2832 = vmatmul.msk.bf16.gmra.mxu0 %vm272_vm1, %v3404_v32 }
  0xf7   :  { %v3627_v34 = vpop.f32.mrf.mxu0 }
  0xff   :  { %v3632_v36 = vpop.f32.mrf.mxu0 }
 0x102   :  { %2833 = vmatmul.msk.bf16.gmra.mxu0 %vm272_vm1, %v3405_v35  ;;  %v403_v35 = vadd.f32 %v3640_v38, %v3608_v27  ;;  %v405_v27 = vadd.f32 %v3640_v38, %v3611_v28  ;;  %v3421_v28 = vld [vmem:[%s4593_s0 + $0xf8] sm:$0xff] }
 0x103   :  { %2849 = vmatmul.msk.bf16.gmra.mxu1 %vm272_vm1, %v3421_v28 }
 0x107   :  { %v3635_v37 = vpop.f32.mrf.mxu0 }
 0x108   :  { %v420_v22 = vadd.f32 %v3640_v38, %v3635_v37  ;;  %v3415_v37 = vld [vmem:[%s4593_s0 + $0xc8] sm:$0xff] }
 0x10f   :  { %v422_v41 = vpop.f32.mrf.mxu0 }
 0x110   :  { %v423_v42 = vadd.f32 %v3640_v38, %v422_v41 }
 0x112   :  { %v558_v44 = vmax.f32 %v423_v42, 0.0  ;;  %2834 = vmatmul.msk.bf16.gmra.mxu0 %vm272_vm1, %v3406_v40  ;;  %v550_v42 = vmax.f32 %v403_v35, 0.0  ;;  %v3414_v35 = vld [vmem:[%s4593_s0 + $0xc0] sm:$0xff] }
 0x114   :  { %v3648_v45 = vmax.f32 %v542_v43, %v558_v44 }
 0x117   :  { %v424_v47 = vpop.f32.mrf.mxu0 }
 0x118   :  { %v425_v48 = vadd.f32 %v3640_v38, %v424_v47 }
 0x11a   :  { %v559_v50 = vmax.f32 %v425_v48, 0.0  ;;  %v551_v48 = vmax.f32 %v405_v27, 0.0 }
 0x11c   :  { %v3652_v51 = vmax.f32 %v543_v49, %v559_v50 }
 0x11f   :  { %v427_v54 = vpop.f32.mrf.mxu0 }
 0x120   :  { %v428_v55 = vadd.f32 %v3640_v38, %v427_v54 }
 0x122   :  { %v560_v57 = vmax.f32 %v428_v55, 0.0  ;;  %2835 = vmatmul.msk.bf16.gmra.mxu0 %vm272_vm1, %v3407_v53  ;;  %v3411_v53 = vld [vmem:[%s4593_s0 + $0xa8] sm:$0xff] }
 0x124   :  { %v3660_v58 = vmax.f32 %v544_v56, %v560_v57  ;;  %v552_v56 = vmax.f32 %v408_v52, 0.0 }
 0x127   :  { %v429_v60 = vpop.f32.mrf.mxu0 }
 0x128   :  { %v430_v61 = vadd.f32 %v3640_v38, %v429_v60 }
 0x12a   :  { %v561_v63 = vmax.f32 %v430_v61, 0.0 }
 0x12c   :  { %v3664_v0 = vmax.f32 %v545_v62, %v561_v63  ;;  %v553_v62 = vmax.f32 %v410_v30, 0.0 }
 0x12f   :  { %v432_v3 = vpop.f32.mrf.mxu0 }
 0x130   :  { %v433_v4 = vadd.f32 %v3640_v38, %v432_v3  ;;  %v3412_v3 = vld [vmem:[%s4593_s0 + $0xb0] sm:$0xff] }
 0x132   :  { %v562_v6 = vmax.f32 %v433_v4, 0.0  ;;  %2836 = vmatmul.msk.bf16.gmra.mxu0 %vm272_vm1, %v3408_v2  ;;  %v413_v2 = vadd.f32 %v3640_v38, %v3624_v33 }
 0x134   :  { %v3672_v7 = vmax.f32 %v546_v5, %v562_v6  ;;  %v554_v6 = vmax.f32 %v413_v2, 0.0 }
 0x137   :  { %v434_v9 = vpop.f32.mrf.mxu0 }
 0x138   :  { %v435_v10 = vadd.f32 %v3640_v38, %v434_v9  ;;  %v415_v9 = vadd.f32 %v3640_v38, %v3627_v34 }
 0x13a   :  { %v563_v12 = vmax.f32 %v435_v10, 0.0  ;;  %v555_v33 = vmax.f32 %v415_v9, 0.0 }
 0x13c   :  { %v3676_v13 = vmax.f32 %v547_v11, %v563_v12 }
 0x13f   :  { %v437_v16 = vpop.f32.mrf.mxu0 }
 0x140   :  { %v438_v17 = vadd.f32 %v3640_v38, %v437_v16  ;;  %v3413_v16 = vld [vmem:[%s4593_s0 + $0xb8] sm:$0xff] }
 0x142   :  { %v564_v20 = vmax.f32 %v438_v17, 0.0  ;;  %2837 = vmatmul.msk.bf16.gmra.mxu0 %vm272_vm1, %v3409_v15  ;;  %v418_v15 = vadd.f32 %v3640_v38, %v3632_v36  ;;  %v557_v36 = vmax.f32 %v420_v22, 0.0 }
 0x144   :  { %v3688_v21 = vmax.f32 %v548_v19, %v564_v20  ;;  %v556_v19 = vmax.f32 %v418_v15, 0.0 }
 0x147   :  { %v439_v23 = vpop.f32.mrf.mxu0 }
 0x148   :  { %v440_v24 = vadd.f32 %v3640_v38, %v439_v23 }
 0x14a   :  { %v565_v29 = vmax.f32 %v440_v24, 0.0 }
 0x14c   :  { %v3693_v32 = vmax.f32 %v549_v26, %v565_v29 }
 0x14f   :  { %v442_v40 = vpop.f32.mrf.mxu0 }
 0x150   :  { %v443_v41 = vadd.f32 %v3640_v38, %v442_v40 }
 0x152   :  { %v566_v43 = vmax.f32 %v443_v41, 0.0  ;;  %2838 = vmatmul.msk.bf16.gmra.mxu0 %vm272_vm1, %v3410_v39 }
 0x154   :  { %v3706_v44 = vmax.f32 %v550_v42, %v566_v43  ;;  %v3416_v42 = vld [vmem:[%s4593_s0 + $0xd0] sm:$0xff] }
 0x157   :  { %v444_v46 = vpop.f32.mrf.mxu0 }
 0x158   :  { %v445_v47 = vadd.f32 %v3640_v38, %v444_v46  ;;  %v3417_v46 = vld [vmem:[%s4593_s0 + $0xd8] sm:$0xff] }
 0x15a   :  { %v567_v49 = vmax.f32 %v445_v47, 0.0 }
 0x15c   :  { %v3711_v50 = vmax.f32 %v551_v48, %v567_v49  ;;  %v3418_v49 = vld [vmem:[%s4593_s0 + $0xe0] sm:$0xff] }
 0x15f   :  { %v447_v54 = vpop.f32.mrf.mxu0 }
 0x160   :  { %v448_v55 = vadd.f32 %v3640_v38, %v447_v54 }
 0x162   :  { %v568_v57 = vmax.f32 %v448_v55, 0.0  ;;  %2839 = vmatmul.msk.bf16.gmra.mxu0 %vm272_vm1, %v3411_v53  ;;  %v527_v53 = vpop.f32.mrf.mxu1 }
 0x164   :  { %v3724_v59 = vmax.f32 %v552_v56, %v568_v57  ;;  %v528_v57 = vadd.f32 %v3640_v38, %v527_v53 }
 0x167   :  { %v449_v60 = vpop.f32.mrf.mxu0 }
 0x168   :  { %v450_v61 = vadd.f32 %v3640_v38, %v449_v60 }
 0x16a   :  { %v569_v63 = vmax.f32 %v450_v61, 0.0  ;;  %v529_v55 = vpop.f32.mrf.mxu1 }
 0x16b   :  { %v530_v60 = vadd.f32 %v3640_v38, %v529_v55 }
 0x16c   :  { %v3729_v1 = vmax.f32 %v553_v62, %v569_v63  ;;  %v600_v62 = vmax.f32 %v528_v57, 0.0 }
 0x16f   :  { %v452_v4 = vpop.f32.mrf.mxu0 }
 0x170   :  { %v453_v5 = vadd.f32 %v3640_v38, %v452_v4 }
 0x172   :  { %v570_v8 = vmax.f32 %v453_v5, 0.0  ;;  %2840 = vmatmul.msk.bf16.gmra.mxu0 %vm272_vm1, %v3412_v3  ;;  %v532_v30 = vpop.f32.mrf.mxu1  ;;  %v601_v3 = vmax.f32 %v530_v60, 0.0 }
 0x173   :  { %v533_v15 = vadd.f32 %v3640_v38, %v532_v30 }
 0x174   :  { %v3738_v31 = vmax.f32 %v554_v6, %v570_v8 }
 0x177   :  { %v454_v10 = vpop.f32.mrf.mxu0 }
 0x178   :  { %v455_v11 = vadd.f32 %v3640_v38, %v454_v10 }
 0x17a   :  { %v571_v12 = vmax.f32 %v455_v11, 0.0  ;;  %v534_v8 = vpop.f32.mrf.mxu1 }
 0x17c   :  { %v3743_v14 = vmax.f32 %v555_v33, %v571_v12 }
 0x17f   :  { %v457_v17 = vpop.f32.mrf.mxu0 }
 0x180   :  { %v458_v18 = vadd.f32 %v3640_v38, %v457_v17 }
 0x182   :  { %v572_v20 = vmax.f32 %v458_v18, 0.0  ;;  %2841 = vmatmul.msk.bf16.gmra.mxu0 %vm272_vm1, %v3413_v16  ;;  %v535_v16 = vadd.f32 %v3640_v38, %v534_v8  ;;  %v602_v18 = vmax.f32 %v533_v15, 0.0 }
 0x184   :  { %v3752_v34 = vmax.f32 %v556_v19, %v572_v20  ;;  %v537_v20 = vpop.f32.mrf.mxu1 }
 0x187   :  { %v459_v23 = vpop.f32.mrf.mxu0 }
 0x188   :  { %v460_v24 = vadd.f32 %v3640_v38, %v459_v23  ;;  %v603_v23 = vmax.f32 %v535_v16, 0.0 }
 0x18a   :  { %v573_v26 = vmax.f32 %v460_v24, 0.0 }
 0x18c   :  { %v3757_v29 = vmax.f32 %v557_v36, %v573_v26 }
 0x18f   :  { %v3762_v39 = vpop.f32.mrf.mxu0 }
 0x192   :  { %2842 = vmatmul.msk.bf16.gmra.mxu0 %vm272_vm1, %v3414_v35 }
 0x197   :  { %v3765_v40 = vpop.f32.mrf.mxu0 }
 0x19f   :  { %v3770_v41 = vpop.f32.mrf.mxu0 }
 0x1a0   :  { %v468_v15 = vadd.f32 %v3640_v38, %v3770_v41 }
 0x1a2   :  { %2843 = vmatmul.msk.bf16.gmra.mxu0 %vm272_vm1, %v3415_v37 }
 0x1a7   :  { %v3773_v25 = vpop.f32.mrf.mxu0 }
 0x1af   :  { %v3778_v43 = vpop.f32.mrf.mxu0 }
 0x1b2   :  { %2844 = vmatmul.msk.bf16.gmra.mxu0 %vm272_vm1, %v3416_v42  ;;  %v539_v42 = vpop.f32.mrf.mxu1 }
 0x1b3   :  { %v540_v53 = vadd.f32 %v3640_v38, %v539_v42 }
 0x1b5   :  { %v605_v30 = vmax.f32 %v540_v53, 0.0 }
 0x1b7   :  { %v3781_v27 = vpop.f32.mrf.mxu0 }
 0x1bf   :  { %v3786_v47 = vpop.f32.mrf.mxu0 }
 0x1c2   :  { %2845 = vmatmul.msk.bf16.gmra.mxu0 %vm272_vm1, %v3417_v46 }
 0x1c7   :  { %v3789_v48 = vpop.f32.mrf.mxu0 }
 0x1cf   :  { %v3794_v52 = vpop.f32.mrf.mxu0 }
 0x1d2   :  { %2846 = vmatmul.msk.bf16.gmra.mxu0 %vm272_vm1, %v3418_v49  ;;  %v538_v49 = vadd.f32 %v3640_v38, %v537_v20 }
 0x1d7   :  { %v3797_v54 = vpop.f32.mrf.mxu0 }
 0x1df   :  { %v487_v28 = vpop.f32.mrf.mxu0 }
 0x1e0   :  { %v488_v56 = vadd.f32 %v3640_v38, %v487_v28  ;;  %v604_v28 = vmax.f32 %v538_v49, 0.0 }
 0x1e2   :  { %v584_v61 = vmax.f32 %v488_v56, 0.0 }
 0x1e4   :  { %v632_v4 = vmax.f32 %v584_v61, %v600_v62 }
 0x1e6   :  { %v648_v9 = vmax.f32 %v3724_v59, %v632_v4 }
 0x1e7   :  { %v489_v63 = vpop.f32.mrf.mxu0 }
 0x1e8   :  { %v490_v2 = vadd.f32 %v3640_v38, %v489_v63 }
 0x1ea   :  { %v585_v5 = vmax.f32 %v490_v2, 0.0 }
 0x1ec   :  { %v633_v6 = vmax.f32 %v585_v5, %v601_v3 }
 0x1ee   :  { %v649_v10 = vmax.f32 %v3729_v1, %v633_v6 }
 0x1ef   :  { %v492_v11 = vpop.f32.mrf.mxu0 }
 0x1f0   :  { %v3805_v33 = vpack.c.bf16 %v649_v10, %v648_v9  ;;  %v493_v12 = vadd.f32 %v3640_v38, %v492_v11  ;;  %v465_v9 = vadd.f32 %v3640_v38, %v3765_v40 }
 0x1f2   :  { %v586_v17 = vmax.f32 %v493_v12, 0.0  ;;  %v575_v10 = vmax.f32 %v465_v9, 0.0 }
 0x1f4   :  { %v634_v24 = vmax.f32 %v586_v17, %v602_v18  ;;  %v576_v18 = vmax.f32 %v468_v15, 0.0 }
 0x1f6   :  { %v650_v1 = vmax.f32 %v3738_v31, %v634_v24 }
 0x1f7   :  { %v494_v19 = vpop.f32.mrf.mxu0 }
 0x1f8   :  { %v495_v22 = vadd.f32 %v3640_v38, %v494_v19 }
 0x1fa   :  { %v587_v59 = vmax.f32 %v495_v22, 0.0  ;;  %v470_v22 = vadd.f32 %v3640_v38, %v3773_v25 }
 0x1fc   :  { %v635_v36 = vmax.f32 %v587_v59, %v603_v23 }
 0x1fe   :  { %v651_v26 = vmax.f32 %v3743_v14, %v635_v36  ;;  %v463_v14 = vadd.f32 %v3640_v38, %v3762_v39  ;;  %v577_v36 = vmax.f32 %v470_v22, 0.0  ;;  %v3427_v22 = vld [vmem:[%s4594_s3 + $0x18] sm:$0xff] }
 0x1ff   :  { %v497_v35 = vpop.f32.mrf.mxu0 }
 0x200   :  { %v3813_v37 = vpack.c.bf16 %v651_v26, %v650_v1  ;;  %v498_v46 = vadd.f32 %v3640_v38, %v497_v35  ;;  %v574_v5 = vmax.f32 %v463_v14, 0.0 }
 0x202   :  { %v588_v55 = vmax.f32 %v498_v46, 0.0 }
 0x204   :  { %v636_v60 = vmax.f32 %v588_v55, %v604_v28 }
 0x206   :  { %v652_v62 = vmax.f32 %v3752_v34, %v636_v60 }
 0x207   :  { %v499_v56 = vpop.f32.mrf.mxu0 }
 0x208   :  { %v500_v57 = vadd.f32 %v3640_v38, %v499_v56 }
 0x20a   :  { %v589_v31 = vmax.f32 %v500_v57, 0.0 }
 0x20c   :  { %v637_v61 = vmax.f32 %v589_v31, %v605_v30 }
 0x20e   :  { %v653_v63 = vmax.f32 %v3757_v29, %v637_v61 }
 0x20f   :  { %v502_v2 = vpop.f32.mrf.mxu0 }
 0x210   :  { %v3823_v3 = vpack.c.bf16 %v653_v63, %v652_v62  ;;  %v503_v4 = vadd.f32 %v3640_v38, %v502_v2 }
 0x212   :  { %v590_v6 = vmax.f32 %v503_v4, 0.0  ;;  %726 = vmatpush.bf16.msrb.mxu1 %v3823_v3  ;;  %850 = vmatpush.bf16.msra.mxu2 %v3823_v3 }
 0x214   :  { %v622_v8 = vmax.f32 %v574_v5, %v590_v6 }
 0x216   :  { %v638_v39 = vmax.f32 %v3648_v45, %v622_v8  ;;  %727 = vmatpush.bf16.msrb.mxu1 %v3813_v37  ;;  %851 = vmatpush.bf16.msra.mxu2 %v3813_v37 }
 0x217   :  { %v504_v34 = vpop.f32.mrf.mxu0 }
 0x218   :  { %v505_v29 = vadd.f32 %v3640_v38, %v504_v34 }
 0x21a   :  { %v591_v11 = vmax.f32 %v505_v29, 0.0  ;;  %728 = vmatpush.bf16.msrb.mxu1 %v3805_v33  ;;  %852 = vmatpush.bf16.msra.mxu2 %v3805_v33 }
 0x21c   :  { %v623_v12 = vmax.f32 %v575_v10, %v591_v11 }
 0x21e   :  { %v639_v40 = vmax.f32 %v3652_v51, %v623_v12  ;;  %v473_v51 = vadd.f32 %v3640_v38, %v3778_v43 }
 0x21f   :  { %v507_v45 = vpop.f32.mrf.mxu0 }
 0x220   :  { %v3839_v16 = vpack.c.bf16 %v639_v40, %v638_v39  ;;  %v508_v17 = vadd.f32 %v3640_v38, %v507_v45  ;;  %v578_v49 = vmax.f32 %v473_v51, 0.0  ;;  %v3430_v51 = vld [vmem:[%s4594_s3 + $0x30] sm:$0xff] }
 0x222   :  { %v592_v19 = vmax.f32 %v508_v17, 0.0 }
 0x224   :  { %v624_v20 = vmax.f32 %v576_v18, %v592_v19  ;;  %v3426_v19 = vld [vmem:[%s4594_s3 + $0x10] sm:$0xff] }
 0x226   :  { %v640_v23 = vmax.f32 %v3660_v58, %v624_v20  ;;  %v475_v58 = vadd.f32 %v3640_v38, %v3781_v27  ;;  %v3435_v20 = vld [vmem:[%s4594_s3 + $0x50] sm:$0xff] }
 0x227   :  { %v509_v24 = vpop.f32.mrf.mxu0 }
 0x228   :  { %v510_v59 = vadd.f32 %v3640_v38, %v509_v24  ;;  %v579_v57 = vmax.f32 %v475_v58, 0.0  ;;  %v3428_v24 = vld [vmem:[%s4594_s3 + $0x20] sm:$0xff] }
 0x22a   :  { %v593_v41 = vmax.f32 %v510_v59, 0.0  ;;  %v3437_v59 = vld [vmem:[%s4594_s3 + $0x60] sm:$0xff] }
 0x22c   :  { %v625_v1 = vmax.f32 %v577_v36, %v593_v41  ;;  %v3441_v36 = vld [vmem:[%s4595_s4 + $0x8] sm:$0xff] }
 0x22d   :  { %3508 = vmatpush.bf16.msra.mxu3 %v3441_v36  ;;  %v3429_v41 = vld [vmem:[%s4594_s3 + $0x28] sm:$0xff] }
 0x22e   :  { %v641_v26 = vmax.f32 %v3664_v0, %v625_v1  ;;  %v478_v0 = vadd.f32 %v3640_v38, %v3786_v47  ;;  %v3438_v1 = vld [vmem:[%s4594_s3 + $0x68] sm:$0xff] }
 0x22f   :  { %v512_v35 = vpop.f32.mrf.mxu0 }
 0x230   :  { %v3849_v42 = vpack.c.bf16 %v641_v26, %v640_v23  ;;  %v513_v46 = vadd.f32 %v3640_v38, %v512_v35  ;;  %v580_v62 = vmax.f32 %v478_v0, 0.0  ;;  %v3436_v23 = vld [vmem:[%s4594_s3 + $0x58] sm:$0xff]  ;;  %v3439_v26 = vld [vmem:[%s4594_s3 + $0x70] sm:$0xff] }
 0x231   :  { %v3459_v35 = vld [vmem:[%s4595_s4 + $0x18] sm:$0xff] }
 0x232   :  { %v594_v25 = vmax.f32 %v513_v46, 0.0  ;;  %v3431_v46 = vld [vmem:[%s4594_s3 + $0x38] sm:$0xff] }
 0x234   :  { %v626_v53 = vmax.f32 %v578_v49, %v594_v25  ;;  %v3440_v49 = vld [vmem:[%s4594_s3 + $0x78] sm:$0xff]  ;;  %v3450_v25 = vld [vmem:[%s4595_s4 + $0x10] sm:$0xff] }
 0x236   :  { %v642_v55 = vmax.f32 %v3672_v7, %v626_v53  ;;  %v480_v7 = vadd.f32 %v3640_v38, %v3789_v48  ;;  %v3442_v53 = vld [vmem:[%s4594_s3 + $0x80] sm:$0xff] }
 0x237   :  { %v514_v28 = vpop.f32.mrf.mxu0 }
 0x238   :  { %v515_v56 = vadd.f32 %v3640_v38, %v514_v28  ;;  %v581_v6 = vmax.f32 %v480_v7, 0.0  ;;  %v3432_v7 = vld [vmem:[%s4595_s4] sm:$0xff] }
 0x239   :  { %1027 = vmatpush.bf16.msrb.mxu3 %v3432_v7 }
 0x23a   :  { %v595_v43 = vmax.f32 %v515_v56, 0.0 }
 0x23c   :  { %v627_v30 = vmax.f32 %v579_v57, %v595_v43 }
 0x23e   :  { %v643_v60 = vmax.f32 %v3676_v13, %v627_v30  ;;  %v483_v13 = vadd.f32 %v3640_v38, %v3794_v52  ;;  %v3443_v30 = vld [vmem:[%s4594_s3 + $0x88] sm:$0xff] }
 0x23f   :  { %v517_v31 = vpop.f32.mrf.mxu0 }
 0x240   :  { %v3859_v61 = vpack.c.bf16 %v643_v60, %v642_v55  ;;  %v518_v14 = vadd.f32 %v3640_v38, %v517_v31  ;;  %v582_v10 = vmax.f32 %v483_v13, 0.0  ;;  %v3445_v13 = vld [vmem:[%s4594_s3 + $0x98] sm:$0xff] }
 0x242   :  { %v596_v27 = vmax.f32 %v518_v14, 0.0 }
 0x244   :  { %v628_v63 = vmax.f32 %v580_v62, %v596_v27 }
 0x246   :  { %v644_v2 = vmax.f32 %v3688_v21, %v628_v63  ;;  %v485_v21 = vadd.f32 %v3640_v38, %v3797_v54  ;;  %v3434_v54 = vld [vmem:[%s4594_s3 + $0x48] sm:$0xff]  ;;  %v3444_v63 = vld [vmem:[%s4594_s3 + $0x90] sm:$0xff] }
 0x247   :  { %v519_v4 = vpop.f32.mrf.mxu0 }
 0x248   :  { %v520_v5 = vadd.f32 %v3640_v38, %v519_v4  ;;  %v583_v45 = vmax.f32 %v485_v21, 0.0  ;;  %v3446_v21 = vld [vmem:[%s4594_s3 + $0xa0] sm:$0xff] }
 0x24a   :  { %v597_v47 = vmax.f32 %v520_v5, 0.0 }
 0x24c   :  { %v629_v8 = vmax.f32 %v581_v6, %v597_v47 }
 0x24e   :  { %v645_v9 = vmax.f32 %v3693_v32, %v629_v8 }
 0x24f   :  { %v522_v39 = vpop.f32.mrf.mxu0 }
 0x250   :  { %v3869_v34 = vpack.c.bf16 %v645_v9, %v644_v2  ;;  %v523_v29 = vadd.f32 %v3640_v38, %v522_v39 }
 0x252   :  { %v598_v48 = vmax.f32 %v523_v29, 0.0 }
 0x254   :  { %v630_v11 = vmax.f32 %v582_v10, %v598_v48 }
 0x256   :  { %v646_v12 = vmax.f32 %v3706_v44, %v630_v11  ;;  %v3433_v44 = vld [vmem:[%s4594_s3 + $0x40] sm:$0xff] }
 0x257   :  { %v524_v15 = vpop.f32.mrf.mxu0 }
 0x258   :  { %v525_v40 = vadd.f32 %v3640_v38, %v524_v15  ;;  %v3424_v38 = vld [vmem:[%s4594_s3] sm:$0xff] }
 0x25a   :  { %v599_v52 = vmax.f32 %v525_v40, 0.0 }
 0x25c   :  { %v631_v17 = vmax.f32 %v583_v45, %v599_v52 }
 0x25e   :  { %v647_v32 = vmax.f32 %v3711_v50, %v631_v17  ;;  %v3425_v50 = vld [vmem:[%s4594_s3 + $0x8] sm:$0xff] }
 0x25f   :  { %v3447_v17 = vld [vmem:[%s4594_s3 + $0xa8] sm:$0xff] }
 0x260   :  { %v3877_v18 = vpack.c.bf16 %v647_v32, %v646_v12 }
 0x262   :  { %729 = vmatpush.bf16.msrb.mxu1 %v3877_v18  ;;  %853 = vmatpush.bf16.msra.mxu2 %v3877_v18 }
 0x266   :  { %730 = vmatpush.bf16.msrb.mxu1 %v3869_v34  ;;  %854 = vmatpush.bf16.msra.mxu2 %v3869_v34 }
 0x26a   :  { %731 = vmatpush.bf16.msrb.mxu1 %v3859_v61  ;;  %855 = vmatpush.bf16.msra.mxu2 %v3859_v61 }
 0x26e   :  { %732 = vmatpush.bf16.msrb.mxu1 %v3849_v42  ;;  %856 = vmatpush.bf16.msra.mxu2 %v3849_v42 }
 0x272   :  { %733 = vmatpush.bf16.msrb.mxu1 %v3839_v16  ;;  %857 = vmatpush.bf16.msra.mxu2 %v3839_v16 }
 0x275   :  { %734 = vmatmul.bf16.vlgmr.msrb.gmra.mxu1 %v3424_v38  ;;  %858 = vmatmul.bf16.vlgmr.msra.gmra.mxu2 %v3433_v44 }
 0x276   :  { %1134 = vmatpush.bf16.msra.mxu1 %v3823_v3  ;;  %948 = vmatpush.bf16.msrb.mxu2 %v3441_v36  ;;  %v3449_v36 = vld [vmem:[%s4594_s3 + $0xb8] sm:$0xff] }
 0x27a   :  { %1135 = vmatpush.bf16.msra.mxu1 %v3813_v37  ;;  %1231 = vmatpush.bf16.msra.mxu2 %v3450_v25 }
 0x27e   :  { %1136 = vmatpush.bf16.msra.mxu1 %v3805_v33 }
 0x282   :  { %1137 = vmatpush.bf16.msra.mxu1 %v3877_v18 }
 0x285   :  { %739 = vmatmul.bf16.gmra.mxu1 %v3425_v50  ;;  %863 = vmatmul.bf16.gmra.mxu2 %v3434_v54 }
 0x286   :  { %1138 = vmatpush.bf16.msra.mxu1 %v3869_v34 }
 0x28a   :  { %1139 = vmatpush.bf16.msra.mxu1 %v3859_v61 }
 0x28e   :  { %1140 = vmatpush.bf16.msra.mxu1 %v3849_v42 }
 0x292   :  { %1141 = vmatpush.bf16.msra.mxu1 %v3839_v16 }
 0x295   :  { %744 = vmatmul.bf16.gmra.mxu1 %v3426_v19  ;;  %868 = vmatmul.bf16.gmra.mxu2 %v3435_v20  ;;  %v3448_v19 = vld [vmem:[%s4594_s3 + $0xb0] sm:$0xff] }
 0x296   :  { %1451 = vmatpush.bf16.msrb.mxu1 %v3459_v35 }
 0x2a5   :  { %749 = vmatmul.bf16.gmra.mxu1 %v3427_v22  ;;  %873 = vmatmul.bf16.gmra.mxu2 %v3436_v23 }
 0x2b5   :  { %754 = vmatmul.bf16.gmra.mxu1 %v3428_v24  ;;  %878 = vmatmul.bf16.gmra.mxu2 %v3437_v59 }
 0x2c5   :  { %759 = vmatmul.bf16.gmra.mxu1 %v3429_v41  ;;  %883 = vmatmul.bf16.gmra.mxu2 %v3438_v1 }
 0x2d5   :  { %764 = vmatmul.bf16.gmra.mxu1 %v3430_v51  ;;  %888 = vmatmul.bf16.gmra.mxu2 %v3439_v26 }
 0x2e5   :  { %769 = vmatmul.bf16.gmra.mxu1 %v3431_v46  ;;  %893 = vmatmul.bf16.gmra.mxu2 %v3440_v49 }
 0x2f2   :  { %v3957_v58 = vpop.f32.mrf.mxu1 }
 0x2f5   :  { %1142 = vmatmul.bf16.vlgmr.msra.gmra.mxu1 %v3442_v53 }
 0x2f6   :  { %1794 = vmatpush.bf16.msra.mxu1 %v3823_v3 }
 0x2f8   :  { %v859_v55 = vpop.f32.mrf.mxu2 }
 0x2fa   :  { %1795 = vmatpush.bf16.msra.mxu1 %v3813_v37  ;;  %v3961_v28 = vpop.f32.mrf.mxu1 }
 0x2fb   :  { %v775_v56 = vpack.c.bf16 %v3961_v28, %v3957_v58 }
 0x2fe   :  { %1796 = vmatpush.bf16.msra.mxu1 %v3805_v33 }
 0x300   :  { %v861_v57 = vpop.f32.mrf.mxu2 }
 0x301   :  { %v899_v43 = vpack.c.bf16 %v861_v57, %v859_v55 }
 0x302   :  { %1797 = vmatpush.bf16.msra.mxu1 %v3877_v18  ;;  %v3970_v0 = vpop.f32.mrf.mxu1 }
 0x303   :  { %2936 = vmatmul.msk.bf16.vlgmr.msrb.gmra.mxu2 %vm916_vm2, %v899_v43 }
 0x304   :  { %1574 = vmatpush.bf16.msrb.mxu2 %v3823_v3 }
 0x305   :  { %1147 = vmatmul.bf16.gmra.mxu1 %v3443_v30 }
 0x306   :  { %1798 = vmatpush.bf16.msra.mxu1 %v3869_v34 }
 0x308   :  { %1575 = vmatpush.bf16.msrb.mxu2 %v3813_v37  ;;  %v864_v60 = vpop.f32.mrf.mxu2 }
 0x30a   :  { %1799 = vmatpush.bf16.msra.mxu1 %v3859_v61  ;;  %v3977_v31 = vpop.f32.mrf.mxu1 }
 0x30b   :  { %v776_v14 = vpack.c.bf16 %v3977_v31, %v3970_v0  ;;  %v3486_v0 = vld [vmem:[%s4595_s4 + $0x30] sm:$0xff] }
 0x30c   :  { %1576 = vmatpush.bf16.msrb.mxu2 %v3805_v33  ;;  %2111 = vmatpush.bf16.msrb.mxu0 %v3486_v0 }
 0x30e   :  { %1800 = vmatpush.bf16.msra.mxu1 %v3849_v42 }
 0x310   :  { %1577 = vmatpush.bf16.msrb.mxu2 %v3877_v18  ;;  %v866_v62 = vpop.f32.mrf.mxu2 }
 0x311   :  { %v900_v27 = vpack.c.bf16 %v866_v62, %v864_v60 }
 0x312   :  { %1801 = vmatpush.bf16.msra.mxu1 %v3839_v16  ;;  %v3991_v2 = vpop.f32.mrf.mxu1 }
 0x313   :  { %2937 = vmatmul.msk.bf16.gmra.mxu2 %vm916_vm2, %v900_v27 }
 0x314   :  { %1578 = vmatpush.bf16.msrb.mxu2 %v3869_v34 }
 0x315   :  { %1152 = vmatmul.bf16.gmra.mxu1 %v3444_v63 }
 0x318   :  { %1579 = vmatpush.bf16.msrb.mxu2 %v3859_v61  ;;  %v869_v4 = vpop.f32.mrf.mxu2 }
 0x31a   :  { %v3996_v5 = vpop.f32.mrf.mxu1 }
 0x31b   :  { %v777_v6 = vpack.c.bf16 %v3996_v5, %v3991_v2 }
 0x31c   :  { %1580 = vmatpush.bf16.msrb.mxu2 %v3849_v42 }
 0x320   :  { %1581 = vmatpush.bf16.msrb.mxu2 %v3839_v16  ;;  %v871_v47 = vpop.f32.mrf.mxu2 }
 0x321   :  { %v901_v8 = vpack.c.bf16 %v871_v47, %v869_v4 }
 0x322   :  { %v4005_v9 = vpop.f32.mrf.mxu1 }
 0x323   :  { %2938 = vmatmul.msk.bf16.gmra.mxu2 %vm916_vm2, %v901_v8 }
 0x325   :  { %1157 = vmatmul.bf16.gmra.mxu1 %v3445_v13 }
 0x328   :  { %v874_v39 = vpop.f32.mrf.mxu2 }
 0x32a   :  { %v4008_v29 = vpop.f32.mrf.mxu1 }
 0x32b   :  { %v778_v10 = vpack.c.bf16 %v4008_v29, %v4005_v9 }
 0x330   :  { %v876_v48 = vpop.f32.mrf.mxu2 }
 0x331   :  { %v902_v11 = vpack.c.bf16 %v876_v48, %v874_v39 }
 0x332   :  { %v4015_v12 = vpop.f32.mrf.mxu1 }
 0x333   :  { %2939 = vmatmul.msk.bf16.vlgmr.msra.gmra.mxu3 %vm916_vm2, %v902_v11 }
 0x334   :  { %1354 = vmatpush.bf16.msra.mxu3 %v3823_v3 }
 0x335   :  { %1162 = vmatmul.bf16.gmra.mxu1 %v3446_v21 }
 0x338   :  { %1355 = vmatpush.bf16.msra.mxu3 %v3813_v37  ;;  %v879_v15 = vpop.f32.mrf.mxu2 }
 0x33a   :  { %v4020_v40 = vpop.f32.mrf.mxu1 }
 0x33b   :  { %v779_v7 = vpack.c.bf16 %v4020_v40, %v4015_v12  ;;  %v3468_v12 = vld [vmem:[%s4595_s4 + $0x20] sm:$0xff] }
 0x33c   :  { %1356 = vmatpush.bf16.msra.mxu3 %v3805_v33 }
 0x340   :  { %1357 = vmatpush.bf16.msra.mxu3 %v3877_v18  ;;  %v881_v45 = vpop.f32.mrf.mxu2 }
 0x341   :  { %v903_v52 = vpack.c.bf16 %v881_v45, %v879_v15 }
 0x342   :  { %v4027_v32 = vpop.f32.mrf.mxu1 }
 0x343   :  { %2940 = vmatmul.msk.bf16.gmra.mxu3 %vm916_vm2, %v903_v52 }
 0x344   :  { %1358 = vmatpush.bf16.msra.mxu3 %v3869_v34 }
 0x345   :  { %1167 = vmatmul.bf16.gmra.mxu1 %v3447_v17 }
 0x348   :  { %1359 = vmatpush.bf16.msra.mxu3 %v3859_v61  ;;  %v884_v38 = vpop.f32.mrf.mxu2 }
 0x34a   :  { %v4032_v44 = vpop.f32.mrf.mxu1 }
 0x34b   :  { %v780_v9 = vpack.c.bf16 %v4032_v44, %v4027_v32 }
 0x34c   :  { %1360 = vmatpush.bf16.msra.mxu3 %v3849_v42 }
 0x350   :  { %1361 = vmatpush.bf16.msra.mxu3 %v3839_v16  ;;  %v886_v50 = vpop.f32.mrf.mxu2 }
 0x351   :  { %v904_v54 = vpack.c.bf16 %v886_v50, %v884_v38 }
 0x352   :  { %v4039_v20 = vpop.f32.mrf.mxu1 }
 0x353   :  { %2941 = vmatmul.msk.bf16.gmra.mxu3 %vm916_vm2, %v904_v54 }
 0x355   :  { %1172 = vmatmul.bf16.gmra.mxu1 %v3448_v19 }
 0x358   :  { %v889_v22 = vpop.f32.mrf.mxu2 }
 0x35a   :  { %v4042_v23 = vpop.f32.mrf.mxu1 }
 0x35b   :  { %v781_v15 = vpack.c.bf16 %v4042_v23, %v4039_v20  ;;  %v3460_v20 = vld [vmem:[%s4594_s3 + $0x100] sm:$0xff] }
 0x35c   :  { %v3451_v23 = vld [vmem:[%s4594_s3 + $0xc0] sm:$0xff] }
 0x360   :  { %v891_v24 = vpop.f32.mrf.mxu2 }
 0x361   :  { %v905_v59 = vpack.c.bf16 %v891_v24, %v889_v22 }
 0x362   :  { %v4047_v41 = vpop.f32.mrf.mxu1 }
 0x363   :  { %2942 = vmatmul.msk.bf16.gmra.mxu3 %vm916_vm2, %v905_v59 }
 0x365   :  { %1177 = vmatmul.bf16.gmra.mxu1 %v3449_v36 }
 0x368   :  { %v894_v1 = vpop.f32.mrf.mxu2 }
 0x36a   :  { %v4050_v51 = vpop.f32.mrf.mxu1 }
 0x36b   :  { %v782_v50 = vpack.c.bf16 %v4050_v51, %v4047_v41 }
 0x370   :  { %v896_v26 = vpop.f32.mrf.mxu2 }
 0x371   :  { %v906_v35 = vpack.c.bf16 %v896_v26, %v894_v1  ;;  %v3461_v1 = vld [vmem:[%s4594_s3 + $0x108] sm:$0xff] }
 0x372   :  { %v1143_v46 = vpop.f32.mrf.mxu1 }
 0x373   :  { %2943 = vmatmul.msk.bf16.gmra.mxu3 %vm916_vm2, %v906_v35 }
 0x37a   :  { %v1145_v49 = vpop.f32.mrf.mxu1 }
 0x37b   :  { %v1183_v25 = vpack.c.bf16 %v1145_v49, %v1143_v46  ;;  %v3452_v46 = vld [vmem:[%s4594_s3 + $0xc8] sm:$0xff] }
 0x37d   :  { %3010 = vmatmul.msk.bf16.vlgmr.msra.gmra.mxu2 %vm916_vm2, %v1183_v25 }
 0x382   :  { %v1148_v53 = vpop.f32.mrf.mxu1 }
 0x383   :  { %2948 = vmatmul.msk.bf16.vlgmr.msrb.gmra.mxu3 %vm916_vm2, %v775_v56 }
 0x384   :  { %1671 = vmatpush.bf16.msrb.mxu3 %v3468_v12 }
 0x386   :  { %v950_v4 = vpop.f32.mrf.mxu2 }
 0x38a   :  { %v1150_v55 = vpop.f32.mrf.mxu1 }
 0x38b   :  { %v1184_v57 = vpack.c.bf16 %v1150_v55, %v1148_v53 }
 0x38d   :  { %3011 = vmatmul.msk.bf16.gmra.mxu2 %vm916_vm2, %v1184_v57 }
 0x38e   :  { %v952_v13 = vpop.f32.mrf.mxu2 }
 0x392   :  { %v1153_v43 = vpop.f32.mrf.mxu1 }
 0x393   :  { %2949 = vmatmul.msk.bf16.gmra.mxu3 %vm916_vm2, %v776_v14 }
 0x39a   :  { %v1155_v30 = vpop.f32.mrf.mxu1 }
 0x39b   :  { %v1185_v60 = vpack.c.bf16 %v1155_v30, %v1153_v43  ;;  %v3462_v43 = vld [vmem:[%s4594_s3 + $0x110] sm:$0xff] }
 0x39d   :  { %3012 = vmatmul.msk.bf16.gmra.mxu2 %vm916_vm2, %v1185_v60 }
 0x3a2   :  { %v1158_v62 = vpop.f32.mrf.mxu1 }
 0x3a3   :  { %2950 = vmatmul.msk.bf16.gmra.mxu3 %vm916_vm2, %v777_v6 }
 0x3aa   :  { %v1160_v58 = vpop.f32.mrf.mxu1 }
 0x3ab   :  { %v1186_v28 = vpack.c.bf16 %v1160_v58, %v1158_v62  ;;  %v3453_v58 = vld [vmem:[%s4594_s3 + $0xd0] sm:$0xff] }
 0x3ad   :  { %3013 = vmatmul.msk.bf16.gmra.mxu2 %vm916_vm2, %v1186_v28 }
 0x3b2   :  { %v1163_v56 = vpop.f32.mrf.mxu1 }
 0x3b3   :  { %2951 = vmatmul.msk.bf16.gmra.mxu3 %vm916_vm2, %v778_v10  ;;  %v955_v10 = vpop.f32.mrf.mxu2 }
 0x3b6   :  { %v4076_v31 = vpop.f32.mrf.mxu3 }
 0x3ba   :  { %v1165_v14 = vpop.f32.mrf.mxu1 }
 0x3bb   :  { %v1187_v27 = vpack.c.bf16 %v1165_v14, %v1163_v56  ;;  %v957_v45 = vpop.f32.mrf.mxu2 }
 0x3bd   :  { %3014 = vmatmul.msk.bf16.gmra.mxu2 %vm916_vm2, %v1187_v27 }
 0x3be   :  { %v4079_v63 = vpop.f32.mrf.mxu3 }
 0x3c2   :  { %v1168_v2 = vpop.f32.mrf.mxu1 }
 0x3c3   :  { %2952 = vmatmul.msk.bf16.gmra.mxu3 %vm916_vm2, %v779_v7  ;;  %v960_v38 = vpop.f32.mrf.mxu2  ;;  %v3463_v7 = vld [vmem:[%s4594_s3 + $0x118] sm:$0xff] }
 0x3c6   :  { %v4084_v5 = vpop.f32.mrf.mxu3 }
 0x3ca   :  { %v1170_v6 = vpop.f32.mrf.mxu1 }
 0x3cb   :  { %v1188_v47 = vpack.c.bf16 %v1170_v6, %v1168_v2  ;;  %v962_v19 = vpop.f32.mrf.mxu2 }
 0x3cd   :  { %3015 = vmatmul.msk.bf16.gmra.mxu2 %vm916_vm2, %v1188_v47  ;;  %v3454_v47 = vld [vmem:[%s4594_s3 + $0xd8] sm:$0xff] }
 0x3ce   :  { %v4087_v8 = vpop.f32.mrf.mxu3 }
 0x3d2   :  { %v1173_v39 = vpop.f32.mrf.mxu1 }
 0x3d3   :  { %2953 = vmatmul.msk.bf16.gmra.mxu3 %vm916_vm2, %v780_v9 }
 0x3d6   :  { %v4092_v29 = vpop.f32.mrf.mxu3 }
 0x3da   :  { %v1175_v48 = vpop.f32.mrf.mxu1 }
 0x3db   :  { %v1189_v11 = vpack.c.bf16 %v1175_v48, %v1173_v39 }
 0x3dd   :  { %3016 = vmatmul.msk.bf16.gmra.mxu2 %vm916_vm2, %v1189_v11  ;;  %v3464_v11 = vld [vmem:[%s4594_s3 + $0x120] sm:$0xff] }
 0x3de   :  { %v4095_v21 = vpop.f32.mrf.mxu3 }
 0x3e2   :  { %v1178_v40 = vpop.f32.mrf.mxu1 }
 0x3e3   :  { %2954 = vmatmul.msk.bf16.gmra.mxu3 %vm916_vm2, %v781_v15 }
 0x3e6   :  { %v4103_v52 = vpop.f32.mrf.mxu3 }
 0x3ea   :  { %v1180_v17 = vpop.f32.mrf.mxu1 }
 0x3eb   :  { %v1190_v32 = vpack.c.bf16 %v1180_v17, %v1178_v40 }
 0x3ed   :  { %3017 = vmatmul.msk.bf16.gmra.mxu2 %vm916_vm2, %v1190_v32 }
 0x3ee   :  { %v4106_v44 = vpop.f32.mrf.mxu3 }
 0x3f3   :  { %2955 = vmatmul.msk.bf16.gmra.mxu3 %vm916_vm2, %v782_v50 }
 0x3f6   :  { %v4111_v54 = vpop.f32.mrf.mxu3 }
 0x3fd   :  { %1582 = vmatmul.bf16.vlgmr.msrb.gmra.mxu2 %v3460_v20 }
 0x3fe   :  { %v4116_v22 = vpop.f32.mrf.mxu3 }
 0x400   :  { %v1233_v24 = vpop.f32.mrf.mxu2 }
 0x403   :  { %1362 = vmatmul.bf16.vlgmr.msra.gmra.mxu3 %v3451_v23  ;;  %v3456_v23 = vld [vmem:[%s4594_s3 + $0xe8] sm:$0xff] }
 0x404   :  { %2014 = vmatpush.bf16.msra.mxu3 %v3823_v3 }
 0x406   :  { %v1029_v59 = vpop.f32.mrf.mxu3 }
 0x407   :  { %v1030_v36 = vadd.f32 %v1029_v59, %v950_v4 }
 0x408   :  { %2015 = vmatpush.bf16.msra.mxu3 %v3813_v37  ;;  %v1235_v41 = vpop.f32.mrf.mxu2 }
 0x409   :  { %v4126_v51 = vadd.f32 %v1233_v24, %v1030_v36 }
 0x40c   :  { %2016 = vmatpush.bf16.msra.mxu3 %v3805_v33 }
 0x40d   :  { %1587 = vmatmul.bf16.gmra.mxu2 %v3461_v1 }
 0x40e   :  { %v1031_v26 = vpop.f32.mrf.mxu3 }
 0x40f   :  { %v1032_v35 = vadd.f32 %v1031_v26, %v952_v13 }
 0x410   :  { %2017 = vmatpush.bf16.msra.mxu3 %v3877_v18  ;;  %v1238_v49 = vpop.f32.mrf.mxu2 }
 0x411   :  { %v4133_v25 = vadd.f32 %v1235_v41, %v1032_v35  ;;  %v3466_v41 = vld [vmem:[%s4594_s3 + $0x130] sm:$0xff] }
 0x412   :  { %v3457_v35 = vld [vmem:[%s4594_s3 + $0xf0] sm:$0xff] }
 0x413   :  { %1367 = vmatmul.bf16.gmra.mxu3 %v3452_v46 }
 0x414   :  { %2018 = vmatpush.bf16.msra.mxu3 %v3869_v34 }
 0x416   :  { %v1034_v53 = vpop.f32.mrf.mxu3 }
 0x417   :  { %v1035_v55 = vadd.f32 %v1034_v53, %v955_v10 }
 0x418   :  { %2019 = vmatpush.bf16.msra.mxu3 %v3859_v61  ;;  %v1240_v57 = vpop.f32.mrf.mxu2 }
 0x419   :  { %v4140_v30 = vadd.f32 %v1238_v49, %v1035_v55  ;;  %v3467_v55 = vld [vmem:[%s4594_s3 + $0x138] sm:$0xff] }
 0x41c   :  { %2020 = vmatpush.bf16.msra.mxu3 %v3849_v42 }
 0x41d   :  { %1592 = vmatmul.bf16.gmra.mxu2 %v3462_v43 }
 0x41e   :  { %v1036_v60 = vpop.f32.mrf.mxu3 }
 0x41f   :  { %v1037_v62 = vadd.f32 %v1036_v60, %v957_v45  ;;  %v3455_v45 = vld [vmem:[%s4594_s3 + $0xe0] sm:$0xff]  ;;  %v3458_v60 = vld [vmem:[%s4594_s3 + $0xf8] sm:$0xff] }
 0x420   :  { %2021 = vmatpush.bf16.msra.mxu3 %v3839_v16  ;;  %v1243_v28 = vpop.f32.mrf.mxu2 }
 0x421   :  { %v4147_v56 = vadd.f32 %v1240_v57, %v1037_v62 }
 0x423   :  { %1372 = vmatmul.bf16.gmra.mxu3 %v3453_v58 }
 0x426   :  { %v1039_v0 = vpop.f32.mrf.mxu3 }
 0x427   :  { %v1040_v14 = vadd.f32 %v1039_v0, %v960_v38 }
 0x428   :  { %v1245_v27 = vpop.f32.mrf.mxu2 }
 0x429   :  { %v4152_v2 = vadd.f32 %v1243_v28, %v1040_v14 }
 0x42d   :  { %1597 = vmatmul.bf16.gmra.mxu2 %v3463_v7 }
 0x42e   :  { %v1041_v4 = vpop.f32.mrf.mxu3 }
 0x42f   :  { %v1042_v6 = vadd.f32 %v1041_v4, %v962_v19  ;;  %v3465_v19 = vld [vmem:[%s4594_s3 + $0x128] sm:$0xff] }
 0x430   :  { %v1248_v13 = vpop.f32.mrf.mxu2 }
 0x431   :  { %v4157_v9 = vadd.f32 %v1245_v27, %v1042_v6 }
 0x433   :  { %1377 = vmatmul.bf16.gmra.mxu3 %v3454_v47 }
 0x436   :  { %v1044_v39 = vpop.f32.mrf.mxu3 }
 0x437   :  { %v1045_v10 = vadd.f32 %v1044_v39, %v4076_v31 }
 0x438   :  { %v1250_v48 = vpop.f32.mrf.mxu2 }
 0x439   :  { %v4163_v12 = vadd.f32 %v1248_v13, %v1045_v10 }
 0x43d   :  { %1602 = vmatmul.bf16.gmra.mxu2 %v3464_v11 }
 0x43e   :  { %v1046_v15 = vpop.f32.mrf.mxu3 }
 0x43f   :  { %v1047_v40 = vadd.f32 %v1046_v15, %v4079_v63 }
 0x440   :  { %v1253_v17 = vpop.f32.mrf.mxu2 }
 0x441   :  { %v4169_v32 = vadd.f32 %v1250_v48, %v1047_v40 }
 0x443   :  { %1382 = vmatmul.bf16.gmra.mxu3 %v3455_v45 }
 0x446   :  { %v1049_v31 = vpop.f32.mrf.mxu3 }
 0x447   :  { %v1050_v38 = vadd.f32 %v1049_v31, %v4084_v5 }
 0x448   :  { %v4172_v50 = vpop.f32.mrf.mxu2 }
 0x449   :  { %v4177_v20 = vadd.f32 %v1253_v17, %v1050_v38 }
 0x44d   :  { %1607 = vmatmul.bf16.gmra.mxu2 %v3465_v19 }
 0x44e   :  { %v4179_v63 = vpop.f32.mrf.mxu3 }
 0x450   :  { %v1258_v24 = vpop.f32.mrf.mxu2 }
 0x453   :  { %1387 = vmatmul.bf16.gmra.mxu3 %v3456_v23 }
 0x456   :  { %v1054_v59 = vpop.f32.mrf.mxu3 }
 0x457   :  { %v1055_v5 = vadd.f32 %v1054_v59, %v4092_v29 }
 0x458   :  { %v4185_v36 = vpop.f32.mrf.mxu2 }
 0x459   :  { %v4190_v1 = vadd.f32 %v1258_v24, %v1055_v5 }
 0x45d   :  { %1612 = vmatmul.bf16.gmra.mxu2 %v3466_v41 }
 0x45e   :  { %v4192_v26 = vpop.f32.mrf.mxu3 }
 0x460   :  { %v1263_v46 = vpop.f32.mrf.mxu2 }
 0x463   :  { %1392 = vmatmul.bf16.gmra.mxu3 %v3457_v35 }
 0x466   :  { %v1059_v49 = vpop.f32.mrf.mxu3 }
 0x467   :  { %v1060_v29 = vadd.f32 %v1059_v49, %v4103_v52 }
 0x468   :  { %v4198_v53 = vpop.f32.mrf.mxu2 }
 0x469   :  { %v4203_v57 = vadd.f32 %v1263_v46, %v1060_v29 }
 0x46d   :  { %1617 = vmatmul.bf16.gmra.mxu2 %v3467_v55 }
 0x46e   :  { %v4205_v43 = vpop.f32.mrf.mxu3 }
 0x470   :  { %v1268_v62 = vpop.f32.mrf.mxu2 }
 0x473   :  { %1397 = vmatmul.bf16.gmra.mxu3 %v3458_v60 }
 0x476   :  { %v1064_v58 = vpop.f32.mrf.mxu3 }
 0x477   :  { %v1065_v52 = vadd.f32 %v1064_v58, %v4111_v54 }
 0x478   :  { %v4211_v28 = vpop.f32.mrf.mxu2 }
 0x479   :  { %v4213_v0 = vadd.f32 %v1268_v62, %v1065_v52 }
 0x47e   :  { %v4215_v14 = vpop.f32.mrf.mxu3 }
 0x480   :  { %v1583_v27 = vpop.f32.mrf.mxu2 }
 0x486   :  { %v1363_v7 = vpop.f32.mrf.mxu3 }
 0x488   :  { %v1585_v4 = vpop.f32.mrf.mxu2 }
 0x489   :  { %v1623_v6 = vpack.c.bf16 %v1585_v4, %v1583_v27 }
 0x48b   :  { %3134 = vmatmul.msk.bf16.vlgmr.msrb.gmra.mxu3 %vm916_vm2, %v1623_v6 }
 0x48c   :  { %2454 = vmatpush.bf16.msrb.mxu3 %v3823_v3 }
 0x48e   :  { %v1365_v47 = vpop.f32.mrf.mxu3 }
 0x48f   :  { %v1403_v13 = vpack.c.bf16 %v1365_v47, %v1363_v7 }
 0x490   :  { %2455 = vmatpush.bf16.msrb.mxu3 %v3813_v37  ;;  %v1588_v39 = vpop.f32.mrf.mxu2 }
 0x491   :  { %3072 = vmatmul.msk.bf16.vlgmr.msrb.gmra.mxu1 %vm916_vm2, %v1403_v13 }
 0x492   :  { %2234 = vmatpush.bf16.msrb.mxu1 %v3823_v3 }
 0x494   :  { %2456 = vmatpush.bf16.msrb.mxu3 %v3805_v33 }
 0x496   :  { %2235 = vmatpush.bf16.msrb.mxu1 %v3813_v37  ;;  %v1368_v54 = vpop.f32.mrf.mxu3 }
 0x498   :  { %2457 = vmatpush.bf16.msrb.mxu3 %v3877_v18  ;;  %v1590_v10 = vpop.f32.mrf.mxu2 }
 0x499   :  { %v1624_v48 = vpack.c.bf16 %v1590_v10, %v1588_v39  ;;  %v3477_v39 = vld [vmem:[%s4595_s4 + $0x28] sm:$0xff] }
 0x49a   :  { %2236 = vmatpush.bf16.msrb.mxu1 %v3805_v33  ;;  %1891 = vmatpush.bf16.msra.mxu2 %v3477_v39 }
 0x49b   :  { %3135 = vmatmul.msk.bf16.gmra.mxu3 %vm916_vm2, %v1624_v48  ;;  %v3478_v48 = vld [vmem:[%s4594_s3 + $0x180] sm:$0xff] }
 0x49c   :  { %2458 = vmatpush.bf16.msrb.mxu3 %v3869_v34 }
 0x49e   :  { %2237 = vmatpush.bf16.msrb.mxu1 %v3877_v18  ;;  %v1370_v11 = vpop.f32.mrf.mxu3 }
 0x49f   :  { %v1404_v15 = vpack.c.bf16 %v1370_v11, %v1368_v54  ;;  %v3469_v11 = vld [vmem:[%s4594_s3 + $0x140] sm:$0xff] }
 0x4a0   :  { %2459 = vmatpush.bf16.msrb.mxu3 %v3859_v61  ;;  %v1593_v3 = vpop.f32.mrf.mxu2 }
 0x4a1   :  { %3073 = vmatmul.msk.bf16.gmra.mxu1 %vm916_vm2, %v1404_v15 }
 0x4a2   :  { %2238 = vmatpush.bf16.msrb.mxu1 %v3869_v34 }
 0x4a4   :  { %2460 = vmatpush.bf16.msrb.mxu3 %v3849_v42 }
 0x4a6   :  { %2239 = vmatpush.bf16.msrb.mxu1 %v3859_v61  ;;  %v1373_v33 = vpop.f32.mrf.mxu3 }
 0x4a8   :  { %2461 = vmatpush.bf16.msrb.mxu3 %v3839_v16  ;;  %v1595_v37 = vpop.f32.mrf.mxu2 }
 0x4a9   :  { %v1625_v40 = vpack.c.bf16 %v1595_v37, %v1593_v3 }
 0x4aa   :  { %2240 = vmatpush.bf16.msrb.mxu1 %v3849_v42 }
 0x4ab   :  { %3136 = vmatmul.msk.bf16.gmra.mxu3 %vm916_vm2, %v1625_v40 }
 0x4ae   :  { %2241 = vmatpush.bf16.msrb.mxu1 %v3839_v16  ;;  %v1375_v18 = vpop.f32.mrf.mxu3 }
 0x4af   :  { %v1405_v45 = vpack.c.bf16 %v1375_v18, %v1373_v33 }
 0x4b0   :  { %v1598_v17 = vpop.f32.mrf.mxu2 }
 0x4b1   :  { %3074 = vmatmul.msk.bf16.gmra.mxu1 %vm916_vm2, %v1405_v45 }
 0x4b6   :  { %v1378_v34 = vpop.f32.mrf.mxu3 }
 0x4b8   :  { %v1600_v31 = vpop.f32.mrf.mxu2 }
 0x4b9   :  { %v1626_v38 = vpack.c.bf16 %v1600_v31, %v1598_v17  ;;  %v3479_v17 = vld [vmem:[%s4594_s3 + $0x188] sm:$0xff] }
 0x4ba   :  { %v3470_v31 = vld [vmem:[%s4594_s3 + $0x148] sm:$0xff] }
 0x4bb   :  { %3137 = vmatmul.msk.bf16.gmra.mxu3 %vm916_vm2, %v1626_v38 }
 0x4be   :  { %v1380_v61 = vpop.f32.mrf.mxu3 }
 0x4bf   :  { %v1406_v19 = vpack.c.bf16 %v1380_v61, %v1378_v34 }
 0x4c0   :  { %v1603_v23 = vpop.f32.mrf.mxu2 }
 0x4c1   :  { %3075 = vmatmul.msk.bf16.gmra.mxu1 %vm916_vm2, %v1406_v19 }
 0x4c6   :  { %v1383_v42 = vpop.f32.mrf.mxu3 }
 0x4c8   :  { %v1605_v24 = vpop.f32.mrf.mxu2 }
 0x4c9   :  { %v1627_v59 = vpack.c.bf16 %v1605_v24, %v1603_v23  ;;  %v3480_v24 = vld [vmem:[%s4594_s3 + $0x190] sm:$0xff] }
 0x4cb   :  { %3138 = vmatmul.msk.bf16.gmra.mxu3 %vm916_vm2, %v1627_v59 }
 0x4ce   :  { %v1385_v16 = vpop.f32.mrf.mxu3 }
 0x4cf   :  { %v1407_v5 = vpack.c.bf16 %v1385_v16, %v1383_v42  ;;  %v3471_v16 = vld [vmem:[%s4594_s3 + $0x150] sm:$0xff] }
 0x4d0   :  { %v1608_v41 = vpop.f32.mrf.mxu2 }
 0x4d1   :  { %3076 = vmatmul.msk.bf16.gmra.mxu1 %vm916_vm2, %v1407_v5 }
 0x4d6   :  { %v1388_v35 = vpop.f32.mrf.mxu3 }
 0x4d8   :  { %v1610_v46 = vpop.f32.mrf.mxu2 }
 0x4d9   :  { %v1628_v49 = vpack.c.bf16 %v1610_v46, %v1608_v41 }
 0x4db   :  { %3139 = vmatmul.msk.bf16.gmra.mxu3 %vm916_vm2, %v1628_v49 }
 0x4de   :  { %v1390_v29 = vpop.f32.mrf.mxu3 }
 0x4df   :  { %v1408_v55 = vpack.c.bf16 %v1390_v29, %v1388_v35  ;;  %v3481_v29 = vld [vmem:[%s4594_s3 + $0x198] sm:$0xff] }
 0x4e0   :  { %v1613_v60 = vpop.f32.mrf.mxu2 }
 0x4e1   :  { %3077 = vmatmul.msk.bf16.gmra.mxu1 %vm916_vm2, %v1408_v55 }
 0x4e6   :  { %v1393_v62 = vpop.f32.mrf.mxu3 }
 0x4e8   :  { %v1615_v58 = vpop.f32.mrf.mxu2 }
 0x4e9   :  { %v1629_v52 = vpack.c.bf16 %v1615_v58, %v1613_v60  ;;  %v3472_v60 = vld [vmem:[%s4594_s3 + $0x158] sm:$0xff] }
 0x4eb   :  { %3140 = vmatmul.msk.bf16.gmra.mxu3 %vm916_vm2, %v1629_v52 }
 0x4ee   :  { %v1395_v27 = vpop.f32.mrf.mxu3 }
 0x4ef   :  { %v1409_v7 = vpack.c.bf16 %v1395_v27, %v1393_v62 }
 0x4f0   :  { %v1618_v4 = vpop.f32.mrf.mxu2 }
 0x4f1   :  { %3078 = vmatmul.msk.bf16.gmra.mxu1 %vm916_vm2, %v1409_v7 }
 0x4f6   :  { %v1398_v6 = vpop.f32.mrf.mxu3 }
 0x4f8   :  { %v1620_v47 = vpop.f32.mrf.mxu2 }
 0x4f9   :  { %v1630_v13 = vpack.c.bf16 %v1620_v47, %v1618_v4  ;;  %v3482_v4 = vld [vmem:[%s4594_s3 + $0x1a0] sm:$0xff] }
 0x4fa   :  { %v3473_v47 = vld [vmem:[%s4594_s3 + $0x160] sm:$0xff] }
 0x4fb   :  { %3141 = vmatmul.msk.bf16.gmra.mxu3 %vm916_vm2, %v1630_v13 }
 0x4fe   :  { %v1400_v54 = vpop.f32.mrf.mxu3 }
 0x4ff   :  { %v1410_v10 = vpack.c.bf16 %v1400_v54, %v1398_v6  ;;  %v1052_v54 = vadd.f32 %v4179_v63, %v4087_v8 }
 0x501   :  { %3079 = vmatmul.msk.bf16.gmra.mxu1 %vm916_vm2, %v1410_v10 }
 0x50b   :  { %2022 = vmatmul.bf16.vlgmr.msra.gmra.mxu3 %v3478_v48 }
 0x50e   :  { %v1453_v15 = vpop.f32.mrf.mxu1  ;;  %v1673_v3 = vpop.f32.mrf.mxu3 }
 0x50f   :  { %v1493_v33 = vadd.f32 %v1453_v15, %v4126_v51 }
 0x511   :  { %v4259_v37 = vadd.f32 %v1673_v3, %v1493_v33  ;;  %1802 = vmatmul.bf16.vlgmr.msra.gmra.mxu1 %v3469_v11  ;;  %v3483_v3 = vld [vmem:[%s4594_s3 + $0x1a8] sm:$0xff] }
 0x516   :  { %v1455_v40 = vpop.f32.mrf.mxu1  ;;  %v1675_v18 = vpop.f32.mrf.mxu3 }
 0x517   :  { %v1494_v45 = vadd.f32 %v1455_v40, %v4133_v25 }
 0x519   :  { %v4265_v34 = vadd.f32 %v1675_v18, %v1494_v45 }
 0x51b   :  { %2027 = vmatmul.bf16.gmra.mxu3 %v3479_v17 }
 0x51e   :  { %v1458_v38 = vpop.f32.mrf.mxu1  ;;  %v1678_v51 = vpop.f32.mrf.mxu3 }
 0x51f   :  { %v1495_v61 = vadd.f32 %v1458_v38, %v4140_v30 }
 0x521   :  { %v4271_v19 = vadd.f32 %v1678_v51, %v1495_v61  ;;  %1807 = vmatmul.bf16.gmra.mxu1 %v3470_v31  ;;  %v3484_v51 = vld [vmem:[%s4594_s3 + $0x1b0] sm:$0xff] }
 0x526   :  { %v1460_v23 = vpop.f32.mrf.mxu1  ;;  %v1680_v25 = vpop.f32.mrf.mxu3 }
 0x527   :  { %v1496_v42 = vadd.f32 %v1460_v23, %v4147_v56 }
 0x529   :  { %v4277_v59 = vadd.f32 %v1680_v25, %v1496_v42 }
 0x52b   :  { %2032 = vmatmul.bf16.gmra.mxu3 %v3480_v24 }
 0x52e   :  { %v1463_v5 = vpop.f32.mrf.mxu1  ;;  %v1683_v30 = vpop.f32.mrf.mxu3 }
 0x52f   :  { %v1497_v41 = vadd.f32 %v1463_v5, %v4152_v2 }
 0x531   :  { %v4283_v35 = vadd.f32 %v1683_v30, %v1497_v41  ;;  %1812 = vmatmul.bf16.gmra.mxu1 %v3471_v16  ;;  %v3485_v30 = vld [vmem:[%s4594_s3 + $0x1b8] sm:$0xff] }
 0x536   :  { %v1465_v46 = vpop.f32.mrf.mxu1  ;;  %v1685_v56 = vpop.f32.mrf.mxu3 }
 0x537   :  { %v1498_v49 = vadd.f32 %v1465_v46, %v4157_v9 }
 0x539   :  { %v4289_v55 = vadd.f32 %v1685_v56, %v1498_v49  ;;  %v1067_v56 = vadd.f32 %v4215_v14, %v4116_v22  ;;  %v3487_v22 = vld [vmem:[%s4594_s3 + $0x1c0] sm:$0xff] }
 0x53b   :  { %2037 = vmatmul.bf16.gmra.mxu3 %v3481_v29  ;;  %v3504_v29 = vld [vmem:[%s4595_s4 + $0x40] sm:$0xff] }
 0x53c   :  { %2551 = vmatpush.bf16.msra.mxu0 %v3504_v29 }
 0x53e   :  { %v1468_v62 = vpop.f32.mrf.mxu1  ;;  %v1688_v2 = vpop.f32.mrf.mxu3 }
 0x53f   :  { %v1499_v58 = vadd.f32 %v1468_v62, %v4163_v12 }
 0x541   :  { %v4295_v52 = vadd.f32 %v1688_v2, %v1499_v58  ;;  %1817 = vmatmul.bf16.gmra.mxu1 %v3472_v60  ;;  %v1288_v60 = vadd.f32 %v4211_v28, %v1067_v56 }
 0x546   :  { %v1470_v27 = vpop.f32.mrf.mxu1  ;;  %v1690_v9 = vpop.f32.mrf.mxu3 }
 0x547   :  { %v1500_v7 = vadd.f32 %v1470_v27, %v4169_v32  ;;  %v1282_v32 = vadd.f32 %v4172_v50, %v1052_v54  ;;  %v1057_v50 = vadd.f32 %v4192_v26, %v4095_v21 }
 0x549   :  { %v4301_v6 = vadd.f32 %v1690_v9, %v1500_v7  ;;  %v1284_v45 = vadd.f32 %v4185_v36, %v1057_v50  ;;  %v1062_v36 = vadd.f32 %v4205_v43, %v4106_v44  ;;  %v3476_v44 = vld [vmem:[%s4594_s3 + $0x178] sm:$0xff] }
 0x54b   :  { %2042 = vmatmul.bf16.gmra.mxu3 %v3482_v4  ;;  %v1286_v42 = vadd.f32 %v4198_v53, %v1062_v36 }
 0x54e   :  { %v1473_v13 = vpop.f32.mrf.mxu1  ;;  %v1693_v12 = vpop.f32.mrf.mxu3 }
 0x54f   :  { %v1501_v39 = vadd.f32 %v1473_v13, %v4177_v20  ;;  %v3474_v20 = vld [vmem:[%s4594_s3 + $0x168] sm:$0xff] }
 0x550   :  { %v3497_v13 = vld [vmem:[%s4594_s3 + $0x208] sm:$0xff] }
 0x551   :  { %v4309_v10 = vadd.f32 %v1693_v12, %v1501_v39  ;;  %1822 = vmatmul.bf16.gmra.mxu1 %v3473_v47  ;;  %v3488_v12 = vld [vmem:[%s4594_s3 + $0x1c8] sm:$0xff] }
 0x556   :  { %v1475_v48 = vpop.f32.mrf.mxu1  ;;  %v1695_v11 = vpop.f32.mrf.mxu3 }
 0x557   :  { %v1502_v15 = vadd.f32 %v1475_v48, %v1282_v32 }
 0x559   :  { %v4315_v33 = vadd.f32 %v1695_v11, %v1502_v15 }
 0x55b   :  { %2047 = vmatmul.bf16.gmra.mxu3 %v3483_v3  ;;  %v3498_v3 = vld [vmem:[%s4594_s3 + $0x210] sm:$0xff] }
 0x55e   :  { %v1478_v8 = vpop.f32.mrf.mxu1  ;;  %v1698_v63 = vpop.f32.mrf.mxu3 }
 0x55f   :  { %v1503_v40 = vadd.f32 %v1478_v8, %v4190_v1  ;;  %v3475_v1 = vld [vmem:[%s4594_s3 + $0x170] sm:$0xff] }
 0x561   :  { %v4323_v18 = vadd.f32 %v1698_v63, %v1503_v40  ;;  %1827 = vmatmul.bf16.gmra.mxu1 %v3474_v20  ;;  %v3489_v20 = vld [vmem:[%s4594_s3 + $0x1d0] sm:$0xff] }
 0x566   :  { %v1480_v17 = vpop.f32.mrf.mxu1  ;;  %v1700_v31 = vpop.f32.mrf.mxu3 }
 0x567   :  { %v1504_v38 = vadd.f32 %v1480_v17, %v1284_v45 }
 0x569   :  { %v4329_v61 = vadd.f32 %v1700_v31, %v1504_v38  ;;  %v3499_v31 = vld [vmem:[%s4594_s3 + $0x218] sm:$0xff] }
 0x56a   :  { %v3490_v38 = vld [vmem:[%s4594_s3 + $0x1d8] sm:$0xff] }
 0x56b   :  { %2052 = vmatmul.bf16.gmra.mxu3 %v3484_v51 }
 0x56e   :  { %v1483_v21 = vpop.f32.mrf.mxu1  ;;  %v1703_v26 = vpop.f32.mrf.mxu3 }
 0x56f   :  { %v1505_v23 = vadd.f32 %v1483_v21, %v4203_v57  ;;  %v3495_v57 = vld [vmem:[%s4595_s4 + $0x38] sm:$0xff] }
 0x570   :  { %2331 = vmatpush.bf16.msrb.mxu2 %v3495_v57 }
 0x571   :  { %v4337_v25 = vadd.f32 %v1703_v26, %v1505_v23  ;;  %1832 = vmatmul.bf16.gmra.mxu1 %v3475_v1 }
 0x576   :  { %v1485_v24 = vpop.f32.mrf.mxu1  ;;  %v1705_v16 = vpop.f32.mrf.mxu3 }
 0x577   :  { %v1506_v5 = vadd.f32 %v1485_v24, %v1286_v42  ;;  %v3500_v42 = vld [vmem:[%s4594_s3 + $0x220] sm:$0xff] }
 0x578   :  { %v3491_v24 = vld [vmem:[%s4594_s3 + $0x1e0] sm:$0xff] }
 0x579   :  { %v4343_v41 = vadd.f32 %v1705_v16, %v1506_v5 }
 0x57b   :  { %2057 = vmatmul.bf16.gmra.mxu3 %v3485_v30 }
 0x57e   :  { %v1488_v53 = vpop.f32.mrf.mxu1  ;;  %v1708_v43 = vpop.f32.mrf.mxu3 }
 0x57f   :  { %v1507_v46 = vadd.f32 %v1488_v53, %v4213_v0  ;;  %v3496_v0 = vld [vmem:[%s4594_s3 + $0x200] sm:$0xff] }
 0x581   :  { %v4354_v49 = vadd.f32 %v1708_v43, %v1507_v46  ;;  %1837 = vmatmul.bf16.gmra.mxu1 %v3476_v44  ;;  %v3501_v43 = vld [vmem:[%s4594_s3 + $0x228] sm:$0xff] }
 0x582   :  { %v3492_v46 = vld [vmem:[%s4594_s3 + $0x1e8] sm:$0xff] }
 0x586   :  { %v1490_v62 = vpop.f32.mrf.mxu1  ;;  %v1710_v2 = vpop.f32.mrf.mxu3 }
 0x587   :  { %v1508_v58 = vadd.f32 %v1490_v62, %v1288_v60 }
 0x589   :  { %v4363_v27 = vadd.f32 %v1710_v2, %v1508_v58 }
 0x58b   :  { %2462 = vmatmul.bf16.vlgmr.msrb.gmra.mxu3 %v3496_v0  ;;  %v3502_v0 = vld [vmem:[%s4594_s3 + $0x230] sm:$0xff] }
 0x58e   :  { %v1803_v14 = vpop.f32.mrf.mxu1  ;;  %v2023_v9 = vpop.f32.mrf.mxu3 }
 0x591   :  { %2242 = vmatmul.bf16.vlgmr.msrb.gmra.mxu1 %v3487_v22  ;;  %v3493_v22 = vld [vmem:[%s4594_s3 + $0x1f0] sm:$0xff] }
 0x596   :  { %v1805_v7 = vpop.f32.mrf.mxu1  ;;  %v2025_v4 = vpop.f32.mrf.mxu3 }
 0x597   :  { %v1843_v28 = vpack.c.bf16 %v1805_v7, %v1803_v14  ;;  %v2063_v47 = vpack.c.bf16 %v2025_v4, %v2023_v9 }
 0x599   :  { %3196 = vmatmul.msk.bf16.vlgmr.msra.gmra.mxu2 %vm916_vm2, %v1843_v28  ;;  %3258 = vmatmul.msk.bf16.vlgmr.msrb.gmra.mxu0 %vm916_vm2, %v2063_v47 }
 0x59b   :  { %2467 = vmatmul.bf16.gmra.mxu3 %v3497_v13  ;;  %v3503_v13 = vld [vmem:[%s4594_s3 + $0x238] sm:$0xff] }
 0x59e   :  { %v1808_v39 = vpop.f32.mrf.mxu1  ;;  %v2028_v54 = vpop.f32.mrf.mxu3 }
 0x5a1   :  { %2247 = vmatmul.bf16.gmra.mxu1 %v3488_v12  ;;  %v3494_v12 = vld [vmem:[%s4594_s3 + $0x1f8] sm:$0xff] }
 0x5a6   :  { %v1810_v32 = vpop.f32.mrf.mxu1  ;;  %v2030_v48 = vpop.f32.mrf.mxu3 }
 0x5a7   :  { %v1844_v11 = vpack.c.bf16 %v1810_v32, %v1808_v39  ;;  %v2064_v15 = vpack.c.bf16 %v2030_v48, %v2028_v54 }
 0x5a9   :  { %3197 = vmatmul.msk.bf16.gmra.mxu2 %vm916_vm2, %v1844_v11  ;;  %3259 = vmatmul.msk.bf16.gmra.mxu0 %vm916_vm2, %v2064_v15 }
 0x5ab   :  { %2472 = vmatmul.bf16.gmra.mxu3 %v3498_v3 }
 0x5ae   :  { %v1813_v8 = vpop.f32.mrf.mxu1  ;;  %v2033_v63 = vpop.f32.mrf.mxu3 }
 0x5b1   :  { %2252 = vmatmul.bf16.gmra.mxu1 %v3489_v20 }
 0x5b6   :  { %v1815_v40 = vpop.f32.mrf.mxu1  ;;  %v2035_v50 = vpop.f32.mrf.mxu3 }
 0x5b7   :  { %v1845_v45 = vpack.c.bf16 %v1815_v40, %v1813_v8  ;;  %v2065_v17 = vpack.c.bf16 %v2035_v50, %v2033_v63 }
 0x5b9   :  { %3198 = vmatmul.msk.bf16.gmra.mxu2 %vm916_vm2, %v1845_v45  ;;  %3260 = vmatmul.msk.bf16.gmra.mxu0 %vm916_vm2, %v2065_v17 }
 0x5bb   :  { %2477 = vmatmul.bf16.gmra.mxu3 %v3499_v31 }
 0x5be   :  { %v1818_v51 = vpop.f32.mrf.mxu1  ;;  %v2038_v1 = vpop.f32.mrf.mxu3 }
 0x5c1   :  { %2257 = vmatmul.bf16.gmra.mxu1 %v3490_v38 }
 0x5c6   :  { %v1820_v21 = vpop.f32.mrf.mxu1  ;;  %v2040_v26 = vpop.f32.mrf.mxu3 }
 0x5c7   :  { %v1846_v23 = vpack.c.bf16 %v1820_v21, %v1818_v51  ;;  %v2066_v36 = vpack.c.bf16 %v2040_v26, %v2038_v1 }
 0x5c9   :  { %3199 = vmatmul.msk.bf16.gmra.mxu2 %vm916_vm2, %v1846_v23  ;;  %3261 = vmatmul.msk.bf16.gmra.mxu0 %vm916_vm2, %v2066_v36 }
 0x5cb   :  { %2482 = vmatmul.bf16.gmra.mxu3 %v3500_v42 }
 0x5ce   :  { %v1823_v16 = vpop.f32.mrf.mxu1  ;;  %v2043_v5 = vpop.f32.mrf.mxu3 }
 0x5d1   :  { %2262 = vmatmul.bf16.gmra.mxu1 %v3491_v24 }
 0x5d6   :  { %v1825_v30 = vpop.f32.mrf.mxu1  ;;  %v2045_v57 = vpop.f32.mrf.mxu3 }
 0x5d7   :  { %v1847_v44 = vpack.c.bf16 %v1825_v30, %v1823_v16  ;;  %v2067_v53 = vpack.c.bf16 %v2045_v57, %v2043_v5 }
 0x5d9   :  { %3200 = vmatmul.msk.bf16.gmra.mxu2 %vm916_vm2, %v1847_v44  ;;  %3262 = vmatmul.msk.bf16.gmra.mxu0 %vm916_vm2, %v2067_v53 }
 0x5db   :  { %2487 = vmatmul.bf16.gmra.mxu3 %v3501_v43 }
 0x5de   :  { %v1828_v56 = vpop.f32.mrf.mxu1  ;;  %v2048_v29 = vpop.f32.mrf.mxu3 }
 0x5e1   :  { %2267 = vmatmul.bf16.gmra.mxu1 %v3492_v46 }
 0x5e6   :  { %v1830_v60 = vpop.f32.mrf.mxu1  ;;  %v2050_v62 = vpop.f32.mrf.mxu3 }
 0x5e7   :  { %v1848_v2 = vpack.c.bf16 %v1830_v60, %v1828_v56  ;;  %v2068_v58 = vpack.c.bf16 %v2050_v62, %v2048_v29 }
 0x5e9   :  { %3201 = vmatmul.msk.bf16.gmra.mxu2 %vm916_vm2, %v1848_v2  ;;  %3263 = vmatmul.msk.bf16.gmra.mxu0 %vm916_vm2, %v2068_v58 }
 0x5eb   :  { %2492 = vmatmul.bf16.gmra.mxu3 %v3502_v0 }
 0x5ee   :  { %v1833_v14 = vpop.f32.mrf.mxu1  ;;  %v2053_v9 = vpop.f32.mrf.mxu3 }
 0x5f1   :  { %2272 = vmatmul.bf16.gmra.mxu1 %v3493_v22 }
 0x5f6   :  { %v1835_v7 = vpop.f32.mrf.mxu1  ;;  %v2055_v4 = vpop.f32.mrf.mxu3 }
 0x5f7   :  { %v1849_v28 = vpack.c.bf16 %v1835_v7, %v1833_v14  ;;  %v2069_v47 = vpack.c.bf16 %v2055_v4, %v2053_v9 }
 0x5f9   :  { %3202 = vmatmul.msk.bf16.gmra.mxu2 %vm916_vm2, %v1849_v28  ;;  %3264 = vmatmul.msk.bf16.gmra.mxu0 %vm916_vm2, %v2069_v47 }
 0x5fb   :  { %2497 = vmatmul.bf16.gmra.mxu3 %v3503_v13 }
 0x5fe   :  { %v1838_v39 = vpop.f32.mrf.mxu1  ;;  %v2058_v54 = vpop.f32.mrf.mxu3 }
 0x601   :  { %2277 = vmatmul.bf16.gmra.mxu1 %v3494_v12 }
 0x606   :  { %v1840_v32 = vpop.f32.mrf.mxu1  ;;  %v2060_v48 = vpop.f32.mrf.mxu3 }
 0x607   :  { %v1850_v11 = vpack.c.bf16 %v1840_v32, %v1838_v39  ;;  %v2070_v15 = vpack.c.bf16 %v2060_v48, %v2058_v54 }
 0x609   :  { %3203 = vmatmul.msk.bf16.gmra.mxu2 %vm916_vm2, %v1850_v11  ;;  %3265 = vmatmul.msk.bf16.gmra.mxu0 %vm916_vm2, %v2070_v15 }
 0x60e   :  { %v2243_v3 = vpop.f32.mrf.mxu1  ;;  %v2463_v20 = vpop.f32.mrf.mxu3 }
 0x616   :  { %v2113_v8 = vpop.f32.mrf.mxu0  ;;  %v2245_v63 = vpop.f32.mrf.mxu1 }
 0x617   :  { %v2283_v40 = vpack.c.bf16 %v2245_v63, %v2243_v3  ;;  %v2465_v50 = vpop.f32.mrf.mxu3 }
 0x618   :  { %v2503_v45 = vpack.c.bf16 %v2465_v50, %v2463_v20 }
 0x619   :  { %3320 = vmatmul.msk.bf16.vlgmr.msrb.gmra.mxu2 %vm916_vm2, %v2283_v40 }
 0x61a   :  { %3382 = vmatmul.msk.bf16.vlgmr.msra.gmra.mxu0 %vm916_vm2, %v2503_v45 }
 0x61c   :  { %v1893_v17 = vpop.f32.mrf.mxu2 }
 0x61d   :  { %v1933_v31 = vadd.f32 %v1893_v17, %v4259_v37 }
 0x61e   :  { %v2115_v38 = vpop.f32.mrf.mxu0  ;;  %v2248_v51 = vpop.f32.mrf.mxu1 }
 0x61f   :  { %v2468_v1 = vpop.f32.mrf.mxu3  ;;  %v4429_v21 = vadd.f32 %v2113_v8, %v1933_v31 }
 0x624   :  { %v1895_v26 = vpop.f32.mrf.mxu2 }
 0x625   :  { %v1934_v23 = vadd.f32 %v1895_v26, %v4265_v34 }
 0x626   :  { %v2118_v36 = vpop.f32.mrf.mxu0  ;;  %v2250_v42 = vpop.f32.mrf.mxu1 }
 0x627   :  { %v2284_v24 = vpack.c.bf16 %v2250_v42, %v2248_v51  ;;  %v2470_v16 = vpop.f32.mrf.mxu3  ;;  %v4432_v5 = vadd.f32 %v2115_v38, %v1934_v23 }
 0x628   :  { %v2504_v30 = vpack.c.bf16 %v2470_v16, %v2468_v1 }
 0x629   :  { %3321 = vmatmul.msk.bf16.gmra.mxu2 %vm916_vm2, %v2284_v24 }
 0x62a   :  { %3383 = vmatmul.msk.bf16.gmra.mxu0 %vm916_vm2, %v2504_v30 }
 0x62c   :  { %v1898_v37 = vpop.f32.mrf.mxu2 }
 0x62d   :  { %v1935_v57 = vadd.f32 %v1898_v37, %v4271_v19 }
 0x62e   :  { %v2120_v44 = vpop.f32.mrf.mxu0  ;;  %v2253_v53 = vpop.f32.mrf.mxu1 }
 0x62f   :  { %v2473_v43 = vpop.f32.mrf.mxu3  ;;  %v4437_v46 = vadd.f32 %v2118_v36, %v1935_v57 }
 0x634   :  { %v1900_v34 = vpop.f32.mrf.mxu2 }
 0x635   :  { %v1936_v56 = vadd.f32 %v1900_v34, %v4277_v59 }
 0x636   :  { %v2123_v29 = vpop.f32.mrf.mxu0  ;;  %v2255_v60 = vpop.f32.mrf.mxu1 }
 0x637   :  { %v2285_v62 = vpack.c.bf16 %v2255_v60, %v2253_v53  ;;  %v2475_v2 = vpop.f32.mrf.mxu3  ;;  %v4440_v58 = vadd.f32 %v2120_v44, %v1936_v56 }
 0x638   :  { %v2505_v0 = vpack.c.bf16 %v2475_v2, %v2473_v43 }
 0x639   :  { %3322 = vmatmul.msk.bf16.gmra.mxu2 %vm916_vm2, %v2285_v62 }
 0x63a   :  { %3384 = vmatmul.msk.bf16.gmra.mxu0 %vm916_vm2, %v2505_v0 }
 0x63c   :  { %v1903_v19 = vpop.f32.mrf.mxu2 }
 0x63d   :  { %v1937_v22 = vadd.f32 %v1903_v19, %v4283_v35 }
 0x63e   :  { %v2125_v14 = vpop.f32.mrf.mxu0  ;;  %v2258_v9 = vpop.f32.mrf.mxu1 }
 0x63f   :  { %v2478_v7 = vpop.f32.mrf.mxu3  ;;  %v4445_v4 = vadd.f32 %v2123_v29, %v1937_v22 }
 0x644   :  { %v1905_v59 = vpop.f32.mrf.mxu2 }
 0x645   :  { %v1938_v28 = vadd.f32 %v1905_v59, %v4289_v55 }
 0x646   :  { %v2128_v47 = vpop.f32.mrf.mxu0  ;;  %v2260_v13 = vpop.f32.mrf.mxu1 }
 0x647   :  { %v2286_v12 = vpack.c.bf16 %v2260_v13, %v2258_v9  ;;  %v2480_v39 = vpop.f32.mrf.mxu3  ;;  %v4448_v54 = vadd.f32 %v2125_v14, %v1938_v28 }
 0x648   :  { %v2506_v32 = vpack.c.bf16 %v2480_v39, %v2478_v7 }
 0x649   :  { %3323 = vmatmul.msk.bf16.gmra.mxu2 %vm916_vm2, %v2286_v12 }
 0x64a   :  { %3385 = vmatmul.msk.bf16.gmra.mxu0 %vm916_vm2, %v2506_v32 }
 0x64c   :  { %v1908_v35 = vpop.f32.mrf.mxu2 }
 0x64d   :  { %v1939_v48 = vadd.f32 %v1908_v35, %v4295_v52 }
 0x64e   :  { %v2130_v11 = vpop.f32.mrf.mxu0  ;;  %v2263_v15 = vpop.f32.mrf.mxu1 }
 0x64f   :  { %v2483_v3 = vpop.f32.mrf.mxu3  ;;  %v4453_v20 = vadd.f32 %v2128_v47, %v1939_v48 }
 0x654   :  { %v1910_v55 = vpop.f32.mrf.mxu2 }
 0x655   :  { %v1940_v8 = vadd.f32 %v1910_v55, %v4301_v6 }
 0x656   :  { %v2133_v63 = vpop.f32.mrf.mxu0  ;;  %v2265_v40 = vpop.f32.mrf.mxu1 }
 0x657   :  { %v2287_v50 = vpack.c.bf16 %v2265_v40, %v2263_v15  ;;  %v2485_v45 = vpop.f32.mrf.mxu3  ;;  %v4456_v17 = vadd.f32 %v2130_v11, %v1940_v8 }
 0x658   :  { %v2507_v31 = vpack.c.bf16 %v2485_v45, %v2483_v3  ;;  %v4494_v45 = vld [vmem:[%s4596_s5] ss:$0 sm:$0xff] }
 0x659   :  { %3324 = vmatmul.msk.bf16.gmra.mxu2 %vm916_vm2, %v2287_v50 }
 0x65a   :  { %3386 = vmatmul.msk.bf16.gmra.mxu0 %vm916_vm2, %v2507_v31 }
 0x65c   :  { %v1913_v52 = vpop.f32.mrf.mxu2 }
 0x65d   :  { %v1941_v38 = vadd.f32 %v1913_v52, %v4309_v10 }
 0x65e   :  { %v2135_v51 = vpop.f32.mrf.mxu0  ;;  %v2268_v1 = vpop.f32.mrf.mxu1 }
 0x65f   :  { %v2488_v26 = vpop.f32.mrf.mxu3  ;;  %v4461_v23 = vadd.f32 %v2133_v63, %v1941_v38 }
 0x664   :  { %v1915_v6 = vpop.f32.mrf.mxu2 }
 0x665   :  { %v1942_v36 = vadd.f32 %v1915_v6, %v4315_v33 }
 0x666   :  { %v2138_v42 = vpop.f32.mrf.mxu0  ;;  %v2270_v24 = vpop.f32.mrf.mxu1 }
 0x667   :  { %v2288_v16 = vpack.c.bf16 %v2270_v24, %v2268_v1  ;;  %v2490_v30 = vpop.f32.mrf.mxu3  ;;  %v4464_v37 = vadd.f32 %v2135_v51, %v1942_v36 }
 0x668   :  { %v2508_v57 = vpack.c.bf16 %v2490_v30, %v2488_v26 }
 0x669   :  { %3325 = vmatmul.msk.bf16.gmra.mxu2 %vm916_vm2, %v2288_v16 }
 0x66a   :  { %3387 = vmatmul.msk.bf16.gmra.mxu0 %vm916_vm2, %v2508_v57 }
 0x66c   :  { %v1918_v10 = vpop.f32.mrf.mxu2 }
 0x66d   :  { %v1943_v44 = vadd.f32 %v1918_v10, %v4323_v18 }
 0x66e   :  { %v2140_v53 = vpop.f32.mrf.mxu0  ;;  %v2273_v43 = vpop.f32.mrf.mxu1 }
 0x66f   :  { %v2493_v34 = vpop.f32.mrf.mxu3  ;;  %v4469_v56 = vadd.f32 %v2138_v42, %v1943_v44 }
 0x674   :  { %v1920_v33 = vpop.f32.mrf.mxu2 }
 0x675   :  { %v1944_v29 = vadd.f32 %v1920_v33, %v4329_v61 }
 0x676   :  { %v2143_v60 = vpop.f32.mrf.mxu0  ;;  %v2275_v62 = vpop.f32.mrf.mxu1 }
 0x677   :  { %v2289_v2 = vpack.c.bf16 %v2275_v62, %v2273_v43  ;;  %v2495_v0 = vpop.f32.mrf.mxu3  ;;  %v4472_v19 = vadd.f32 %v2140_v53, %v1944_v29 }
 0x678   :  { %v2509_v22 = vpack.c.bf16 %v2495_v0, %v2493_v34 }
 0x679   :  { %3326 = vmatmul.msk.bf16.gmra.mxu2 %vm916_vm2, %v2289_v2 }
 0x67a   :  { %3388 = vmatmul.msk.bf16.gmra.mxu0 %vm916_vm2, %v2509_v22 }
 0x67c   :  { %v1923_v18 = vpop.f32.mrf.mxu2 }
 0x67d   :  { %v1945_v14 = vadd.f32 %v1923_v18, %v4337_v25 }
 0x67e   :  { %v2145_v9 = vpop.f32.mrf.mxu0  ;;  %v2278_v7 = vpop.f32.mrf.mxu1 }
 0x67f   :  { %v2498_v59 = vpop.f32.mrf.mxu3  ;;  %v4477_v28 = vadd.f32 %v2143_v60, %v1945_v14 }
 0x684   :  { %v1925_v61 = vpop.f32.mrf.mxu2 }
 0x685   :  { %v1946_v47 = vadd.f32 %v1925_v61, %v4343_v41 }
 0x686   :  { %v2148_v13 = vpop.f32.mrf.mxu0  ;;  %v2280_v12 = vpop.f32.mrf.mxu1 }
 0x687   :  { %v2290_v39 = vpack.c.bf16 %v2280_v12, %v2278_v7  ;;  %v2500_v32 = vpop.f32.mrf.mxu3  ;;  %v4480_v35 = vadd.f32 %v2145_v9, %v1946_v47 }
 0x688   :  { %v2510_v48 = vpack.c.bf16 %v2500_v32, %v2498_v59 }
 0x689   :  { %3327 = vmatmul.msk.bf16.gmra.mxu2 %vm916_vm2, %v2290_v39 }
 0x68a   :  { %3389 = vmatmul.msk.bf16.gmra.mxu0 %vm916_vm2, %v2510_v48 }
 0x68c   :  { %v1928_v25 = vpop.f32.mrf.mxu2 }
 0x68d   :  { %v1947_v11 = vadd.f32 %v1928_v25, %v4354_v49 }
 0x68e   :  { %v2150_v15 = vpop.f32.mrf.mxu0 }
 0x68f   :  { %v4485_v3 = vadd.f32 %v2148_v13, %v1947_v11 }
 0x694   :  { %v1930_v55 = vpop.f32.mrf.mxu2 }
 0x695   :  { %v1948_v41 = vadd.f32 %v1930_v55, %v4363_v27 }
 0x697   :  { %v2553_v8 = vpop.f32.mrf.mxu0  ;;  %v4488_v63 = vadd.f32 %v2150_v15, %v1948_v41 }
 0x69c   :  { %v2333_v40 = vpop.f32.mrf.mxu2 }
 0x69d   :  { %v2373_v50 = vadd.f32 %v2333_v40, %v4429_v21 }
 0x69f   :  { %v2593_v31 = vadd.f32 %v2553_v8, %v2373_v50  ;;  %v2555_v52 = vpop.f32.mrf.mxu0 }
 0x6a1   :  { %v2613_v49 = vadd.f32 %v4494_v45, %v2593_v31 }
 0x6a3   :  { %v2629_v38 = vmax.f32 %v2613_v49, 0.0 }
 0x6a4   :  { %v2335_v51 = vpop.f32.mrf.mxu2 }
 0x6a5   :  { %v2645_v1 = vpack.c.bf16 %v2629_v38, %v2629_v38  ;;  %v2374_v27 = vadd.f32 %v2335_v51, %v4432_v5 }
 0x6a7   :  { %2662 = vst.msk [vmem:[%s4597_s6] sm:$0xf] %vm2661_vm3, %v2645_v1  ;;  %v2594_v21 = vadd.f32 %v2555_v52, %v2374_v27  ;;  %v2558_v26 = vpop.f32.mrf.mxu0 }
 0x6a9   :  { %v2614_v6 = vadd.f32 %v4494_v45, %v2594_v21 }
 0x6ab   :  { %v2630_v36 = vmax.f32 %v2614_v6, 0.0 }
 0x6ac   :  { %v2338_v42 = vpop.f32.mrf.mxu2 }
 0x6ad   :  { %v2646_v24 = vpack.c.bf16 %v2630_v36, %v2630_v36  ;;  %v2375_v16 = vadd.f32 %v2338_v42, %v4437_v46 }
 0x6af   :  { %2663 = vst.msk [vmem:[%s4597_s6 + $0x4] sm:$0xf] %vm2661_vm3, %v2646_v24  ;;  %v2595_v5 = vadd.f32 %v2558_v26, %v2375_v16  ;;  %v2560_v30 = vpop.f32.mrf.mxu0 }
 0x6b1   :  { %v2615_v57 = vadd.f32 %v4494_v45, %v2595_v5 }
 0x6b3   :  { %v2631_v10 = vmax.f32 %v2615_v57, 0.0 }
 0x6b4   :  { %v2340_v44 = vpop.f32.mrf.mxu2 }
 0x6b5   :  { %v2647_v53 = vpack.c.bf16 %v2631_v10, %v2631_v10  ;;  %v2376_v43 = vadd.f32 %v2340_v44, %v4440_v58 }
 0x6b7   :  { %2664 = vst.msk [vmem:[%s4597_s6 + $0x8] sm:$0xf] %vm2661_vm3, %v2647_v53  ;;  %v2596_v46 = vadd.f32 %v2560_v30, %v2376_v43  ;;  %v2563_v34 = vpop.f32.mrf.mxu0 }
 0x6b9   :  { %v2616_v33 = vadd.f32 %v4494_v45, %v2596_v46 }
 0x6bb   :  { %v2632_v29 = vmax.f32 %v2616_v33, 0.0 }
 0x6bc   :  { %v2343_v60 = vpop.f32.mrf.mxu2 }
 0x6bd   :  { %v2648_v62 = vpack.c.bf16 %v2632_v29, %v2632_v29  ;;  %v2377_v2 = vadd.f32 %v2343_v60, %v4445_v4 }
 0x6bf   :  { %2665 = vst.msk [vmem:[%s4597_s6 + $0xc] sm:$0xf] %vm2661_vm3, %v2648_v62  ;;  %v2597_v58 = vadd.f32 %v2563_v34, %v2377_v2  ;;  %v2565_v0 = vpop.f32.mrf.mxu0 }
 0x6c1   :  { %v2617_v22 = vadd.f32 %v4494_v45, %v2597_v58 }
 0x6c3   :  { %v2633_v18 = vmax.f32 %v2617_v22, 0.0 }
 0x6c4   :  { %v2345_v14 = vpop.f32.mrf.mxu2 }
 0x6c5   :  { %v2649_v9 = vpack.c.bf16 %v2633_v18, %v2633_v18  ;;  %v2378_v7 = vadd.f32 %v2345_v14, %v4448_v54 }
 0x6c7   :  { %2666 = vst.msk [vmem:[%s4597_s6 + $0x10] sm:$0xf] %vm2661_vm3, %v2649_v9  ;;  %v2598_v4 = vadd.f32 %v2565_v0, %v2378_v7  ;;  %v2568_v59 = vpop.f32.mrf.mxu0 }
 0x6c9   :  { %v2618_v61 = vadd.f32 %v4494_v45, %v2598_v4 }
 0x6cb   :  { %v2634_v47 = vmax.f32 %v2618_v61, 0.0 }
 0x6cc   :  { %v2348_v13 = vpop.f32.mrf.mxu2 }
 0x6cd   :  { %v2650_v12 = vpack.c.bf16 %v2634_v47, %v2634_v47  ;;  %v2379_v39 = vadd.f32 %v2348_v13, %v4453_v20 }
 0x6cf   :  { %2667 = vst.msk [vmem:[%s4597_s6 + $0x14] sm:$0xf] %vm2661_vm3, %v2650_v12  ;;  %v2599_v54 = vadd.f32 %v2568_v59, %v2379_v39  ;;  %v2570_v32 = vpop.f32.mrf.mxu0 }
 0x6d1   :  { %v2619_v48 = vadd.f32 %v4494_v45, %v2599_v54 }
 0x6d3   :  { %v2635_v25 = vmax.f32 %v2619_v48, 0.0 }
 0x6d4   :  { %v2350_v11 = vpop.f32.mrf.mxu2 }
 0x6d5   :  { %v2651_v15 = vpack.c.bf16 %v2635_v25, %v2635_v25  ;;  %v2380_v55 = vadd.f32 %v2350_v11, %v4456_v17 }
 0x6d7   :  { %2668 = vst.msk [vmem:[%s4597_s6 + $0x18] sm:$0xf] %vm2661_vm3, %v2651_v15  ;;  %v2600_v20 = vadd.f32 %v2570_v32, %v2380_v55  ;;  %v2573_v41 = vpop.f32.mrf.mxu0 }
 0x6d9   :  { %v2620_v8 = vadd.f32 %v4494_v45, %v2600_v20 }
 0x6db   :  { %v2636_v40 = vmax.f32 %v2620_v8, 0.0 }
 0x6dc   :  { %v2353_v50 = vpop.f32.mrf.mxu2 }
 0x6dd   :  { %v2652_v31 = vpack.c.bf16 %v2636_v40, %v2636_v40  ;;  %v2381_v52 = vadd.f32 %v2353_v50, %v4461_v23 }
 0x6df   :  { %2669 = vst.msk [vmem:[%s4597_s6 + $0x1c] sm:$0xf] %vm2661_vm3, %v2652_v31  ;;  %v2601_v17 = vadd.f32 %v2573_v41, %v2381_v52  ;;  %v2575_v49 = vpop.f32.mrf.mxu0 }
 0x6e1   :  { %v2621_v38 = vadd.f32 %v4494_v45, %v2601_v17 }
 0x6e3   :  { %v2637_v51 = vmax.f32 %v2621_v38, 0.0 }
 0x6e4   :  { %v2355_v1 = vpop.f32.mrf.mxu2 }
 0x6e5   :  { %v2653_v27 = vpack.c.bf16 %v2637_v51, %v2637_v51  ;;  %v2382_v21 = vadd.f32 %v2355_v1, %v4464_v37 }
 0x6e7   :  { %2670 = vst.msk [vmem:[%s4597_s6 + $0x20] sm:$0xf] %vm2661_vm3, %v2653_v27  ;;  %v2602_v23 = vadd.f32 %v2575_v49, %v2382_v21  ;;  %v2578_v26 = vpop.f32.mrf.mxu0 }
 0x6e9   :  { %v2622_v6 = vadd.f32 %v4494_v45, %v2602_v23 }
 0x6eb   :  { %v2638_v36 = vmax.f32 %v2622_v6, 0.0 }
 0x6ec   :  { %v2358_v42 = vpop.f32.mrf.mxu2 }
 0x6ed   :  { %v2654_v24 = vpack.c.bf16 %v2638_v36, %v2638_v36  ;;  %v2383_v16 = vadd.f32 %v2358_v42, %v4469_v56 }
 0x6ef   :  { %2671 = vst.msk [vmem:[%s4597_s6 + $0x24] sm:$0xf] %vm2661_vm3, %v2654_v24  ;;  %v2603_v37 = vadd.f32 %v2578_v26, %v2383_v16  ;;  %v2580_v5 = vpop.f32.mrf.mxu0 }
 0x6f1   :  { %v2623_v30 = vadd.f32 %v4494_v45, %v2603_v37 }
 0x6f3   :  { %v2639_v57 = vmax.f32 %v2623_v30, 0.0 }
 0x6f4   :  { %v2360_v10 = vpop.f32.mrf.mxu2 }
 0x6f5   :  { %v2655_v44 = vpack.c.bf16 %v2639_v57, %v2639_v57  ;;  %v2384_v53 = vadd.f32 %v2360_v10, %v4472_v19 }
 0x6f7   :  { %2672 = vst.msk [vmem:[%s4597_s6 + $0x28] sm:$0xf] %vm2661_vm3, %v2655_v44  ;;  %v2604_v56 = vadd.f32 %v2580_v5, %v2384_v53  ;;  %v2583_v43 = vpop.f32.mrf.mxu0 }
 0x6f9   :  { %v2624_v46 = vadd.f32 %v4494_v45, %v2604_v56 }
 0x6fb   :  { %v2640_v34 = vmax.f32 %v2624_v46, 0.0 }
 0x6fc   :  { %v2363_v33 = vpop.f32.mrf.mxu2 }
 0x6fd   :  { %v2656_v29 = vpack.c.bf16 %v2640_v34, %v2640_v34  ;;  %v2385_v60 = vadd.f32 %v2363_v33, %v4477_v28 }
 0x6ff   :  { %2673 = vst.msk [vmem:[%s4597_s6 + $0x2c] sm:$0xf] %vm2661_vm3, %v2656_v29  ;;  %v2605_v19 = vadd.f32 %v2583_v43, %v2385_v60  ;;  %v2585_v2 = vpop.f32.mrf.mxu0 }
 0x701   :  { %v2625_v62 = vadd.f32 %v4494_v45, %v2605_v19 }
 0x703   :  { %v2641_v58 = vmax.f32 %v2625_v62, 0.0 }
 0x704   :  { %v2365_v0 = vpop.f32.mrf.mxu2 }
 0x705   :  { %v2657_v22 = vpack.c.bf16 %v2641_v58, %v2641_v58  ;;  %v2386_v18 = vadd.f32 %v2365_v0, %v4480_v35 }
 0x707   :  { %2674 = vst.msk [vmem:[%s4597_s6 + $0x30] sm:$0xf] %vm2661_vm3, %v2657_v22  ;;  %v2606_v28 = vadd.f32 %v2585_v2, %v2386_v18  ;;  %v2588_v7 = vpop.f32.mrf.mxu0 }
 0x709   :  { %v2626_v14 = vadd.f32 %v4494_v45, %v2606_v28 }
 0x70b   :  { %v2642_v9 = vmax.f32 %v2626_v14, 0.0 }
 0x70c   :  { %v2368_v4 = vpop.f32.mrf.mxu2 }
 0x70d   :  { %v2658_v59 = vpack.c.bf16 %v2642_v9, %v2642_v9  ;;  %v2387_v61 = vadd.f32 %v2368_v4, %v4485_v3 }
 0x70f   :  { %2675 = vst.msk [vmem:[%s4597_s6 + $0x34] sm:$0xf] %vm2661_vm3, %v2658_v59  ;;  %v2607_v35 = vadd.f32 %v2588_v7, %v2387_v61  ;;  %v2590_v32 = vpop.f32.mrf.mxu0 }
 0x711   :  { %v2627_v47 = vadd.f32 %v4494_v45, %v2607_v35 }
 0x713   :  { %v2643_v13 = vmax.f32 %v2627_v47, 0.0 }
 0x714   :  { %v2370_v12 = vpop.f32.mrf.mxu2 }
 0x715   :  { %v2659_v39 = vpack.c.bf16 %v2643_v13, %v2643_v13  ;;  %v2388_v54 = vadd.f32 %v2370_v12, %v4488_v63 }
 0x717   :  { %2676 = vst.msk [vmem:[%s4597_s6 + $0x38] sm:$0xf] %vm2661_vm3, %v2659_v39  ;;  %v2608_v3 = vadd.f32 %v2590_v32, %v2388_v54 }
 0x719   :  { %v2628_v48 = vadd.f32 %v4494_v45, %v2608_v3 }
 0x71b   :  { %v2644_v25 = vmax.f32 %v2628_v48, 0.0 }
 0x71d   :  { %v2660_v11 = vpack.c.bf16 %v2644_v25, %v2644_v25 }
 0x71f   :  { %2677 = vst.msk [vmem:[%s4597_s6 + $0x3c] sm:$0xf] %vm2661_vm3, %v2660_v11 }

// kernel: cnn_forward.3
= control target key start
LH: loop header
LB: loop body
LE: loop exit
PB: predicated region body
PF: predicated region fallthrough
CT: control target
= control target key end

     0   :  { %s2501_s0 = inlined_call_operand.vmem [shape: bf16[2,2048], index: 0, kind: input, shape index: {}]   ;;  %s2502_s1 = inlined_call_operand.vmem [shape: bf16[2048,64], index: 1, kind: input, shape index: {}]   ;;  %s2503_s2 = inlined_call_operand.vmem [shape: f32[1,64], index: 2, kind: input, shape index: {}]   ;;  %s2504_s3 = inlined_call_operand.vmem [shape: bf16[64,8], index: 3, kind: input, shape index: {}]   ;;  %s2505_s4 = inlined_call_operand.vmem [shape: f32[1,8], index: 4, kind: input, shape index: {}]   ;;  %s2506_s5 = inlined_call_operand.hbm [shape: f32[2,8], index: 5, kind: output, shape index: {}]  }
   0x1   :  { %v1905_v0 = vld [vmem:[%s2502_s1 + $0x38] sm:$0xff]  ;;  %v1904_v4 = vld [vmem:[%s2502_s1 + $0x30] sm:$0xff]  ;;  %v1903_v8 = vld [vmem:[%s2502_s1 + $0x28] sm:$0xff] }
   0x2   :  { %v1913_v1 = vld [vmem:[%s2502_s1 + $0x78] sm:$0xff]  ;;  %1088 = vmatpush.bf16.msra.mxu0 %v1905_v0  ;;  %v1912_v5 = vld [vmem:[%s2502_s1 + $0x70] sm:$0xff]  ;;  %v1911_v9 = vld [vmem:[%s2502_s1 + $0x68] sm:$0xff] }
   0x3   :  { %v1921_v2 = vld [vmem:[%s2502_s1 + $0xb8] sm:$0xff]  ;;  %1101 = vmatpush.bf16.msra.mxu1 %v1913_v1  ;;  %v1920_v6 = vld [vmem:[%s2502_s1 + $0xb0] sm:$0xff]  ;;  %v1919_v10 = vld [vmem:[%s2502_s1 + $0xa8] sm:$0xff] }
   0x4   :  { %v1929_v3 = vld [vmem:[%s2502_s1 + $0xf8] sm:$0xff]  ;;  %1114 = vmatpush.bf16.msra.mxu2 %v1921_v2  ;;  %v1928_v7 = vld [vmem:[%s2502_s1 + $0xf0] sm:$0xff]  ;;  %v1927_v11 = vld [vmem:[%s2502_s1 + $0xe8] sm:$0xff] }
   0x5   :  { %1127 = vmatpush.bf16.msra.mxu3 %v1929_v3  ;;  %v1902_v12 = vld [vmem:[%s2502_s1 + $0x20] sm:$0xff]  ;;  %v1901_v16 = vld [vmem:[%s2502_s1 + $0x18] sm:$0xff]  ;;  %v1900_v20 = vld [vmem:[%s2502_s1 + $0x10] sm:$0xff] }
   0x6   :  { %1089 = vmatpush.bf16.msra.mxu0 %v1904_v4  ;;  %v1910_v13 = vld [vmem:[%s2502_s1 + $0x60] sm:$0xff]  ;;  %v1909_v17 = vld [vmem:[%s2502_s1 + $0x58] sm:$0xff]  ;;  %v1908_v21 = vld [vmem:[%s2502_s1 + $0x50] sm:$0xff] }
   0x7   :  { %1102 = vmatpush.bf16.msra.mxu1 %v1912_v5  ;;  %v1918_v14 = vld [vmem:[%s2502_s1 + $0xa0] sm:$0xff]  ;;  %v1917_v18 = vld [vmem:[%s2502_s1 + $0x98] sm:$0xff]  ;;  %v1916_v23 = vld [vmem:[%s2502_s1 + $0x90] sm:$0xff] }
   0x8   :  { %1115 = vmatpush.bf16.msra.mxu2 %v1920_v6  ;;  %v1926_v15 = vld [vmem:[%s2502_s1 + $0xe0] sm:$0xff]  ;;  %v1925_v19 = vld [vmem:[%s2502_s1 + $0xd8] sm:$0xff]  ;;  %v1924_v24 = vld [vmem:[%s2502_s1 + $0xd0] sm:$0xff] }
   0x9   :  { %1128 = vmatpush.bf16.msra.mxu3 %v1928_v7  ;;  %v22_v22 = vld [vmem:[%s2501_s0] sm:$0xff] }
   0xa   :  { %1090 = vmatpush.bf16.msra.mxu0 %v1903_v8  ;;  %285 = vst [vmem:[#allocation1] ss:$9 sm:$0xff] %v22_v22 }
   0xb   :  { %1103 = vmatpush.bf16.msra.mxu1 %v1911_v9 }
   0xc   :  { %1116 = vmatpush.bf16.msra.mxu2 %v1919_v10 }
   0xd   :  { %1129 = vmatpush.bf16.msra.mxu3 %v1927_v11 }
   0xe   :  { %1091 = vmatpush.bf16.msra.mxu0 %v1902_v12 }
   0xf   :  { %1104 = vmatpush.bf16.msra.mxu1 %v1910_v13 }
  0x10   :  { %1117 = vmatpush.bf16.msra.mxu2 %v1918_v14 }
  0x11   :  { %1130 = vmatpush.bf16.msra.mxu3 %v1926_v15 }
  0x12   :  { %1092 = vmatpush.bf16.msra.mxu0 %v1901_v16 }
  0x13   :  { %1105 = vmatpush.bf16.msra.mxu1 %v1909_v17 }
  0x14   :  { %1118 = vmatpush.bf16.msra.mxu2 %v1917_v18 }
  0x15   :  { %1131 = vmatpush.bf16.msra.mxu3 %v1925_v19 }
  0x16   :  { %10 = vsyncpa [#allocation3], 0  ;;  %1093 = vmatpush.bf16.msra.mxu0 %v1900_v20  ;;  %v1899_v25 = vld [vmem:[%s2502_s1 + $0x8] sm:$0xff]  ;;  %v1898_v29 = vld [vmem:[%s2502_s1] sm:$0xff]  ;;  %vm1334_vm0 = vcmask 523264   ;;  %s2059_s30 = smov [#allocation2]  }
  0x17   :  { %1106 = vmatpush.bf16.msra.mxu1 %v1908_v21  ;;  %v1907_v26 = vld [vmem:[%s2502_s1 + $0x48] sm:$0xff]  ;;  %v1906_v30 = vld [vmem:[%s2502_s1 + $0x40] sm:$0xff]  ;;  %v1937_v33 = vld [vmem:[%s2502_s1 + $0x138] sm:$0xff]  ;;  %s1358_s6 = sshll.u32 %s2059_s30, 4  ;;  %s1360_s9 = sshll.u32 %s2506_s5, 4  ;;  %vm1351_vm1 = vcmask 58368   ;;  %s1359_s6 = int_to_ptr.vmem [resolvable:$true] %s1358_s6  ;;  %s1361_s9 = int_to_ptr.hbm [resolvable:$true] %s1360_s9 }
  0x18   :  { %1119 = vmatpush.bf16.msra.mxu2 %v1916_v23  ;;  %v1915_v27 = vld [vmem:[%s2502_s1 + $0x88] sm:$0xff]  ;;  %v1914_v31 = vld [vmem:[%s2502_s1 + $0x80] sm:$0xff]  ;;  %v1945_v34 = vld [vmem:[%s2502_s1 + $0x178] sm:$0xff] }
  0x19   :  { %1132 = vmatpush.bf16.msra.mxu3 %v1924_v24  ;;  %v1923_v28 = vld [vmem:[%s2502_s1 + $0xc8] sm:$0xff]  ;;  %v1922_v32 = vld [vmem:[%s2502_s1 + $0xc0] sm:$0xff]  ;;  %v1953_v35 = vld [vmem:[%s2502_s1 + $0x1b8] sm:$0xff] }
  0x1a   :  { %1094 = vmatpush.bf16.msra.mxu0 %v1899_v25  ;;  %v1961_v36 = vld [vmem:[%s2502_s1 + $0x1f8] sm:$0xff]  ;;  %v1936_v37 = vld [vmem:[%s2502_s1 + $0x130] sm:$0xff]  ;;  %v286_v39 = vld [vmem:[#allocation1] sm:$0xff] }
  0x1b   :  { %1107 = vmatpush.bf16.msra.mxu1 %v1907_v26  ;;  %v288_v38 = vld [vmem:[#allocation1 + $0x12] sm:$0xff]  ;;  %v289_v41 = vld [vmem:[#allocation1 + $0x1b] sm:$0xff]  ;;  %v287_v42 = vld [vmem:[#allocation1 + $0x9] sm:$0xff] }
  0x1c   :  { %1120 = vmatpush.bf16.msra.mxu2 %v1915_v27  ;;  %v1944_v40 = vld [vmem:[%s2502_s1 + $0x170] sm:$0xff]  ;;  %v1935_v45 = vld [vmem:[%s2502_s1 + $0x128] sm:$0xff]  ;;  %v1934_v49 = vld [vmem:[%s2502_s1 + $0x120] sm:$0xff] }
  0x1d   :  { %1133 = vmatpush.bf16.msra.mxu3 %v1923_v28  ;;  %v1952_v43 = vld [vmem:[%s2502_s1 + $0x1b0] sm:$0xff]  ;;  %v1943_v46 = vld [vmem:[%s2502_s1 + $0x168] sm:$0xff]  ;;  %v1942_v50 = vld [vmem:[%s2502_s1 + $0x160] sm:$0xff] }
  0x1e   :  { %1095 = vmatpush.bf16.msra.mxu0 %v1898_v29  ;;  %v1960_v44 = vld [vmem:[%s2502_s1 + $0x1f0] sm:$0xff]  ;;  %v1951_v47 = vld [vmem:[%s2502_s1 + $0x1a8] sm:$0xff]  ;;  %v293_v54 = vld [vmem:[#allocation1 + $0x3f] sm:$0xff] }
  0x1f   :  { %1108 = vmatpush.bf16.msra.mxu1 %v1906_v30  ;;  %v1959_v48 = vld [vmem:[%s2502_s1 + $0x1e8] sm:$0xff]  ;;  %v292_v51 = vld [vmem:[#allocation1 + $0x36] sm:$0xff]  ;;  %v1950_v56 = vld [vmem:[%s2502_s1 + $0x1a0] sm:$0xff] }
  0x20   :  { %1121 = vmatpush.bf16.msra.mxu2 %v1914_v31  ;;  %v23_v52 = vld [vmem:[%s2501_s0 + $0x8] sm:$0xff]  ;;  %v1958_v57 = vld [vmem:[%s2502_s1 + $0x1e0] sm:$0xff]  ;;  %v1933_v58 = vld [vmem:[%s2502_s1 + $0x118] sm:$0xff] }
  0x21   :  { %1134 = vmatpush.bf16.msra.mxu3 %v1922_v32  ;;  %1096 = vmatmul.bf16.vlgmr.msra.gmra.mxu0 %v286_v39  ;;  %v290_v53 = vld [vmem:[#allocation1 + $0x24] sm:$0xff]  ;;  %v291_v55 = vld [vmem:[#allocation1 + $0x2d] sm:$0xff]  ;;  %v1941_v59 = vld [vmem:[%s2502_s1 + $0x158] sm:$0xff] }
  0x22   :  { %1140 = vmatpush.bf16.msrb.mxu0 %v1937_v33  ;;  %1109 = vmatmul.bf16.vlgmr.msra.gmra.mxu1 %v287_v42  ;;  %295 = vst [vmem:[#allocation1] ss:$9 sm:$0xff] %v23_v52  ;;  %v1949_v60 = vld [vmem:[%s2502_s1 + $0x198] sm:$0xff]  ;;  %v1932_v62 = vld [vmem:[%s2502_s1 + $0x110] sm:$0xff]  ;;  %v1931_v2 = vld [vmem:[%s2502_s1 + $0x108] sm:$0xff] }
  0x23   :  { %1153 = vmatpush.bf16.msrb.mxu1 %v1945_v34  ;;  %1122 = vmatmul.bf16.vlgmr.msra.gmra.mxu2 %v288_v38  ;;  %v1957_v61 = vld [vmem:[%s2502_s1 + $0x1d8] sm:$0xff]  ;;  %v1940_v63 = vld [vmem:[%s2502_s1 + $0x150] sm:$0xff]  ;;  %v1939_v3 = vld [vmem:[%s2502_s1 + $0x148] sm:$0xff] }
  0x24   :  { %1166 = vmatpush.bf16.msrb.mxu2 %v1953_v35  ;;  %1135 = vmatmul.bf16.vlgmr.msra.gmra.mxu3 %v289_v41  ;;  %v1948_v0 = vld [vmem:[%s2502_s1 + $0x190] sm:$0xff]  ;;  %v1947_v4 = vld [vmem:[%s2502_s1 + $0x188] sm:$0xff]  ;;  %v1930_v6 = vld [vmem:[%s2502_s1 + $0x100] sm:$0xff] }
  0x25   :  { %1179 = vmatpush.bf16.msrb.mxu3 %v1961_v36  ;;  %v1956_v1 = vld [vmem:[%s2502_s1 + $0x1d0] sm:$0xff]  ;;  %v1955_v5 = vld [vmem:[%s2502_s1 + $0x1c8] sm:$0xff]  ;;  %v1938_v7 = vld [vmem:[%s2502_s1 + $0x140] sm:$0xff] }
  0x26   :  { %1141 = vmatpush.bf16.msrb.mxu0 %v1936_v37  ;;  %v1946_v8 = vld [vmem:[%s2502_s1 + $0x180] sm:$0xff]  ;;  %v1969_v10 = vld [vmem:[%s2502_s1 + $0x238] sm:$0xff]  ;;  %v1968_v14 = vld [vmem:[%s2502_s1 + $0x230] sm:$0xff] }
  0x27   :  { %1154 = vmatpush.bf16.msrb.mxu1 %v1944_v40  ;;  %v1954_v9 = vld [vmem:[%s2502_s1 + $0x1c0] sm:$0xff]  ;;  %v1977_v11 = vld [vmem:[%s2502_s1 + $0x278] sm:$0xff]  ;;  %v1976_v15 = vld [vmem:[%s2502_s1 + $0x270] sm:$0xff] }
  0x28   :  { %1167 = vmatpush.bf16.msrb.mxu2 %v1952_v43  ;;  %v1985_v12 = vld [vmem:[%s2502_s1 + $0x2b8] sm:$0xff]  ;;  %v1984_v16 = vld [vmem:[%s2502_s1 + $0x2b0] sm:$0xff]  ;;  %v1967_v18 = vld [vmem:[%s2502_s1 + $0x228] sm:$0xff] }
  0x29   :  { %1180 = vmatpush.bf16.msrb.mxu3 %v1960_v44  ;;  %v1993_v13 = vld [vmem:[%s2502_s1 + $0x2f8] sm:$0xff]  ;;  %v1992_v17 = vld [vmem:[%s2502_s1 + $0x2f0] sm:$0xff]  ;;  %v1975_v19 = vld [vmem:[%s2502_s1 + $0x268] sm:$0xff] }
  0x2a   :  { %1142 = vmatpush.bf16.msrb.mxu0 %v1935_v45  ;;  %v1983_v20 = vld [vmem:[%s2502_s1 + $0x2a8] sm:$0xff]  ;;  %v1966_v22 = vld [vmem:[%s2502_s1 + $0x220] sm:$0xff]  ;;  %v1965_v26 = vld [vmem:[%s2502_s1 + $0x218] sm:$0xff] }
  0x2b   :  { %1155 = vmatpush.bf16.msrb.mxu1 %v1943_v46  ;;  %v1991_v21 = vld [vmem:[%s2502_s1 + $0x2e8] sm:$0xff]  ;;  %v1974_v23 = vld [vmem:[%s2502_s1 + $0x260] sm:$0xff]  ;;  %v1973_v27 = vld [vmem:[%s2502_s1 + $0x258] sm:$0xff] }
  0x2c   :  { %1168 = vmatpush.bf16.msrb.mxu2 %v1951_v47  ;;  %v1982_v24 = vld [vmem:[%s2502_s1 + $0x2a0] sm:$0xff]  ;;  %v1981_v28 = vld [vmem:[%s2502_s1 + $0x298] sm:$0xff]  ;;  %v1964_v30 = vld [vmem:[%s2502_s1 + $0x210] sm:$0xff] }
  0x2d   :  { %1181 = vmatpush.bf16.msrb.mxu3 %v1959_v48  ;;  %v1990_v25 = vld [vmem:[%s2502_s1 + $0x2e0] sm:$0xff]  ;;  %v1989_v29 = vld [vmem:[%s2502_s1 + $0x2d8] sm:$0xff]  ;;  %v1972_v31 = vld [vmem:[%s2502_s1 + $0x250] sm:$0xff] }
  0x2e   :  { %1143 = vmatpush.bf16.msrb.mxu0 %v1934_v49  ;;  %v1980_v32 = vld [vmem:[%s2502_s1 + $0x290] sm:$0xff]  ;;  %v1963_v34 = vld [vmem:[%s2502_s1 + $0x208] sm:$0xff]  ;;  %v1962_v38 = vld [vmem:[%s2502_s1 + $0x200] sm:$0xff] }
  0x2f   :  { %1156 = vmatpush.bf16.msrb.mxu1 %v1942_v50  ;;  %v1988_v33 = vld [vmem:[%s2502_s1 + $0x2d0] sm:$0xff]  ;;  %v1971_v35 = vld [vmem:[%s2502_s1 + $0x248] sm:$0xff]  ;;  %v1970_v39 = vld [vmem:[%s2502_s1 + $0x240] sm:$0xff] }
  0x30   :  { %1169 = vmatpush.bf16.msrb.mxu2 %v1950_v56  ;;  %v1979_v36 = vld [vmem:[%s2502_s1 + $0x288] sm:$0xff]  ;;  %v1978_v40 = vld [vmem:[%s2502_s1 + $0x280] sm:$0xff]  ;;  %v2001_v42 = vld [vmem:[%s2502_s1 + $0x338] sm:$0xff] }
  0x31   :  { %1182 = vmatpush.bf16.msrb.mxu3 %v1958_v57  ;;  %v1987_v37 = vld [vmem:[%s2502_s1 + $0x2c8] sm:$0xff]  ;;  %v1986_v41 = vld [vmem:[%s2502_s1 + $0x2c0] sm:$0xff]  ;;  %v2009_v43 = vld [vmem:[%s2502_s1 + $0x378] sm:$0xff] }
  0x32   :  { %1144 = vmatpush.bf16.msrb.mxu0 %v1933_v58  ;;  %v2017_v44 = vld [vmem:[%s2502_s1 + $0x3b8] sm:$0xff]  ;;  %v296_v46 = vld [vmem:[#allocation1] sm:$0xff]  ;;  %v297_v48 = vld [vmem:[#allocation1 + $0x9] sm:$0xff] }
  0x33   :  { %1157 = vmatpush.bf16.msrb.mxu1 %v1941_v59  ;;  %v2025_v45 = vld [vmem:[%s2502_s1 + $0x3f8] sm:$0xff]  ;;  %v2000_v50 = vld [vmem:[%s2502_s1 + $0x330] sm:$0xff]  ;;  %v2015_v56 = vld [vmem:[%s2502_s1 + $0x3a8] sm:$0xff] }
  0x34   :  { %1170 = vmatpush.bf16.msrb.mxu2 %v1949_v60  ;;  %v298_v47 = vld [vmem:[#allocation1 + $0x12] sm:$0xff]  ;;  %v299_v49 = vld [vmem:[#allocation1 + $0x1b] sm:$0xff]  ;;  %v2023_v57 = vld [vmem:[%s2502_s1 + $0x3e8] sm:$0xff] }
  0x35   :  { %1183 = vmatpush.bf16.msrb.mxu3 %v1957_v61  ;;  %v2016_v52 = vld [vmem:[%s2502_s1 + $0x3b0] sm:$0xff]  ;;  %v1998_v58 = vld [vmem:[%s2502_s1 + $0x320] sm:$0xff] }
  0x36   :  { %1145 = vmatpush.bf16.msrb.mxu0 %v1932_v62  ;;  %v2006_v59 = vld [vmem:[%s2502_s1 + $0x360] sm:$0xff]  ;;  %v1997_v62 = vld [vmem:[%s2502_s1 + $0x318] sm:$0xff] }
  0x37   :  { %1158 = vmatpush.bf16.msrb.mxu1 %v1940_v63  ;;  %v2014_v60 = vld [vmem:[%s2502_s1 + $0x3a0] sm:$0xff]  ;;  %v2005_v63 = vld [vmem:[%s2502_s1 + $0x358] sm:$0xff] }
  0x38   :  { %1171 = vmatpush.bf16.msrb.mxu2 %v1948_v0  ;;  %v2022_v61 = vld [vmem:[%s2502_s1 + $0x3e0] sm:$0xff]  ;;  %v2013_v0 = vld [vmem:[%s2502_s1 + $0x398] sm:$0xff] }
  0x39   :  { %1184 = vmatpush.bf16.msrb.mxu3 %v1956_v1  ;;  %v2021_v1 = vld [vmem:[%s2502_s1 + $0x3d8] sm:$0xff] }
  0x3a   :  { %1146 = vmatpush.bf16.msrb.mxu0 %v1931_v2  ;;  %v1996_v2 = vld [vmem:[%s2502_s1 + $0x310] sm:$0xff] }
  0x3b   :  { %1159 = vmatpush.bf16.msrb.mxu1 %v1939_v3  ;;  %v2004_v3 = vld [vmem:[%s2502_s1 + $0x350] sm:$0xff] }
  0x3c   :  { %1172 = vmatpush.bf16.msrb.mxu2 %v1947_v4  ;;  %v2012_v4 = vld [vmem:[%s2502_s1 + $0x390] sm:$0xff] }
  0x3d   :  { %1185 = vmatpush.bf16.msrb.mxu3 %v1955_v5  ;;  %v2020_v5 = vld [vmem:[%s2502_s1 + $0x3d0] sm:$0xff] }
  0x3e   :  { %1147 = vmatpush.bf16.msrb.mxu0 %v1930_v6  ;;  %v1995_v6 = vld [vmem:[%s2502_s1 + $0x308] sm:$0xff] }
  0x3f   :  { %1160 = vmatpush.bf16.msrb.mxu1 %v1938_v7  ;;  %v2003_v7 = vld [vmem:[%s2502_s1 + $0x348] sm:$0xff] }
  0x40   :  { %1173 = vmatpush.bf16.msrb.mxu2 %v1946_v8  ;;  %v2011_v8 = vld [vmem:[%s2502_s1 + $0x388] sm:$0xff] }
  0x41   :  { %1186 = vmatpush.bf16.msrb.mxu3 %v1954_v9  ;;  %1148 = vmatmul.bf16.vlgmr.msrb.gmra.mxu0 %v290_v53  ;;  %v2024_v53 = vld [vmem:[%s2502_s1 + $0x3f0] sm:$0xff]  ;;  %v2019_v9 = vld [vmem:[%s2502_s1 + $0x3c8] sm:$0xff] }
  0x42   :  { %1192 = vmatpush.bf16.msra.mxu0 %v1969_v10  ;;  %1161 = vmatmul.bf16.vlgmr.msrb.gmra.mxu1 %v291_v55  ;;  %v2007_v55 = vld [vmem:[%s2502_s1 + $0x368] sm:$0xff]  ;;  %v1994_v10 = vld [vmem:[%s2502_s1 + $0x300] sm:$0xff] }
  0x43   :  { %1205 = vmatpush.bf16.msra.mxu1 %v1977_v11  ;;  %1174 = vmatmul.bf16.vlgmr.msrb.gmra.mxu2 %v292_v51  ;;  %v2008_v51 = vld [vmem:[%s2502_s1 + $0x370] sm:$0xff]  ;;  %v2002_v11 = vld [vmem:[%s2502_s1 + $0x340] sm:$0xff] }
  0x44   :  { %1218 = vmatpush.bf16.msra.mxu2 %v1985_v12  ;;  %1187 = vmatmul.bf16.vlgmr.msrb.gmra.mxu3 %v293_v54  ;;  %v1999_v54 = vld [vmem:[%s2502_s1 + $0x328] sm:$0xff]  ;;  %v2010_v12 = vld [vmem:[%s2502_s1 + $0x380] sm:$0xff] }
  0x45   :  { %1231 = vmatpush.bf16.msra.mxu3 %v1993_v13  ;;  %v2018_v13 = vld [vmem:[%s2502_s1 + $0x3c0] sm:$0xff] }
  0x46   :  { %1193 = vmatpush.bf16.msra.mxu0 %v1968_v14  ;;  %v300_v14 = vld [vmem:[#allocation1 + $0x24] sm:$0xff] }
  0x47   :  { %1206 = vmatpush.bf16.msra.mxu1 %v1976_v15  ;;  %v301_v15 = vld [vmem:[#allocation1 + $0x2d] sm:$0xff] }
  0x48   :  { %1219 = vmatpush.bf16.msra.mxu2 %v1984_v16  ;;  %v302_v16 = vld [vmem:[#allocation1 + $0x36] sm:$0xff] }
  0x49   :  { %1232 = vmatpush.bf16.msra.mxu3 %v1992_v17  ;;  %v303_v17 = vld [vmem:[#allocation1 + $0x3f] sm:$0xff] }
  0x4a   :  { %1194 = vmatpush.bf16.msra.mxu0 %v1967_v18  ;;  %v2031_v18 = vld [vmem:[%s2503_s2] ss:$0 sm:$0xff] }
  0x4b   :  { %1207 = vmatpush.bf16.msra.mxu1 %v1975_v19 }
  0x4c   :  { %1220 = vmatpush.bf16.msra.mxu2 %v1983_v20 }
  0x4d   :  { %1233 = vmatpush.bf16.msra.mxu3 %v1991_v21 }
  0x4e   :  { %1195 = vmatpush.bf16.msra.mxu0 %v1966_v22 }
  0x4f   :  { %1208 = vmatpush.bf16.msra.mxu1 %v1974_v23 }
  0x50   :  { %1221 = vmatpush.bf16.msra.mxu2 %v1982_v24 }
  0x51   :  { %1234 = vmatpush.bf16.msra.mxu3 %v1990_v25 }
  0x52   :  { %1196 = vmatpush.bf16.msra.mxu0 %v1965_v26 }
  0x53   :  { %1209 = vmatpush.bf16.msra.mxu1 %v1973_v27 }
  0x54   :  { %1222 = vmatpush.bf16.msra.mxu2 %v1981_v28 }
  0x55   :  { %1235 = vmatpush.bf16.msra.mxu3 %v1989_v29 }
  0x56   :  { %1197 = vmatpush.bf16.msra.mxu0 %v1964_v30 }
  0x57   :  { %1210 = vmatpush.bf16.msra.mxu1 %v1972_v31 }
  0x58   :  { %1223 = vmatpush.bf16.msra.mxu2 %v1980_v32 }
  0x59   :  { %1236 = vmatpush.bf16.msra.mxu3 %v1988_v33 }
  0x5a   :  { %1198 = vmatpush.bf16.msra.mxu0 %v1963_v34 }
  0x5b   :  { %1211 = vmatpush.bf16.msra.mxu1 %v1971_v35 }
  0x5c   :  { %1224 = vmatpush.bf16.msra.mxu2 %v1979_v36 }
  0x5d   :  { %1237 = vmatpush.bf16.msra.mxu3 %v1987_v37  ;;  %v2029_v37 = vld [vmem:[%s2504_s3 + $0x18] sm:$0xff] }
  0x5e   :  { %1199 = vmatpush.bf16.msra.mxu0 %v1962_v38 }
  0x5f   :  { %1212 = vmatpush.bf16.msra.mxu1 %v1970_v39 }
  0x60   :  { %1225 = vmatpush.bf16.msra.mxu2 %v1978_v40 }
  0x61   :  { %1238 = vmatpush.bf16.msra.mxu3 %v1986_v41  ;;  %1200 = vmatmul.bf16.vlgmr.msra.gmra.mxu0 %v296_v46  ;;  %v2028_v41 = vld [vmem:[%s2504_s3 + $0x10] sm:$0xff] }
  0x62   :  { %1244 = vmatpush.bf16.msrb.mxu0 %v2001_v42  ;;  %1213 = vmatmul.bf16.vlgmr.msra.gmra.mxu1 %v297_v48  ;;  %v2026_v48 = vld [vmem:[%s2504_s3] sm:$0xff] }
  0x63   :  { %1257 = vmatpush.bf16.msrb.mxu1 %v2009_v43  ;;  %1226 = vmatmul.bf16.vlgmr.msra.gmra.mxu2 %v298_v47  ;;  %v2027_v43 = vld [vmem:[%s2504_s3 + $0x8] sm:$0xff] }
  0x64   :  { %1270 = vmatpush.bf16.msrb.mxu2 %v2017_v44  ;;  %1239 = vmatmul.bf16.vlgmr.msra.gmra.mxu3 %v299_v49 }
  0x65   :  { %1283 = vmatpush.bf16.msrb.mxu3 %v2025_v45 }
  0x66   :  { %1245 = vmatpush.bf16.msrb.mxu0 %v2000_v50 }
  0x67   :  { %1258 = vmatpush.bf16.msrb.mxu1 %v2008_v51 }
  0x68   :  { %1271 = vmatpush.bf16.msrb.mxu2 %v2016_v52 }
  0x69   :  { %1284 = vmatpush.bf16.msrb.mxu3 %v2024_v53 }
  0x6a   :  { %1246 = vmatpush.bf16.msrb.mxu0 %v1999_v54 }
  0x6b   :  { %1259 = vmatpush.bf16.msrb.mxu1 %v2007_v55 }
  0x6c   :  { %1272 = vmatpush.bf16.msrb.mxu2 %v2015_v56 }
  0x6d   :  { %1285 = vmatpush.bf16.msrb.mxu3 %v2023_v57 }
  0x6e   :  { %1247 = vmatpush.bf16.msrb.mxu0 %v1998_v58 }
  0x6f   :  { %1260 = vmatpush.bf16.msrb.mxu1 %v2006_v59 }
  0x70   :  { %1273 = vmatpush.bf16.msrb.mxu2 %v2014_v60 }
  0x71   :  { %1286 = vmatpush.bf16.msrb.mxu3 %v2022_v61 }
  0x72   :  { %1248 = vmatpush.bf16.msrb.mxu0 %v1997_v62 }
  0x73   :  { %1261 = vmatpush.bf16.msrb.mxu1 %v2005_v63 }
  0x74   :  { %1274 = vmatpush.bf16.msrb.mxu2 %v2013_v0 }
  0x75   :  { %1287 = vmatpush.bf16.msrb.mxu3 %v2021_v1 }
  0x76   :  { %1249 = vmatpush.bf16.msrb.mxu0 %v1996_v2 }
  0x77   :  { %1262 = vmatpush.bf16.msrb.mxu1 %v2004_v3 }
  0x78   :  { %1275 = vmatpush.bf16.msrb.mxu2 %v2012_v4 }
  0x79   :  { %1288 = vmatpush.bf16.msrb.mxu3 %v2020_v5 }
  0x7a   :  { %1250 = vmatpush.bf16.msrb.mxu0 %v1995_v6 }
  0x7b   :  { %1263 = vmatpush.bf16.msrb.mxu1 %v2003_v7 }
  0x7c   :  { %1276 = vmatpush.bf16.msrb.mxu2 %v2011_v8 }
  0x7d   :  { %1289 = vmatpush.bf16.msrb.mxu3 %v2019_v9  ;;  %v2032_v9 = vld [vmem:[%s2505_s4] ss:$0 sm:$0xff] }
  0x7e   :  { %1251 = vmatpush.bf16.msrb.mxu0 %v1994_v10 }
  0x7f   :  { %1264 = vmatpush.bf16.msrb.mxu1 %v2002_v11 }
  0x80   :  { %1277 = vmatpush.bf16.msrb.mxu2 %v2010_v12 }
  0x81   :  { %1290 = vmatpush.bf16.msrb.mxu3 %v2018_v13  ;;  %1252 = vmatmul.bf16.vlgmr.msrb.gmra.mxu0 %v300_v14 }
  0x82   :  { %1265 = vmatmul.bf16.vlgmr.msrb.gmra.mxu1 %v301_v15  ;;  %1342 = vmatpush.bf16.msra.mxu0 %v2029_v37 }
  0x83   :  { %1278 = vmatmul.bf16.vlgmr.msrb.gmra.mxu2 %v302_v16 }
  0x84   :  { %1291 = vmatmul.bf16.vlgmr.msrb.gmra.mxu3 %v303_v17 }
  0x86   :  { %1343 = vmatpush.bf16.msra.mxu0 %v2028_v41 }
  0x8a   :  { %1344 = vmatpush.bf16.msra.mxu0 %v2027_v43 }
  0x8e   :  { %1345 = vmatpush.bf16.msra.mxu0 %v2026_v48 }
  0x9e   :  { %v1097_v19 = vpop.f32.mrf.mxu0 }
  0x9f   :  { %v1098_v20 = vadd.f32 %v2031_v18, %v1097_v19  ;;  %v1110_v21 = vpop.f32.mrf.mxu1 }
  0xa1   :  { %v1111_v22 = vadd.f32 %v1110_v21, %v1098_v20 }
  0xa6   :  { %v1123_v23 = vpop.f32.mrf.mxu2  ;;  %v1099_v26 = vpop.f32.mrf.mxu0 }
  0xa7   :  { %v1124_v24 = vadd.f32 %v1123_v23, %v1111_v22  ;;  %v1136_v25 = vpop.f32.mrf.mxu3  ;;  %v1112_v28 = vpop.f32.mrf.mxu1 }
  0xa9   :  { %v1137_v27 = vadd.f32 %v1136_v25, %v1124_v24 }
  0xae   :  { %v1125_v29 = vpop.f32.mrf.mxu2 }
  0xaf   :  { %v1138_v30 = vpop.f32.mrf.mxu3 }
  0xbe   :  { %v1149_v31 = vpop.f32.mrf.mxu0 }
  0xbf   :  { %v1162_v32 = vpop.f32.mrf.mxu1  ;;  %v1150_v44 = vadd.f32 %v1149_v31, %v1137_v27 }
  0xc1   :  { %v1163_v49 = vadd.f32 %v1162_v32, %v1150_v44 }
  0xc6   :  { %v1175_v33 = vpop.f32.mrf.mxu2  ;;  %v1151_v35 = vpop.f32.mrf.mxu0 }
  0xc7   :  { %v1188_v34 = vpop.f32.mrf.mxu3  ;;  %v1164_v36 = vpop.f32.mrf.mxu1  ;;  %v1176_v51 = vadd.f32 %v1175_v33, %v1163_v49 }
  0xc9   :  { %v1189_v54 = vadd.f32 %v1188_v34, %v1176_v51 }
  0xce   :  { %v1177_v38 = vpop.f32.mrf.mxu2 }
  0xcf   :  { %v1190_v39 = vpop.f32.mrf.mxu3 }
  0xde   :  { %v1201_v40 = vpop.f32.mrf.mxu0 }
  0xdf   :  { %v1214_v42 = vpop.f32.mrf.mxu1  ;;  %v1202_v55 = vadd.f32 %v1201_v40, %v1189_v54 }
  0xe1   :  { %v1215_v56 = vadd.f32 %v1214_v42, %v1202_v55 }
  0xe6   :  { %v1227_v45 = vpop.f32.mrf.mxu2  ;;  %v1203_v47 = vpop.f32.mrf.mxu0 }
  0xe7   :  { %v1240_v46 = vpop.f32.mrf.mxu3  ;;  %v1216_v50 = vpop.f32.mrf.mxu1  ;;  %v1228_v57 = vadd.f32 %v1227_v45, %v1215_v56 }
  0xe9   :  { %v1241_v58 = vadd.f32 %v1240_v46, %v1228_v57 }
  0xee   :  { %v1229_v52 = vpop.f32.mrf.mxu2 }
  0xef   :  { %v1242_v53 = vpop.f32.mrf.mxu3 }
  0xfe   :  { %v1253_v59 = vpop.f32.mrf.mxu0 }
  0xff   :  { %v1266_v60 = vpop.f32.mrf.mxu1  ;;  %v1254_v61 = vadd.f32 %v1253_v59, %v1241_v58 }
 0x101   :  { %v1267_v62 = vadd.f32 %v1266_v60, %v1254_v61 }
 0x106   :  { %v1279_v63 = vpop.f32.mrf.mxu2  ;;  %v1255_v2 = vpop.f32.mrf.mxu0 }
 0x107   :  { %v1292_v0 = vpop.f32.mrf.mxu3  ;;  %v1280_v1 = vadd.f32 %v1279_v63, %v1267_v62  ;;  %v1268_v3 = vpop.f32.mrf.mxu1 }
 0x109   :  { %v1293_v4 = vadd.f32 %v1292_v0, %v1280_v1 }
 0x10b   :  { %v1296_v5 = vmax.f32 %v1293_v4, 0.0 }
 0x10d   :  { %v1297_v6 = vpack.c.bf16 %v1296_v5, %v1296_v5 }
 0x10e   :  { %v1281_v7 = vpop.f32.mrf.mxu2 }
 0x10f   :  { %v1294_v8 = vpop.f32.mrf.mxu3  ;;  %1897 = vmatmul.msk.bf16.vlgmr.msra.gmra.mxu0 %vm1334_vm0, %v1297_v6 }
 0x18c   :  { %v1347_v10 = vpop.f32.mrf.mxu0 }
 0x18d   :  { %v1348_v11 = vadd.f32 %v2032_v9, %v1347_v10 }
 0x18f   :  { %1352 = vst.msk [vmem:[#allocation2] sm:$0x3] %vm1351_vm1, %v1348_v11 }
 0x190   :  { %1363 = dma.vmem_to_hbm [thread:$0]  %s1359_s6, 32, %s1361_s9, [#allocation3]  }
 0x194   :  { %v1349_v12 = vpop.f32.mrf.mxu0 }
 0x195   :  { %2057 = dma.done.wait [#allocation3], 32  }
 0x196   :  { %2058 = vsyncadd [#allocation3], 4294967264 }
 0x197   :  { %1368 = vsyncpa [#allocation3], 1 }

</bundles_post_ra>
